<compile_context>
chip_gen: v5e
topology: v5e:2x2
jax: 0.10.0
libtpu: 0.0.40
codegen_flags: <defaults>
</compile_context>

<pallas_src>
import jax
import jax.numpy as jnp
from jax import lax
from jax.experimental import pallas as pl
from jax.experimental.pallas import tpu as pltpu
import numpy as np

# ---- config (small shapes consistent with the module) ----
EMBED_DIM = 300          # siamese_bert_config['embed_dim']
HIDDEN = 64              # siamese_bert_config['hidden_dim']
T = 8                    # sequence length
B = 2                    # per-sentence batch
B2 = 2 * B               # body + pun stacked along batch
VOCAB = 50
POLARITIES = 3           # opt.polarities_dim


# ---------------------------------------------------------------------------
# Fused Pallas kernel: embedding gather + masked BiLSTM + attention pooling +
# dense, for the batch-stacked [body; pun] sentences.
# ---------------------------------------------------------------------------
def _siamese_kernel(idx_s_ref, idx_v_ref, embed_ref,
                    wih_ref, whh_ref, b_ref, w1b_ref, wdb_ref,
                    out_ref,
                    x2_ref, gx_ref, m2_ref):
    """
    idx_s_ref : [B2, T]        int32 SMEM   token ids (scalar reads for gather)
    idx_v_ref : [B2, T]        int32 VMEM   same ids (vectorised mask build)
    embed_ref : [VOCAB, 1, E]  f32   VMEM   frozen embedding table
    wih_ref   : [E, 8H]        bf16         packed W_ih (fwd lanes [:4H], bwd [4H:])
    whh_ref   : [H, 8H]        bf16         packed W_hh
    b_ref     : [1, 8H]        f32          packed gate bias (order i, f, g, o)
    w1b_ref   : [2H+1, 2H]     f32          weight1 rows [:2H], weight2 row [2H]
    wdb_ref   : [4H+1, P]      f32          dense weight rows [:4H], bias row [4H]
    out_ref   : [B, P]         f32          logits
    x2_ref    : [T*B2, E]      f32   VMEM scratch   time-major embeddings
    gx_ref    : [T*B2, 8H]     f32   VMEM scratch   hoisted input projections
    m2_ref    : [T*B2, 2H]     f32   VMEM scratch   BiLSTM outputs (fwd|bwd lanes)
    """
    H = HIDDEN
    H2 = 2 * H
    H4 = 4 * H

    # ---- fused embedding gather: build time-major x2 (row = t*B2 + b) -------
    for t in range(T):
        for b in range(B2):
            tok = idx_s_ref[b, t]                       # scalar id from SMEM
            r = t * B2 + b
            x2_ref[r:r + 1, :] = embed_ref[tok]         # (1, E) f32 row copy

    # ---- one hoisted input-projection matmul for BOTH directions (bf16) -----
    x2 = x2_ref[...].astype(jnp.bfloat16)               # (32, 300)
    gx_ref[...] = (jnp.dot(x2, wih_ref[...],
                           preferred_element_type=jnp.float32)
                   + b_ref[...])                        # (32, 512) f32

    # ---- per-step keep masks, precomputed once, reused by both directions ---
    idxv = idx_v_ref[...]                               # (B2, T) int32
    keep = [jnp.broadcast_to(idxv[:, t:t + 1], (B2, H)) != 0 for t in range(T)]

    # lane mask selecting the g-gate lanes; tanh(x) = 2*sigmoid(2x) - 1 lets us
    # run a single sigmoid over the whole gate block (one EUP pass per step).
    lane = lax.broadcasted_iota(jnp.int32, (B2, H4), 1)
    is_g = (lane >= 2 * H) & (lane < 3 * H)

    def run_direction(gate_lo, out_lo, t_order):
        whh = whh_ref[:, gate_lo:gate_lo + H4]          # (H, 4H) bf16, hoisted
        h = jnp.zeros((B2, H), jnp.float32)
        c = jnp.zeros((B2, H), jnp.float32)
        for t in t_order:                               # fully unrolled
            r0 = t * B2
            # gx load is address-static (off the h->h dependency chain)
            gates = (gx_ref[r0:r0 + B2, gate_lo:gate_lo + H4]
                     + jnp.dot(h.astype(jnp.bfloat16), whh,
                               preferred_element_type=jnp.float32))
            pre = jnp.where(is_g, gates * 2.0, gates)
            sg = jax.nn.sigmoid(pre)                    # single EUP pass
            act = jnp.where(is_g, 2.0 * sg - 1.0, sg)
            i_g = act[:, 0:H]
            f_g = act[:, H:2 * H]
            g_g = act[:, 2 * H:3 * H]
            o_g = act[:, 3 * H:4 * H]
            c_new = f_g * c + i_g * g_g
            h_new = o_g * jnp.tanh(c_new)
            # pack_padded_sequence semantics: freeze the state past the
            # sequence length, emit zeros at padded positions.
            k = keep[t]
            c = jnp.where(k, c_new, c)
            h = jnp.where(k, h_new, h)
            m2_ref[r0:r0 + B2, out_lo:out_lo + H] = jnp.where(k, h_new, 0.0)

    run_direction(0, 0, range(T))                       # forward
    run_direction(H4, H, range(T - 1, -1, -1))          # backward

    # ---- attention pooling (softmax over T; padded slots included, as in the
    #      original PyTorch model), done with lane-dense MXU matmuls ----------
    M2 = m2_ref[...]                                    # (T*B2, 2H) = (32,128)
    w1 = w1b_ref[0:H2, :]                               # (128, 128)
    w2 = w1b_ref[H2:H2 + 1, :]                          # (1, 128)
    score = jnp.tanh(jnp.dot(M2, w1, preferred_element_type=jnp.float32))
    logit = jnp.sum(score * w2, axis=-1, keepdims=True)  # (32, 1)
    e = jnp.exp(logit)                                   # bounded; no max needed
    # selection matrix S[b, r] = 1 iff row r (= t*B2 + b') belongs to batch b
    col = lax.broadcasted_iota(jnp.int32, (B2, T * B2), 1)
    row = lax.broadcasted_iota(jnp.int32, (B2, T * B2), 0)
    S = (col % B2 == row).astype(jnp.float32)            # (B2, T*B2)
    num = jnp.dot(S, e * M2, preferred_element_type=jnp.float32)   # (B2, 2H)
    den = jnp.dot(S, e, preferred_element_type=jnp.float32)        # (B2, 1)
    rep = num / den                                                 # (B2, 2H)

    # ---- fused dense layer: cat(body_rep, pun_rep) @ Wd + bd ----------------
    out_ref[...] = (
        jnp.dot(rep[0:B, :], wdb_ref[0:H2, :],
                preferred_element_type=jnp.float32)
        + jnp.dot(rep[B:B2, :], wdb_ref[H2:2 * H2, :],
                  preferred_element_type=jnp.float32)
        + wdb_ref[2 * H2:2 * H2 + 1, :])


# ---------------------------------------------------------------------------
# Parameter packing (done once, outside the per-call path).
# ---------------------------------------------------------------------------
def pack_params(p, embed):
    return dict(
        embed3=embed.astype(jnp.float32).reshape(VOCAB, 1, EMBED_DIM),
        wih=jnp.concatenate([p['wih_f'], p['wih_b']],
                            axis=1).astype(jnp.bfloat16),          # [E, 8H]
        whh=jnp.concatenate([p['whh_f'], p['whh_b']],
                            axis=1).astype(jnp.bfloat16),          # [H, 8H]
        b=jnp.concatenate([p['b_f'], p['b_b']],
                          axis=1).astype(jnp.float32),             # [1, 8H]
        w1b=jnp.concatenate([p['w1'], p['w2']],
                            axis=0).astype(jnp.float32),           # [2H+1, 2H]
        wdb=jnp.concatenate([p['wd'], p['bd']],
                            axis=0).astype(jnp.float32),           # [4H+1, P]
    )


# ---------------------------------------------------------------------------
# Wrapper: only a tiny index concat in XLA, then one pallas_call.
# ---------------------------------------------------------------------------
def _vmem():
    return pl.BlockSpec(memory_space=pltpu.MemorySpace.VMEM)


def _smem():
    return pl.BlockSpec(memory_space=pltpu.MemorySpace.SMEM)


def siamese_forward(body_idx, pun_idx, packed):
    idx_all = jnp.concatenate([body_idx, pun_idx], axis=0).astype(jnp.int32)

    return pl.pallas_call(
        _siamese_kernel,
        out_shape=jax.ShapeDtypeStruct((B, POLARITIES), jnp.float32),
        in_specs=[_smem(), _vmem(), _vmem(), _vmem(),
                  _vmem(), _vmem(), _vmem(), _vmem()],
        out_specs=_vmem(),
        scratch_shapes=[
            pltpu.VMEM((T * B2, EMBED_DIM), jnp.float32),   # x2
            pltpu.VMEM((T * B2, 8 * HIDDEN), jnp.float32),  # gx (fwd|bwd)
            pltpu.VMEM((T * B2, 2 * HIDDEN), jnp.float32),  # BiLSTM outputs
        ],
    )(idx_all, idx_all, packed['embed3'], packed['wih'], packed['whh'],
      packed['b'], packed['w1b'], packed['wdb'])


# ---------------------------------------------------------------------------
# Pure-JAX reference (module math, f32) for the correctness check.
# ---------------------------------------------------------------------------
def _ref_forward(body_idx, pun_idx, embed, p):
    wih_f = p['wih_f'].astype(jnp.float32)
    wih_b = p['wih_b'].astype(jnp.float32)
    whh_f = p['whh_f'].astype(jnp.float32)
    whh_b = p['whh_b'].astype(jnp.float32)

    def encode(idx):
        emb = jnp.take(embed, idx, axis=0).astype(jnp.float32)    # [B, T, E]
        x = jnp.transpose(emb, (1, 0, 2))                         # [T, B, E]
        mask = (idx != 0).astype(jnp.float32).T[:, :, None]       # [T, B, 1]

        def direction(x_seq, m_seq, wih, whh, bias):
            def step(carry, inp):
                h, c = carry
                xt, mt = inp
                gates = xt @ wih + h @ whh + bias
                i = jax.nn.sigmoid(gates[:, :HIDDEN])
                f = jax.nn.sigmoid(gates[:, HIDDEN:2 * HIDDEN])
                g = jnp.tanh(gates[:, 2 * HIDDEN:3 * HIDDEN])
                o = jax.nn.sigmoid(gates[:, 3 * HIDDEN:])
                c_new = f * c + i * g
                h_new = o * jnp.tanh(c_new)
                c = jnp.where(mt > 0, c_new, c)
                h = jnp.where(mt > 0, h_new, h)
                return (h, c), h * mt
            init = (jnp.zeros((B, HIDDEN), jnp.float32),
                    jnp.zeros((B, HIDDEN), jnp.float32))
            _, outs = lax.scan(step, init, (x_seq, m_seq))
            return outs                                            # [T, B, H]

        mf = direction(x, mask, wih_f, whh_f, p['b_f'][0])
        mb = direction(x[::-1], mask[::-1], wih_b, whh_b, p['b_b'][0])[::-1]
        M = jnp.concatenate([mf, mb], axis=-1)                     # [T, B, 2H]
        score = jnp.tanh(M @ p['w1'])
        att_logit = jnp.sum(score * p['w2'][0], axis=-1, keepdims=True)
        att = jax.nn.softmax(att_logit, axis=0)
        return jnp.sum(M * att, axis=0)                            # [B, 2H]

    rep = jnp.concatenate([encode(body_idx), encode(pun_idx)], axis=-1)
    return rep @ p['wd'] + p['bd'][0]


# ---------------------------------------------------------------------------
if __name__ == "__main__":
    key = jax.random.PRNGKey(0)
    keys = jax.random.split(key, 13)

    def u(k, shape, lo=-0.1, hi=0.1):
        return jax.random.uniform(k, shape, jnp.float32, lo, hi)

    embed = u(keys[0], (VOCAB, EMBED_DIM))
    embed = embed.at[0].set(0.0)       # padding row of the frozen embedding table

    params = dict(
        # matmul weights stored as bf16 (what the kernel feeds the MXU);
        # the reference upcasts the same stored values.
        wih_f=u(keys[1], (EMBED_DIM, 4 * HIDDEN)).astype(jnp.bfloat16),
        whh_f=u(keys[2], (HIDDEN, 4 * HIDDEN)).astype(jnp.bfloat16),
        b_f=u(keys[3], (1, 4 * HIDDEN)),
        wih_b=u(keys[4], (EMBED_DIM, 4 * HIDDEN)).astype(jnp.bfloat16),
        whh_b=u(keys[5], (HIDDEN, 4 * HIDDEN)).astype(jnp.bfloat16),
        b_b=u(keys[6], (1, 4 * HIDDEN)),
        w1=u(keys[7], (2 * HIDDEN, 2 * HIDDEN)),
        w2=u(keys[8], (1, 2 * HIDDEN)),
        wd=u(keys[9], (4 * HIDDEN, POLARITIES)),
        bd=u(keys[10], (1, POLARITIES)),
    )
    packed = pack_params(params, embed)

    body_idx = jax.random.randint(keys[11], (B, T), 1, VOCAB)
    pun_idx = jax.random.randint(keys[12], (B, T), 1, VOCAB)
    # variable lengths (zeros are padding, like in the PyTorch model)
    body_idx = body_idx.at[1, 5:].set(0)
    pun_idx = pun_idx.at[0, 6:].set(0)

    logits = jax.jit(siamese_forward)(body_idx, pun_idx, packed)
    logits = jax.block_until_ready(logits)

    ref = jax.block_until_ready(_ref_forward(body_idx, pun_idx, embed, params))
    assert logits.shape == (B, POLARITIES)
    np.testing.assert_allclose(np.asarray(logits), np.asarray(ref),
                               rtol=5e-3, atol=5e-3)
    print("KERNEL_OK")
</pallas_src>

<mosaic_0001>
module attributes {stable_mosaic.version = 11 : i64} {
  func.func @_siamese_kernel(%arg0: memref<4x8xi32, #tpu.memory_space<smem>>, %arg1: memref<4x8xi32, #tpu.memory_space<vmem>>, %arg2: memref<50x1x300xf32, #tpu.memory_space<vmem>>, %arg3: memref<300x512xbf16, #tpu.memory_space<vmem>>, %arg4: memref<64x512xbf16, #tpu.memory_space<vmem>>, %arg5: memref<1x512xf32, #tpu.memory_space<vmem>>, %arg6: memref<129x128xf32, #tpu.memory_space<vmem>>, %arg7: memref<257x3xf32, #tpu.memory_space<vmem>>, %arg8: memref<2x3xf32, #tpu.memory_space<vmem>>, %arg9: memref<32x300xf32, #tpu.memory_space<vmem>>, %arg10: memref<32x512xf32, #tpu.memory_space<vmem>>, %arg11: memref<32x128xf32, #tpu.memory_space<vmem>>) attributes {dimension_semantics = [], scalar_prefetch = 0 : i64, scratch_operands = 3 : i64, tpu.core_type = #tpu.core_type<tc>} {
    %c0 = arith.constant 0 : index
    %c0_0 = arith.constant 0 : index
    %0 = memref.load %arg0[%c0, %c0_0] : memref<4x8xi32, #tpu.memory_space<smem>>
    %1 = arith.index_cast %0 : i32 to index
    %c0_1 = arith.constant 0 : index
    %c0_2 = arith.constant 0 : index
    %2 = vector.load %arg2[%1, %c0_1, %c0_2] : memref<50x1x300xf32, #tpu.memory_space<vmem>>, vector<1x1x300xf32>
    %3 = vector.shape_cast %2 : vector<1x1x300xf32> to vector<1x300xf32>
    %c0_3 = arith.constant 0 : index
    %c0_4 = arith.constant 0 : index
    %4 = vector.load %arg9[%c0_3, %c0_4] : memref<32x300xf32, #tpu.memory_space<vmem>>, vector<1x300xf32>
    tpu.vector_store %arg9[%c0_3, %c0_4], %3 {strides = array<i32>} : memref<32x300xf32, #tpu.memory_space<vmem>>, vector<1x300xf32>,
    %c1 = arith.constant 1 : index
    %c0_5 = arith.constant 0 : index
    %5 = memref.load %arg0[%c1, %c0_5] : memref<4x8xi32, #tpu.memory_space<smem>>
    %6 = arith.index_cast %5 : i32 to index
    %c0_6 = arith.constant 0 : index
    %c0_7 = arith.constant 0 : index
    %7 = vector.load %arg2[%6, %c0_6, %c0_7] : memref<50x1x300xf32, #tpu.memory_space<vmem>>, vector<1x1x300xf32>
    %8 = vector.shape_cast %7 : vector<1x1x300xf32> to vector<1x300xf32>
    %c1_8 = arith.constant 1 : index
    %c0_9 = arith.constant 0 : index
    %9 = vector.load %arg9[%c1_8, %c0_9] : memref<32x300xf32, #tpu.memory_space<vmem>>, vector<1x300xf32>
    tpu.vector_store %arg9[%c1_8, %c0_9], %8 {strides = array<i32>} : memref<32x300xf32, #tpu.memory_space<vmem>>, vector<1x300xf32>,
    %c2 = arith.constant 2 : index
    %c0_10 = arith.constant 0 : index
    %10 = memref.load %arg0[%c2, %c0_10] : memref<4x8xi32, #tpu.memory_space<smem>>
    %11 = arith.index_cast %10 : i32 to index
    %c0_11 = arith.constant 0 : index
    %c0_12 = arith.constant 0 : index
    %12 = vector.load %arg2[%11, %c0_11, %c0_12] : memref<50x1x300xf32, #tpu.memory_space<vmem>>, vector<1x1x300xf32>
    %13 = vector.shape_cast %12 : vector<1x1x300xf32> to vector<1x300xf32>
    %c2_13 = arith.constant 2 : index
    %c0_14 = arith.constant 0 : index
    %14 = vector.load %arg9[%c2_13, %c0_14] : memref<32x300xf32, #tpu.memory_space<vmem>>, vector<1x300xf32>
    tpu.vector_store %arg9[%c2_13, %c0_14], %13 {strides = array<i32>} : memref<32x300xf32, #tpu.memory_space<vmem>>, vector<1x300xf32>,
    %c3 = arith.constant 3 : index
    %c0_15 = arith.constant 0 : index
    %15 = memref.load %arg0[%c3, %c0_15] : memref<4x8xi32, #tpu.memory_space<smem>>
    %16 = arith.index_cast %15 : i32 to index
    %c0_16 = arith.constant 0 : index
    %c0_17 = arith.constant 0 : index
    %17 = vector.load %arg2[%16, %c0_16, %c0_17] : memref<50x1x300xf32, #tpu.memory_space<vmem>>, vector<1x1x300xf32>
    %18 = vector.shape_cast %17 : vector<1x1x300xf32> to vector<1x300xf32>
    %c3_18 = arith.constant 3 : index
    %c0_19 = arith.constant 0 : index
    %19 = vector.load %arg9[%c3_18, %c0_19] : memref<32x300xf32, #tpu.memory_space<vmem>>, vector<1x300xf32>
    tpu.vector_store %arg9[%c3_18, %c0_19], %18 {strides = array<i32>} : memref<32x300xf32, #tpu.memory_space<vmem>>, vector<1x300xf32>,
    %c0_20 = arith.constant 0 : index
    %c1_21 = arith.constant 1 : index
    %20 = memref.load %arg0[%c0_20, %c1_21] : memref<4x8xi32, #tpu.memory_space<smem>>
    %21 = arith.index_cast %20 : i32 to index
    %c0_22 = arith.constant 0 : index
    %c0_23 = arith.constant 0 : index
    %22 = vector.load %arg2[%21, %c0_22, %c0_23] : memref<50x1x300xf32, #tpu.memory_space<vmem>>, vector<1x1x300xf32>
    %23 = vector.shape_cast %22 : vector<1x1x300xf32> to vector<1x300xf32>
    %c4 = arith.constant 4 : index
    %c0_24 = arith.constant 0 : index
    %24 = vector.load %arg9[%c4, %c0_24] : memref<32x300xf32, #tpu.memory_space<vmem>>, vector<1x300xf32>
    tpu.vector_store %arg9[%c4, %c0_24], %23 {strides = array<i32>} : memref<32x300xf32, #tpu.memory_space<vmem>>, vector<1x300xf32>,
    %c1_25 = arith.constant 1 : index
    %c1_26 = arith.constant 1 : index
    %25 = memref.load %arg0[%c1_25, %c1_26] : memref<4x8xi32, #tpu.memory_space<smem>>
    %26 = arith.index_cast %25 : i32 to index
    %c0_27 = arith.constant 0 : index
    %c0_28 = arith.constant 0 : index
    %27 = vector.load %arg2[%26, %c0_27, %c0_28] : memref<50x1x300xf32, #tpu.memory_space<vmem>>, vector<1x1x300xf32>
    %28 = vector.shape_cast %27 : vector<1x1x300xf32> to vector<1x300xf32>
    %c5 = arith.constant 5 : index
    %c0_29 = arith.constant 0 : index
    %29 = vector.load %arg9[%c5, %c0_29] : memref<32x300xf32, #tpu.memory_space<vmem>>, vector<1x300xf32>
    tpu.vector_store %arg9[%c5, %c0_29], %28 {strides = array<i32>} : memref<32x300xf32, #tpu.memory_space<vmem>>, vector<1x300xf32>,
    %c2_30 = arith.constant 2 : index
    %c1_31 = arith.constant 1 : index
    %30 = memref.load %arg0[%c2_30, %c1_31] : memref<4x8xi32, #tpu.memory_space<smem>>
    %31 = arith.index_cast %30 : i32 to index
    %c0_32 = arith.constant 0 : index
    %c0_33 = arith.constant 0 : index
    %32 = vector.load %arg2[%31, %c0_32, %c0_33] : memref<50x1x300xf32, #tpu.memory_space<vmem>>, vector<1x1x300xf32>
    %33 = vector.shape_cast %32 : vector<1x1x300xf32> to vector<1x300xf32>
    %c6 = arith.constant 6 : index
    %c0_34 = arith.constant 0 : index
    %34 = vector.load %arg9[%c6, %c0_34] : memref<32x300xf32, #tpu.memory_space<vmem>>, vector<1x300xf32>
    tpu.vector_store %arg9[%c6, %c0_34], %33 {strides = array<i32>} : memref<32x300xf32, #tpu.memory_space<vmem>>, vector<1x300xf32>,
    %c3_35 = arith.constant 3 : index
    %c1_36 = arith.constant 1 : index
    %35 = memref.load %arg0[%c3_35, %c1_36] : memref<4x8xi32, #tpu.memory_space<smem>>
    %36 = arith.index_cast %35 : i32 to index
    %c0_37 = arith.constant 0 : index
    %c0_38 = arith.constant 0 : index
    %37 = vector.load %arg2[%36, %c0_37, %c0_38] : memref<50x1x300xf32, #tpu.memory_space<vmem>>, vector<1x1x300xf32>
    %38 = vector.shape_cast %37 : vector<1x1x300xf32> to vector<1x300xf32>
    %c7 = arith.constant 7 : index
    %c0_39 = arith.constant 0 : index
    %39 = vector.load %arg9[%c7, %c0_39] : memref<32x300xf32, #tpu.memory_space<vmem>>, vector<1x300xf32>
    tpu.vector_store %arg9[%c7, %c0_39], %38 {strides = array<i32>} : memref<32x300xf32, #tpu.memory_space<vmem>>, vector<1x300xf32>,
    %c0_40 = arith.constant 0 : index
    %c2_41 = arith.constant 2 : index
    %40 = memref.load %arg0[%c0_40, %c2_41] : memref<4x8xi32, #tpu.memory_space<smem>>
    %41 = arith.index_cast %40 : i32 to index
    %c0_42 = arith.constant 0 : index
    %c0_43 = arith.constant 0 : index
    %42 = vector.load %arg2[%41, %c0_42, %c0_43] : memref<50x1x300xf32, #tpu.memory_space<vmem>>, vector<1x1x300xf32>
    %43 = vector.shape_cast %42 : vector<1x1x300xf32> to vector<1x300xf32>
    %c8 = arith.constant 8 : index
    %c0_44 = arith.constant 0 : index
    %44 = vector.load %arg9[%c8, %c0_44] : memref<32x300xf32, #tpu.memory_space<vmem>>, vector<1x300xf32>
    tpu.vector_store %arg9[%c8, %c0_44], %43 {strides = array<i32>} : memref<32x300xf32, #tpu.memory_space<vmem>>, vector<1x300xf32>,
    %c1_45 = arith.constant 1 : index
    %c2_46 = arith.constant 2 : index
    %45 = memref.load %arg0[%c1_45, %c2_46] : memref<4x8xi32, #tpu.memory_space<smem>>
    %46 = arith.index_cast %45 : i32 to index
    %c0_47 = arith.constant 0 : index
    %c0_48 = arith.constant 0 : index
    %47 = vector.load %arg2[%46, %c0_47, %c0_48] : memref<50x1x300xf32, #tpu.memory_space<vmem>>, vector<1x1x300xf32>
    %48 = vector.shape_cast %47 : vector<1x1x300xf32> to vector<1x300xf32>
    %c9 = arith.constant 9 : index
    %c0_49 = arith.constant 0 : index
    %49 = vector.load %arg9[%c9, %c0_49] : memref<32x300xf32, #tpu.memory_space<vmem>>, vector<1x300xf32>
    tpu.vector_store %arg9[%c9, %c0_49], %48 {strides = array<i32>} : memref<32x300xf32, #tpu.memory_space<vmem>>, vector<1x300xf32>,
    %c2_50 = arith.constant 2 : index
    %c2_51 = arith.constant 2 : index
    %50 = memref.load %arg0[%c2_50, %c2_51] : memref<4x8xi32, #tpu.memory_space<smem>>
    %51 = arith.index_cast %50 : i32 to index
    %c0_52 = arith.constant 0 : index
    %c0_53 = arith.constant 0 : index
    %52 = vector.load %arg2[%51, %c0_52, %c0_53] : memref<50x1x300xf32, #tpu.memory_space<vmem>>, vector<1x1x300xf32>
    %53 = vector.shape_cast %52 : vector<1x1x300xf32> to vector<1x300xf32>
    %c10 = arith.constant 10 : index
    %c0_54 = arith.constant 0 : index
    %54 = vector.load %arg9[%c10, %c0_54] : memref<32x300xf32, #tpu.memory_space<vmem>>, vector<1x300xf32>
    tpu.vector_store %arg9[%c10, %c0_54], %53 {strides = array<i32>} : memref<32x300xf32, #tpu.memory_space<vmem>>, vector<1x300xf32>,
    %c3_55 = arith.constant 3 : index
    %c2_56 = arith.constant 2 : index
    %55 = memref.load %arg0[%c3_55, %c2_56] : memref<4x8xi32, #tpu.memory_space<smem>>
    %56 = arith.index_cast %55 : i32 to index
    %c0_57 = arith.constant 0 : index
    %c0_58 = arith.constant 0 : index
    %57 = vector.load %arg2[%56, %c0_57, %c0_58] : memref<50x1x300xf32, #tpu.memory_space<vmem>>, vector<1x1x300xf32>
    %58 = vector.shape_cast %57 : vector<1x1x300xf32> to vector<1x300xf32>
    %c11 = arith.constant 11 : index
    %c0_59 = arith.constant 0 : index
    %59 = vector.load %arg9[%c11, %c0_59] : memref<32x300xf32, #tpu.memory_space<vmem>>, vector<1x300xf32>
    tpu.vector_store %arg9[%c11, %c0_59], %58 {strides = array<i32>} : memref<32x300xf32, #tpu.memory_space<vmem>>, vector<1x300xf32>,
    %c0_60 = arith.constant 0 : index
    %c3_61 = arith.constant 3 : index
    %60 = memref.load %arg0[%c0_60, %c3_61] : memref<4x8xi32, #tpu.memory_space<smem>>
    %61 = arith.index_cast %60 : i32 to index
    %c0_62 = arith.constant 0 : index
    %c0_63 = arith.constant 0 : index
    %62 = vector.load %arg2[%61, %c0_62, %c0_63] : memref<50x1x300xf32, #tpu.memory_space<vmem>>, vector<1x1x300xf32>
    %63 = vector.shape_cast %62 : vector<1x1x300xf32> to vector<1x300xf32>
    %c12 = arith.constant 12 : index
    %c0_64 = arith.constant 0 : index
    %64 = vector.load %arg9[%c12, %c0_64] : memref<32x300xf32, #tpu.memory_space<vmem>>, vector<1x300xf32>
    tpu.vector_store %arg9[%c12, %c0_64], %63 {strides = array<i32>} : memref<32x300xf32, #tpu.memory_space<vmem>>, vector<1x300xf32>,
    %c1_65 = arith.constant 1 : index
    %c3_66 = arith.constant 3 : index
    %65 = memref.load %arg0[%c1_65, %c3_66] : memref<4x8xi32, #tpu.memory_space<smem>>
    %66 = arith.index_cast %65 : i32 to index
    %c0_67 = arith.constant 0 : index
    %c0_68 = arith.constant 0 : index
    %67 = vector.load %arg2[%66, %c0_67, %c0_68] : memref<50x1x300xf32, #tpu.memory_space<vmem>>, vector<1x1x300xf32>
    %68 = vector.shape_cast %67 : vector<1x1x300xf32> to vector<1x300xf32>
    %c13 = arith.constant 13 : index
    %c0_69 = arith.constant 0 : index
    %69 = vector.load %arg9[%c13, %c0_69] : memref<32x300xf32, #tpu.memory_space<vmem>>, vector<1x300xf32>
    tpu.vector_store %arg9[%c13, %c0_69], %68 {strides = array<i32>} : memref<32x300xf32, #tpu.memory_space<vmem>>, vector<1x300xf32>,
    %c2_70 = arith.constant 2 : index
    %c3_71 = arith.constant 3 : index
    %70 = memref.load %arg0[%c2_70, %c3_71] : memref<4x8xi32, #tpu.memory_space<smem>>
    %71 = arith.index_cast %70 : i32 to index
    %c0_72 = arith.constant 0 : index
    %c0_73 = arith.constant 0 : index
    %72 = vector.load %arg2[%71, %c0_72, %c0_73] : memref<50x1x300xf32, #tpu.memory_space<vmem>>, vector<1x1x300xf32>
    %73 = vector.shape_cast %72 : vector<1x1x300xf32> to vector<1x300xf32>
    %c14 = arith.constant 14 : index
    %c0_74 = arith.constant 0 : index
    %74 = vector.load %arg9[%c14, %c0_74] : memref<32x300xf32, #tpu.memory_space<vmem>>, vector<1x300xf32>
    tpu.vector_store %arg9[%c14, %c0_74], %73 {strides = array<i32>} : memref<32x300xf32, #tpu.memory_space<vmem>>, vector<1x300xf32>,
    %c3_75 = arith.constant 3 : index
    %c3_76 = arith.constant 3 : index
    %75 = memref.load %arg0[%c3_75, %c3_76] : memref<4x8xi32, #tpu.memory_space<smem>>
    %76 = arith.index_cast %75 : i32 to index
    %c0_77 = arith.constant 0 : index
    %c0_78 = arith.constant 0 : index
    %77 = vector.load %arg2[%76, %c0_77, %c0_78] : memref<50x1x300xf32, #tpu.memory_space<vmem>>, vector<1x1x300xf32>
    %78 = vector.shape_cast %77 : vector<1x1x300xf32> to vector<1x300xf32>
    %c15 = arith.constant 15 : index
    %c0_79 = arith.constant 0 : index
    %79 = vector.load %arg9[%c15, %c0_79] : memref<32x300xf32, #tpu.memory_space<vmem>>, vector<1x300xf32>
    tpu.vector_store %arg9[%c15, %c0_79], %78 {strides = array<i32>} : memref<32x300xf32, #tpu.memory_space<vmem>>, vector<1x300xf32>,
    %c0_80 = arith.constant 0 : index
    %c4_81 = arith.constant 4 : index
    %80 = memref.load %arg0[%c0_80, %c4_81] : memref<4x8xi32, #tpu.memory_space<smem>>
    %81 = arith.index_cast %80 : i32 to index
    %c0_82 = arith.constant 0 : index
    %c0_83 = arith.constant 0 : index
    %82 = vector.load %arg2[%81, %c0_82, %c0_83] : memref<50x1x300xf32, #tpu.memory_space<vmem>>, vector<1x1x300xf32>
    %83 = vector.shape_cast %82 : vector<1x1x300xf32> to vector<1x300xf32>
    %c16 = arith.constant 16 : index
    %c0_84 = arith.constant 0 : index
    %84 = vector.load %arg9[%c16, %c0_84] : memref<32x300xf32, #tpu.memory_space<vmem>>, vector<1x300xf32>
    tpu.vector_store %arg9[%c16, %c0_84], %83 {strides = array<i32>} : memref<32x300xf32, #tpu.memory_space<vmem>>, vector<1x300xf32>,
    %c1_85 = arith.constant 1 : index
    %c4_86 = arith.constant 4 : index
    %85 = memref.load %arg0[%c1_85, %c4_86] : memref<4x8xi32, #tpu.memory_space<smem>>
    %86 = arith.index_cast %85 : i32 to index
    %c0_87 = arith.constant 0 : index
    %c0_88 = arith.constant 0 : index
    %87 = vector.load %arg2[%86, %c0_87, %c0_88] : memref<50x1x300xf32, #tpu.memory_space<vmem>>, vector<1x1x300xf32>
    %88 = vector.shape_cast %87 : vector<1x1x300xf32> to vector<1x300xf32>
    %c17 = arith.constant 17 : index
    %c0_89 = arith.constant 0 : index
    %89 = vector.load %arg9[%c17, %c0_89] : memref<32x300xf32, #tpu.memory_space<vmem>>, vector<1x300xf32>
    tpu.vector_store %arg9[%c17, %c0_89], %88 {strides = array<i32>} : memref<32x300xf32, #tpu.memory_space<vmem>>, vector<1x300xf32>,
    %c2_90 = arith.constant 2 : index
    %c4_91 = arith.constant 4 : index
    %90 = memref.load %arg0[%c2_90, %c4_91] : memref<4x8xi32, #tpu.memory_space<smem>>
    %91 = arith.index_cast %90 : i32 to index
    %c0_92 = arith.constant 0 : index
    %c0_93 = arith.constant 0 : index
    %92 = vector.load %arg2[%91, %c0_92, %c0_93] : memref<50x1x300xf32, #tpu.memory_space<vmem>>, vector<1x1x300xf32>
    %93 = vector.shape_cast %92 : vector<1x1x300xf32> to vector<1x300xf32>
    %c18 = arith.constant 18 : index
    %c0_94 = arith.constant 0 : index
    %94 = vector.load %arg9[%c18, %c0_94] : memref<32x300xf32, #tpu.memory_space<vmem>>, vector<1x300xf32>
    tpu.vector_store %arg9[%c18, %c0_94], %93 {strides = array<i32>} : memref<32x300xf32, #tpu.memory_space<vmem>>, vector<1x300xf32>,
    %c3_95 = arith.constant 3 : index
    %c4_96 = arith.constant 4 : index
    %95 = memref.load %arg0[%c3_95, %c4_96] : memref<4x8xi32, #tpu.memory_space<smem>>
    %96 = arith.index_cast %95 : i32 to index
    %c0_97 = arith.constant 0 : index
    %c0_98 = arith.constant 0 : index
    %97 = vector.load %arg2[%96, %c0_97, %c0_98] : memref<50x1x300xf32, #tpu.memory_space<vmem>>, vector<1x1x300xf32>
    %98 = vector.shape_cast %97 : vector<1x1x300xf32> to vector<1x300xf32>
    %c19 = arith.constant 19 : index
    %c0_99 = arith.constant 0 : index
    %99 = vector.load %arg9[%c19, %c0_99] : memref<32x300xf32, #tpu.memory_space<vmem>>, vector<1x300xf32>
    tpu.vector_store %arg9[%c19, %c0_99], %98 {strides = array<i32>} : memref<32x300xf32, #tpu.memory_space<vmem>>, vector<1x300xf32>,
    %c0_100 = arith.constant 0 : index
    %c5_101 = arith.constant 5 : index
    %100 = memref.load %arg0[%c0_100, %c5_101] : memref<4x8xi32, #tpu.memory_space<smem>>
    %101 = arith.index_cast %100 : i32 to index
    %c0_102 = arith.constant 0 : index
    %c0_103 = arith.constant 0 : index
    %102 = vector.load %arg2[%101, %c0_102, %c0_103] : memref<50x1x300xf32, #tpu.memory_space<vmem>>, vector<1x1x300xf32>
    %103 = vector.shape_cast %102 : vector<1x1x300xf32> to vector<1x300xf32>
    %c20 = arith.constant 20 : index
    %c0_104 = arith.constant 0 : index
    %104 = vector.load %arg9[%c20, %c0_104] : memref<32x300xf32, #tpu.memory_space<vmem>>, vector<1x300xf32>
    tpu.vector_store %arg9[%c20, %c0_104], %103 {strides = array<i32>} : memref<32x300xf32, #tpu.memory_space<vmem>>, vector<1x300xf32>,
    %c1_105 = arith.constant 1 : index
    %c5_106 = arith.constant 5 : index
    %105 = memref.load %arg0[%c1_105, %c5_106] : memref<4x8xi32, #tpu.memory_space<smem>>
    %106 = arith.index_cast %105 : i32 to index
    %c0_107 = arith.constant 0 : index
    %c0_108 = arith.constant 0 : index
    %107 = vector.load %arg2[%106, %c0_107, %c0_108] : memref<50x1x300xf32, #tpu.memory_space<vmem>>, vector<1x1x300xf32>
    %108 = vector.shape_cast %107 : vector<1x1x300xf32> to vector<1x300xf32>
    %c21 = arith.constant 21 : index
    %c0_109 = arith.constant 0 : index
    %109 = vector.load %arg9[%c21, %c0_109] : memref<32x300xf32, #tpu.memory_space<vmem>>, vector<1x300xf32>
    tpu.vector_store %arg9[%c21, %c0_109], %108 {strides = array<i32>} : memref<32x300xf32, #tpu.memory_space<vmem>>, vector<1x300xf32>,
    %c2_110 = arith.constant 2 : index
    %c5_111 = arith.constant 5 : index
    %110 = memref.load %arg0[%c2_110, %c5_111] : memref<4x8xi32, #tpu.memory_space<smem>>
    %111 = arith.index_cast %110 : i32 to index
    %c0_112 = arith.constant 0 : index
    %c0_113 = arith.constant 0 : index
    %112 = vector.load %arg2[%111, %c0_112, %c0_113] : memref<50x1x300xf32, #tpu.memory_space<vmem>>, vector<1x1x300xf32>
    %113 = vector.shape_cast %112 : vector<1x1x300xf32> to vector<1x300xf32>
    %c22 = arith.constant 22 : index
    %c0_114 = arith.constant 0 : index
    %114 = vector.load %arg9[%c22, %c0_114] : memref<32x300xf32, #tpu.memory_space<vmem>>, vector<1x300xf32>
    tpu.vector_store %arg9[%c22, %c0_114], %113 {strides = array<i32>} : memref<32x300xf32, #tpu.memory_space<vmem>>, vector<1x300xf32>,
    %c3_115 = arith.constant 3 : index
    %c5_116 = arith.constant 5 : index
    %115 = memref.load %arg0[%c3_115, %c5_116] : memref<4x8xi32, #tpu.memory_space<smem>>
    %116 = arith.index_cast %115 : i32 to index
    %c0_117 = arith.constant 0 : index
    %c0_118 = arith.constant 0 : index
    %117 = vector.load %arg2[%116, %c0_117, %c0_118] : memref<50x1x300xf32, #tpu.memory_space<vmem>>, vector<1x1x300xf32>
    %118 = vector.shape_cast %117 : vector<1x1x300xf32> to vector<1x300xf32>
    %c23 = arith.constant 23 : index
    %c0_119 = arith.constant 0 : index
    %119 = vector.load %arg9[%c23, %c0_119] : memref<32x300xf32, #tpu.memory_space<vmem>>, vector<1x300xf32>
    tpu.vector_store %arg9[%c23, %c0_119], %118 {strides = array<i32>} : memref<32x300xf32, #tpu.memory_space<vmem>>, vector<1x300xf32>,
    %c0_120 = arith.constant 0 : index
    %c6_121 = arith.constant 6 : index
    %120 = memref.load %arg0[%c0_120, %c6_121] : memref<4x8xi32, #tpu.memory_space<smem>>
    %121 = arith.index_cast %120 : i32 to index
    %c0_122 = arith.constant 0 : index
    %c0_123 = arith.constant 0 : index
    %122 = vector.load %arg2[%121, %c0_122, %c0_123] : memref<50x1x300xf32, #tpu.memory_space<vmem>>, vector<1x1x300xf32>
    %123 = vector.shape_cast %122 : vector<1x1x300xf32> to vector<1x300xf32>
    %c24 = arith.constant 24 : index
    %c0_124 = arith.constant 0 : index
    %124 = vector.load %arg9[%c24, %c0_124] : memref<32x300xf32, #tpu.memory_space<vmem>>, vector<1x300xf32>
    tpu.vector_store %arg9[%c24, %c0_124], %123 {strides = array<i32>} : memref<32x300xf32, #tpu.memory_space<vmem>>, vector<1x300xf32>,
    %c1_125 = arith.constant 1 : index
    %c6_126 = arith.constant 6 : index
    %125 = memref.load %arg0[%c1_125, %c6_126] : memref<4x8xi32, #tpu.memory_space<smem>>
    %126 = arith.index_cast %125 : i32 to index
    %c0_127 = arith.constant 0 : index
    %c0_128 = arith.constant 0 : index
    %127 = vector.load %arg2[%126, %c0_127, %c0_128] : memref<50x1x300xf32, #tpu.memory_space<vmem>>, vector<1x1x300xf32>
    %128 = vector.shape_cast %127 : vector<1x1x300xf32> to vector<1x300xf32>
    %c25 = arith.constant 25 : index
    %c0_129 = arith.constant 0 : index
    %129 = vector.load %arg9[%c25, %c0_129] : memref<32x300xf32, #tpu.memory_space<vmem>>, vector<1x300xf32>
    tpu.vector_store %arg9[%c25, %c0_129], %128 {strides = array<i32>} : memref<32x300xf32, #tpu.memory_space<vmem>>, vector<1x300xf32>,
    %c2_130 = arith.constant 2 : index
    %c6_131 = arith.constant 6 : index
    %130 = memref.load %arg0[%c2_130, %c6_131] : memref<4x8xi32, #tpu.memory_space<smem>>
    %131 = arith.index_cast %130 : i32 to index
    %c0_132 = arith.constant 0 : index
    %c0_133 = arith.constant 0 : index
    %132 = vector.load %arg2[%131, %c0_132, %c0_133] : memref<50x1x300xf32, #tpu.memory_space<vmem>>, vector<1x1x300xf32>
    %133 = vector.shape_cast %132 : vector<1x1x300xf32> to vector<1x300xf32>
    %c26 = arith.constant 26 : index
    %c0_134 = arith.constant 0 : index
    %134 = vector.load %arg9[%c26, %c0_134] : memref<32x300xf32, #tpu.memory_space<vmem>>, vector<1x300xf32>
    tpu.vector_store %arg9[%c26, %c0_134], %133 {strides = array<i32>} : memref<32x300xf32, #tpu.memory_space<vmem>>, vector<1x300xf32>,
    %c3_135 = arith.constant 3 : index
    %c6_136 = arith.constant 6 : index
    %135 = memref.load %arg0[%c3_135, %c6_136] : memref<4x8xi32, #tpu.memory_space<smem>>
    %136 = arith.index_cast %135 : i32 to index
    %c0_137 = arith.constant 0 : index
    %c0_138 = arith.constant 0 : index
    %137 = vector.load %arg2[%136, %c0_137, %c0_138] : memref<50x1x300xf32, #tpu.memory_space<vmem>>, vector<1x1x300xf32>
    %138 = vector.shape_cast %137 : vector<1x1x300xf32> to vector<1x300xf32>
    %c27 = arith.constant 27 : index
    %c0_139 = arith.constant 0 : index
    %139 = vector.load %arg9[%c27, %c0_139] : memref<32x300xf32, #tpu.memory_space<vmem>>, vector<1x300xf32>
    tpu.vector_store %arg9[%c27, %c0_139], %138 {strides = array<i32>} : memref<32x300xf32, #tpu.memory_space<vmem>>, vector<1x300xf32>,
    %c0_140 = arith.constant 0 : index
    %c7_141 = arith.constant 7 : index
    %140 = memref.load %arg0[%c0_140, %c7_141] : memref<4x8xi32, #tpu.memory_space<smem>>
    %141 = arith.index_cast %140 : i32 to index
    %c0_142 = arith.constant 0 : index
    %c0_143 = arith.constant 0 : index
    %142 = vector.load %arg2[%141, %c0_142, %c0_143] : memref<50x1x300xf32, #tpu.memory_space<vmem>>, vector<1x1x300xf32>
    %143 = vector.shape_cast %142 : vector<1x1x300xf32> to vector<1x300xf32>
    %c28 = arith.constant 28 : index
    %c0_144 = arith.constant 0 : index
    %144 = vector.load %arg9[%c28, %c0_144] : memref<32x300xf32, #tpu.memory_space<vmem>>, vector<1x300xf32>
    tpu.vector_store %arg9[%c28, %c0_144], %143 {strides = array<i32>} : memref<32x300xf32, #tpu.memory_space<vmem>>, vector<1x300xf32>,
    %c1_145 = arith.constant 1 : index
    %c7_146 = arith.constant 7 : index
    %145 = memref.load %arg0[%c1_145, %c7_146] : memref<4x8xi32, #tpu.memory_space<smem>>
    %146 = arith.index_cast %145 : i32 to index
    %c0_147 = arith.constant 0 : index
    %c0_148 = arith.constant 0 : index
    %147 = vector.load %arg2[%146, %c0_147, %c0_148] : memref<50x1x300xf32, #tpu.memory_space<vmem>>, vector<1x1x300xf32>
    %148 = vector.shape_cast %147 : vector<1x1x300xf32> to vector<1x300xf32>
    %c29 = arith.constant 29 : index
    %c0_149 = arith.constant 0 : index
    %149 = vector.load %arg9[%c29, %c0_149] : memref<32x300xf32, #tpu.memory_space<vmem>>, vector<1x300xf32>
    tpu.vector_store %arg9[%c29, %c0_149], %148 {strides = array<i32>} : memref<32x300xf32, #tpu.memory_space<vmem>>, vector<1x300xf32>,
    %c2_150 = arith.constant 2 : index
    %c7_151 = arith.constant 7 : index
    %150 = memref.load %arg0[%c2_150, %c7_151] : memref<4x8xi32, #tpu.memory_space<smem>>
    %151 = arith.index_cast %150 : i32 to index
    %c0_152 = arith.constant 0 : index
    %c0_153 = arith.constant 0 : index
    %152 = vector.load %arg2[%151, %c0_152, %c0_153] : memref<50x1x300xf32, #tpu.memory_space<vmem>>, vector<1x1x300xf32>
    %153 = vector.shape_cast %152 : vector<1x1x300xf32> to vector<1x300xf32>
    %c30 = arith.constant 30 : index
    %c0_154 = arith.constant 0 : index
    %154 = vector.load %arg9[%c30, %c0_154] : memref<32x300xf32, #tpu.memory_space<vmem>>, vector<1x300xf32>
    tpu.vector_store %arg9[%c30, %c0_154], %153 {strides = array<i32>} : memref<32x300xf32, #tpu.memory_space<vmem>>, vector<1x300xf32>,
    %c3_155 = arith.constant 3 : index
    %c7_156 = arith.constant 7 : index
    %155 = memref.load %arg0[%c3_155, %c7_156] : memref<4x8xi32, #tpu.memory_space<smem>>
    %156 = arith.index_cast %155 : i32 to index
    %c0_157 = arith.constant 0 : index
    %c0_158 = arith.constant 0 : index
    %157 = vector.load %arg2[%156, %c0_157, %c0_158] : memref<50x1x300xf32, #tpu.memory_space<vmem>>, vector<1x1x300xf32>
    %158 = vector.shape_cast %157 : vector<1x1x300xf32> to vector<1x300xf32>
    %c31 = arith.constant 31 : index
    %c0_159 = arith.constant 0 : index
    %159 = vector.load %arg9[%c31, %c0_159] : memref<32x300xf32, #tpu.memory_space<vmem>>, vector<1x300xf32>
    tpu.vector_store %arg9[%c31, %c0_159], %158 {strides = array<i32>} : memref<32x300xf32, #tpu.memory_space<vmem>>, vector<1x300xf32>,
    %c0_160 = arith.constant 0 : index
    %c0_161 = arith.constant 0 : index
    %160 = vector.load %arg9[%c0_160, %c0_161] : memref<32x300xf32, #tpu.memory_space<vmem>>, vector<32x300xf32>
    %161 = arith.truncf %160 : vector<32x300xf32> to vector<32x300xbf16>
    %c0_162 = arith.constant 0 : index
    %c0_163 = arith.constant 0 : index
    %162 = vector.load %arg3[%c0_162, %c0_163] : memref<300x512xbf16, #tpu.memory_space<vmem>>, vector<300x512xbf16>
    %cst = arith.constant dense<0.000000e+00> : vector<32x512xf32>
    %163 = tpu.matmul %161, %162, %cst {dimension_numbers = #tpu.dot_dimension_numbers<[1], [0], [0], [1], [0, 0, 1, 1], [], []>} : vector<32x300xbf16>, vector<300x512xbf16>, vector<32x512xf32> -> vector<32x512xf32>
    %c0_164 = arith.constant 0 : index
    %c0_165 = arith.constant 0 : index
    %164 = vector.load %arg5[%c0_164, %c0_165] : memref<1x512xf32, #tpu.memory_space<vmem>>, vector<1x512xf32>
    %165 = vector.broadcast %164 : vector<1x512xf32> to vector<32x512xf32>
    %166 = arith.addf %163, %165 : vector<32x512xf32>
    %c0_166 = arith.constant 0 : index
    %c0_167 = arith.constant 0 : index
    %167 = vector.load %arg10[%c0_166, %c0_167] : memref<32x512xf32, #tpu.memory_space<vmem>>, vector<32x512xf32>
    tpu.vector_store %arg10[%c0_166, %c0_167], %166 {strides = array<i32>} : memref<32x512xf32, #tpu.memory_space<vmem>>, vector<32x512xf32>,
    %c0_168 = arith.constant 0 : index
    %c0_169 = arith.constant 0 : index
    %168 = vector.load %arg1[%c0_168, %c0_169] : memref<4x8xi32, #tpu.memory_space<vmem>>, vector<4x8xi32>
    %169 = vector.extract_strided_slice %168 {offsets = [0, 0], sizes = [4, 1], strides = [1, 1]} : vector<4x8xi32> to vector<4x1xi32>
    %170 = vector.shape_cast %169 : vector<4x1xi32> to vector<4x1xi32>
    %171 = vector.broadcast %170 : vector<4x1xi32> to vector<4x64xi32>
    %c0_i32 = arith.constant 0 : i32
    %172 = vector.broadcast %c0_i32 : i32 to vector<4x64xi32>
    %173 = arith.cmpi ne, %171, %172 : vector<4x64xi32>
    %174 = vector.extract_strided_slice %168 {offsets = [0, 1], sizes = [4, 1], strides = [1, 1]} : vector<4x8xi32> to vector<4x1xi32>
    %175 = vector.shape_cast %174 : vector<4x1xi32> to vector<4x1xi32>
    %176 = vector.broadcast %175 : vector<4x1xi32> to vector<4x64xi32>
    %c0_i32_170 = arith.constant 0 : i32
    %177 = vector.broadcast %c0_i32_170 : i32 to vector<4x64xi32>
    %178 = arith.cmpi ne, %176, %177 : vector<4x64xi32>
    %179 = vector.extract_strided_slice %168 {offsets = [0, 2], sizes = [4, 1], strides = [1, 1]} : vector<4x8xi32> to vector<4x1xi32>
    %180 = vector.shape_cast %179 : vector<4x1xi32> to vector<4x1xi32>
    %181 = vector.broadcast %180 : vector<4x1xi32> to vector<4x64xi32>
    %c0_i32_171 = arith.constant 0 : i32
    %182 = vector.broadcast %c0_i32_171 : i32 to vector<4x64xi32>
    %183 = arith.cmpi ne, %181, %182 : vector<4x64xi32>
    %184 = vector.extract_strided_slice %168 {offsets = [0, 3], sizes = [4, 1], strides = [1, 1]} : vector<4x8xi32> to vector<4x1xi32>
    %185 = vector.shape_cast %184 : vector<4x1xi32> to vector<4x1xi32>
    %186 = vector.broadcast %185 : vector<4x1xi32> to vector<4x64xi32>
    %c0_i32_172 = arith.constant 0 : i32
    %187 = vector.broadcast %c0_i32_172 : i32 to vector<4x64xi32>
    %188 = arith.cmpi ne, %186, %187 : vector<4x64xi32>
    %189 = vector.extract_strided_slice %168 {offsets = [0, 4], sizes = [4, 1], strides = [1, 1]} : vector<4x8xi32> to vector<4x1xi32>
    %190 = vector.shape_cast %189 : vector<4x1xi32> to vector<4x1xi32>
    %191 = vector.broadcast %190 : vector<4x1xi32> to vector<4x64xi32>
    %c0_i32_173 = arith.constant 0 : i32
    %192 = vector.broadcast %c0_i32_173 : i32 to vector<4x64xi32>
    %193 = arith.cmpi ne, %191, %192 : vector<4x64xi32>
    %194 = vector.extract_strided_slice %168 {offsets = [0, 5], sizes = [4, 1], strides = [1, 1]} : vector<4x8xi32> to vector<4x1xi32>
    %195 = vector.shape_cast %194 : vector<4x1xi32> to vector<4x1xi32>
    %196 = vector.broadcast %195 : vector<4x1xi32> to vector<4x64xi32>
    %c0_i32_174 = arith.constant 0 : i32
    %197 = vector.broadcast %c0_i32_174 : i32 to vector<4x64xi32>
    %198 = arith.cmpi ne, %196, %197 : vector<4x64xi32>
    %199 = vector.extract_strided_slice %168 {offsets = [0, 6], sizes = [4, 1], strides = [1, 1]} : vector<4x8xi32> to vector<4x1xi32>
    %200 = vector.shape_cast %199 : vector<4x1xi32> to vector<4x1xi32>
    %201 = vector.broadcast %200 : vector<4x1xi32> to vector<4x64xi32>
    %c0_i32_175 = arith.constant 0 : i32
    %202 = vector.broadcast %c0_i32_175 : i32 to vector<4x64xi32>
    %203 = arith.cmpi ne, %201, %202 : vector<4x64xi32>
    %204 = vector.extract_strided_slice %168 {offsets = [0, 7], sizes = [4, 1], strides = [1, 1]} : vector<4x8xi32> to vector<4x1xi32>
    %205 = vector.shape_cast %204 : vector<4x1xi32> to vector<4x1xi32>
    %206 = vector.broadcast %205 : vector<4x1xi32> to vector<4x64xi32>
    %c0_i32_176 = arith.constant 0 : i32
    %207 = vector.broadcast %c0_i32_176 : i32 to vector<4x64xi32>
    %208 = arith.cmpi ne, %206, %207 : vector<4x64xi32>
    %209 = tpu.iota {dimensions = array<i32: 1>} : vector<4x256xi32>
    %c128_i32 = arith.constant 128 : i32
    %210 = vector.broadcast %c128_i32 : i32 to vector<4x256xi32>
    %211 = arith.cmpi sge, %209, %210 : vector<4x256xi32>
    %c192_i32 = arith.constant 192 : i32
    %212 = vector.broadcast %c192_i32 : i32 to vector<4x256xi32>
    %213 = arith.cmpi slt, %209, %212 : vector<4x256xi32>
    %214 = arith.andi %211, %213 : vector<4x256xi1>
    %c0_177 = arith.constant 0 : index
    %c0_178 = arith.constant 0 : index
    %215 = vector.load %arg4[%c0_177, %c0_178] : memref<64x512xbf16, #tpu.memory_space<vmem>>, vector<64x256xbf16>
    %cst_179 = arith.constant 0.000000e+00 : f32
    %216 = vector.broadcast %cst_179 : f32 to vector<4x64xf32>
    %cst_180 = arith.constant 0.000000e+00 : f32
    %217 = vector.broadcast %cst_180 : f32 to vector<4x64xf32>
    %c0_181 = arith.constant 0 : index
    %c0_182 = arith.constant 0 : index
    %218 = vector.load %arg10[%c0_181, %c0_182] : memref<32x512xf32, #tpu.memory_space<vmem>>, vector<4x256xf32>
    %219 = arith.truncf %216 : vector<4x64xf32> to vector<4x64xbf16>
    %cst_183 = arith.constant dense<0.000000e+00> : vector<4x256xf32>
    %220 = tpu.matmul %219, %215, %cst_183 {dimension_numbers = #tpu.dot_dimension_numbers<[1], [0], [0], [1], [0, 0, 1, 1], [], []>} : vector<4x64xbf16>, vector<64x256xbf16>, vector<4x256xf32> -> vector<4x256xf32>
    %221 = arith.addf %218, %220 : vector<4x256xf32>
    %cst_184 = arith.constant 2.000000e+00 : f32
    %222 = vector.broadcast %cst_184 : f32 to vector<4x256xf32>
    %223 = arith.mulf %221, %222 : vector<4x256xf32>
    %224 = arith.select %214, %223, %221 : vector<4x256xi1>, vector<4x256xf32>
    %225 = arith.negf %224 : vector<4x256xf32>
    %226 = math.exp %225 : vector<4x256xf32>
    %cst_185 = arith.constant 1.000000e+00 : f32
    %227 = vector.broadcast %cst_185 : f32 to vector<4x256xf32>
    %228 = arith.addf %227, %226 : vector<4x256xf32>
    %229 = arith.divf %227, %228 : vector<4x256xf32>
    %cst_186 = arith.constant 2.000000e+00 : f32
    %230 = vector.broadcast %cst_186 : f32 to vector<4x256xf32>
    %231 = arith.mulf %230, %229 : vector<4x256xf32>
    %cst_187 = arith.constant 1.000000e+00 : f32
    %232 = vector.broadcast %cst_187 : f32 to vector<4x256xf32>
    %233 = arith.subf %231, %232 : vector<4x256xf32>
    %234 = arith.select %214, %233, %229 : vector<4x256xi1>, vector<4x256xf32>
    %235 = vector.extract_strided_slice %234 {offsets = [0, 0], sizes = [4, 64], strides = [1, 1]} : vector<4x256xf32> to vector<4x64xf32>
    %236 = vector.extract_strided_slice %234 {offsets = [0, 64], sizes = [4, 64], strides = [1, 1]} : vector<4x256xf32> to vector<4x64xf32>
    %237 = vector.extract_strided_slice %234 {offsets = [0, 128], sizes = [4, 64], strides = [1, 1]} : vector<4x256xf32> to vector<4x64xf32>
    %238 = vector.extract_strided_slice %234 {offsets = [0, 192], sizes = [4, 64], strides = [1, 1]} : vector<4x256xf32> to vector<4x64xf32>
    %239 = arith.mulf %236, %217 : vector<4x64xf32>
    %240 = arith.mulf %235, %237 : vector<4x64xf32>
    %241 = arith.addf %239, %240 : vector<4x64xf32>
    %242 = math.tanh %241 : vector<4x64xf32>
    %243 = arith.mulf %238, %242 : vector<4x64xf32>
    %244 = arith.select %173, %241, %217 : vector<4x64xi1>, vector<4x64xf32>
    %245 = arith.select %173, %243, %216 : vector<4x64xi1>, vector<4x64xf32>
    %cst_188 = arith.constant 0.000000e+00 : f32
    %246 = vector.broadcast %cst_188 : f32 to vector<4x64xf32>
    %247 = arith.select %173, %243, %246 : vector<4x64xi1>, vector<4x64xf32>
    %c0_189 = arith.constant 0 : index
    %c0_190 = arith.constant 0 : index
    %248 = vector.load %arg11[%c0_189, %c0_190] : memref<32x128xf32, #tpu.memory_space<vmem>>, vector<4x64xf32>
    tpu.vector_store %arg11[%c0_189, %c0_190], %247 {strides = array<i32>} : memref<32x128xf32, #tpu.memory_space<vmem>>, vector<4x64xf32>,
    %c4_191 = arith.constant 4 : index
    %c0_192 = arith.constant 0 : index
    %249 = vector.load %arg10[%c4_191, %c0_192] : memref<32x512xf32, #tpu.memory_space<vmem>>, vector<4x256xf32>
    %250 = arith.truncf %245 : vector<4x64xf32> to vector<4x64xbf16>
    %cst_193 = arith.constant dense<0.000000e+00> : vector<4x256xf32>
    %251 = tpu.matmul %250, %215, %cst_193 {dimension_numbers = #tpu.dot_dimension_numbers<[1], [0], [0], [1], [0, 0, 1, 1], [], []>} : vector<4x64xbf16>, vector<64x256xbf16>, vector<4x256xf32> -> vector<4x256xf32>
    %252 = arith.addf %249, %251 : vector<4x256xf32>
    %cst_194 = arith.constant 2.000000e+00 : f32
    %253 = vector.broadcast %cst_194 : f32 to vector<4x256xf32>
    %254 = arith.mulf %252, %253 : vector<4x256xf32>
    %255 = arith.select %214, %254, %252 : vector<4x256xi1>, vector<4x256xf32>
    %256 = arith.negf %255 : vector<4x256xf32>
    %257 = math.exp %256 : vector<4x256xf32>
    %cst_195 = arith.constant 1.000000e+00 : f32
    %258 = vector.broadcast %cst_195 : f32 to vector<4x256xf32>
    %259 = arith.addf %258, %257 : vector<4x256xf32>
    %260 = arith.divf %258, %259 : vector<4x256xf32>
    %cst_196 = arith.constant 2.000000e+00 : f32
    %261 = vector.broadcast %cst_196 : f32 to vector<4x256xf32>
    %262 = arith.mulf %261, %260 : vector<4x256xf32>
    %cst_197 = arith.constant 1.000000e+00 : f32
    %263 = vector.broadcast %cst_197 : f32 to vector<4x256xf32>
    %264 = arith.subf %262, %263 : vector<4x256xf32>
    %265 = arith.select %214, %264, %260 : vector<4x256xi1>, vector<4x256xf32>
    %266 = vector.extract_strided_slice %265 {offsets = [0, 0], sizes = [4, 64], strides = [1, 1]} : vector<4x256xf32> to vector<4x64xf32>
    %267 = vector.extract_strided_slice %265 {offsets = [0, 64], sizes = [4, 64], strides = [1, 1]} : vector<4x256xf32> to vector<4x64xf32>
    %268 = vector.extract_strided_slice %265 {offsets = [0, 128], sizes = [4, 64], strides = [1, 1]} : vector<4x256xf32> to vector<4x64xf32>
    %269 = vector.extract_strided_slice %265 {offsets = [0, 192], sizes = [4, 64], strides = [1, 1]} : vector<4x256xf32> to vector<4x64xf32>
    %270 = arith.mulf %267, %244 : vector<4x64xf32>
    %271 = arith.mulf %266, %268 : vector<4x64xf32>
    %272 = arith.addf %270, %271 : vector<4x64xf32>
    %273 = math.tanh %272 : vector<4x64xf32>
    %274 = arith.mulf %269, %273 : vector<4x64xf32>
    %275 = arith.select %178, %272, %244 : vector<4x64xi1>, vector<4x64xf32>
    %276 = arith.select %178, %274, %245 : vector<4x64xi1>, vector<4x64xf32>
    %cst_198 = arith.constant 0.000000e+00 : f32
    %277 = vector.broadcast %cst_198 : f32 to vector<4x64xf32>
    %278 = arith.select %178, %274, %277 : vector<4x64xi1>, vector<4x64xf32>
    %c4_199 = arith.constant 4 : index
    %c0_200 = arith.constant 0 : index
    %279 = vector.load %arg11[%c4_199, %c0_200] : memref<32x128xf32, #tpu.memory_space<vmem>>, vector<4x64xf32>
    tpu.vector_store %arg11[%c4_199, %c0_200], %278 {strides = array<i32>} : memref<32x128xf32, #tpu.memory_space<vmem>>, vector<4x64xf32>,
    %c8_201 = arith.constant 8 : index
    %c0_202 = arith.constant 0 : index
    %280 = vector.load %arg10[%c8_201, %c0_202] : memref<32x512xf32, #tpu.memory_space<vmem>>, vector<4x256xf32>
    %281 = arith.truncf %276 : vector<4x64xf32> to vector<4x64xbf16>
    %cst_203 = arith.constant dense<0.000000e+00> : vector<4x256xf32>
    %282 = tpu.matmul %281, %215, %cst_203 {dimension_numbers = #tpu.dot_dimension_numbers<[1], [0], [0], [1], [0, 0, 1, 1], [], []>} : vector<4x64xbf16>, vector<64x256xbf16>, vector<4x256xf32> -> vector<4x256xf32>
    %283 = arith.addf %280, %282 : vector<4x256xf32>
    %cst_204 = arith.constant 2.000000e+00 : f32
    %284 = vector.broadcast %cst_204 : f32 to vector<4x256xf32>
    %285 = arith.mulf %283, %284 : vector<4x256xf32>
    %286 = arith.select %214, %285, %283 : vector<4x256xi1>, vector<4x256xf32>
    %287 = arith.negf %286 : vector<4x256xf32>
    %288 = math.exp %287 : vector<4x256xf32>
    %cst_205 = arith.constant 1.000000e+00 : f32
    %289 = vector.broadcast %cst_205 : f32 to vector<4x256xf32>
    %290 = arith.addf %289, %288 : vector<4x256xf32>
    %291 = arith.divf %289, %290 : vector<4x256xf32>
    %cst_206 = arith.constant 2.000000e+00 : f32
    %292 = vector.broadcast %cst_206 : f32 to vector<4x256xf32>
    %293 = arith.mulf %292, %291 : vector<4x256xf32>
    %cst_207 = arith.constant 1.000000e+00 : f32
    %294 = vector.broadcast %cst_207 : f32 to vector<4x256xf32>
    %295 = arith.subf %293, %294 : vector<4x256xf32>
    %296 = arith.select %214, %295, %291 : vector<4x256xi1>, vector<4x256xf32>
    %297 = vector.extract_strided_slice %296 {offsets = [0, 0], sizes = [4, 64], strides = [1, 1]} : vector<4x256xf32> to vector<4x64xf32>
    %298 = vector.extract_strided_slice %296 {offsets = [0, 64], sizes = [4, 64], strides = [1, 1]} : vector<4x256xf32> to vector<4x64xf32>
    %299 = vector.extract_strided_slice %296 {offsets = [0, 128], sizes = [4, 64], strides = [1, 1]} : vector<4x256xf32> to vector<4x64xf32>
    %300 = vector.extract_strided_slice %296 {offsets = [0, 192], sizes = [4, 64], strides = [1, 1]} : vector<4x256xf32> to vector<4x64xf32>
    %301 = arith.mulf %298, %275 : vector<4x64xf32>
    %302 = arith.mulf %297, %299 : vector<4x64xf32>
    %303 = arith.addf %301, %302 : vector<4x64xf32>
    %304 = math.tanh %303 : vector<4x64xf32>
    %305 = arith.mulf %300, %304 : vector<4x64xf32>
    %306 = arith.select %183, %303, %275 : vector<4x64xi1>, vector<4x64xf32>
    %307 = arith.select %183, %305, %276 : vector<4x64xi1>, vector<4x64xf32>
    %cst_208 = arith.constant 0.000000e+00 : f32
    %308 = vector.broadcast %cst_208 : f32 to vector<4x64xf32>
    %309 = arith.select %183, %305, %308 : vector<4x64xi1>, vector<4x64xf32>
    %c8_209 = arith.constant 8 : index
    %c0_210 = arith.constant 0 : index
    %310 = vector.load %arg11[%c8_209, %c0_210] : memref<32x128xf32, #tpu.memory_space<vmem>>, vector<4x64xf32>
    tpu.vector_store %arg11[%c8_209, %c0_210], %309 {strides = array<i32>} : memref<32x128xf32, #tpu.memory_space<vmem>>, vector<4x64xf32>,
    %c12_211 = arith.constant 12 : index
    %c0_212 = arith.constant 0 : index
    %311 = vector.load %arg10[%c12_211, %c0_212] : memref<32x512xf32, #tpu.memory_space<vmem>>, vector<4x256xf32>
    %312 = arith.truncf %307 : vector<4x64xf32> to vector<4x64xbf16>
    %cst_213 = arith.constant dense<0.000000e+00> : vector<4x256xf32>
    %313 = tpu.matmul %312, %215, %cst_213 {dimension_numbers = #tpu.dot_dimension_numbers<[1], [0], [0], [1], [0, 0, 1, 1], [], []>} : vector<4x64xbf16>, vector<64x256xbf16>, vector<4x256xf32> -> vector<4x256xf32>
    %314 = arith.addf %311, %313 : vector<4x256xf32>
    %cst_214 = arith.constant 2.000000e+00 : f32
    %315 = vector.broadcast %cst_214 : f32 to vector<4x256xf32>
    %316 = arith.mulf %314, %315 : vector<4x256xf32>
    %317 = arith.select %214, %316, %314 : vector<4x256xi1>, vector<4x256xf32>
    %318 = arith.negf %317 : vector<4x256xf32>
    %319 = math.exp %318 : vector<4x256xf32>
    %cst_215 = arith.constant 1.000000e+00 : f32
    %320 = vector.broadcast %cst_215 : f32 to vector<4x256xf32>
    %321 = arith.addf %320, %319 : vector<4x256xf32>
    %322 = arith.divf %320, %321 : vector<4x256xf32>
    %cst_216 = arith.constant 2.000000e+00 : f32
    %323 = vector.broadcast %cst_216 : f32 to vector<4x256xf32>
    %324 = arith.mulf %323, %322 : vector<4x256xf32>
    %cst_217 = arith.constant 1.000000e+00 : f32
    %325 = vector.broadcast %cst_217 : f32 to vector<4x256xf32>
    %326 = arith.subf %324, %325 : vector<4x256xf32>
    %327 = arith.select %214, %326, %322 : vector<4x256xi1>, vector<4x256xf32>
    %328 = vector.extract_strided_slice %327 {offsets = [0, 0], sizes = [4, 64], strides = [1, 1]} : vector<4x256xf32> to vector<4x64xf32>
    %329 = vector.extract_strided_slice %327 {offsets = [0, 64], sizes = [4, 64], strides = [1, 1]} : vector<4x256xf32> to vector<4x64xf32>
    %330 = vector.extract_strided_slice %327 {offsets = [0, 128], sizes = [4, 64], strides = [1, 1]} : vector<4x256xf32> to vector<4x64xf32>
    %331 = vector.extract_strided_slice %327 {offsets = [0, 192], sizes = [4, 64], strides = [1, 1]} : vector<4x256xf32> to vector<4x64xf32>
    %332 = arith.mulf %329, %306 : vector<4x64xf32>
    %333 = arith.mulf %328, %330 : vector<4x64xf32>
    %334 = arith.addf %332, %333 : vector<4x64xf32>
    %335 = math.tanh %334 : vector<4x64xf32>
    %336 = arith.mulf %331, %335 : vector<4x64xf32>
    %337 = arith.select %188, %334, %306 : vector<4x64xi1>, vector<4x64xf32>
    %338 = arith.select %188, %336, %307 : vector<4x64xi1>, vector<4x64xf32>
    %cst_218 = arith.constant 0.000000e+00 : f32
    %339 = vector.broadcast %cst_218 : f32 to vector<4x64xf32>
    %340 = arith.select %188, %336, %339 : vector<4x64xi1>, vector<4x64xf32>
    %c12_219 = arith.constant 12 : index
    %c0_220 = arith.constant 0 : index
    %341 = vector.load %arg11[%c12_219, %c0_220] : memref<32x128xf32, #tpu.memory_space<vmem>>, vector<4x64xf32>
    tpu.vector_store %arg11[%c12_219, %c0_220], %340 {strides = array<i32>} : memref<32x128xf32, #tpu.memory_space<vmem>>, vector<4x64xf32>,
    %c16_221 = arith.constant 16 : index
    %c0_222 = arith.constant 0 : index
    %342 = vector.load %arg10[%c16_221, %c0_222] : memref<32x512xf32, #tpu.memory_space<vmem>>, vector<4x256xf32>
    %343 = arith.truncf %338 : vector<4x64xf32> to vector<4x64xbf16>
    %cst_223 = arith.constant dense<0.000000e+00> : vector<4x256xf32>
    %344 = tpu.matmul %343, %215, %cst_223 {dimension_numbers = #tpu.dot_dimension_numbers<[1], [0], [0], [1], [0, 0, 1, 1], [], []>} : vector<4x64xbf16>, vector<64x256xbf16>, vector<4x256xf32> -> vector<4x256xf32>
    %345 = arith.addf %342, %344 : vector<4x256xf32>
    %cst_224 = arith.constant 2.000000e+00 : f32
    %346 = vector.broadcast %cst_224 : f32 to vector<4x256xf32>
    %347 = arith.mulf %345, %346 : vector<4x256xf32>
    %348 = arith.select %214, %347, %345 : vector<4x256xi1>, vector<4x256xf32>
    %349 = arith.negf %348 : vector<4x256xf32>
    %350 = math.exp %349 : vector<4x256xf32>
    %cst_225 = arith.constant 1.000000e+00 : f32
    %351 = vector.broadcast %cst_225 : f32 to vector<4x256xf32>
    %352 = arith.addf %351, %350 : vector<4x256xf32>
    %353 = arith.divf %351, %352 : vector<4x256xf32>
    %cst_226 = arith.constant 2.000000e+00 : f32
    %354 = vector.broadcast %cst_226 : f32 to vector<4x256xf32>
    %355 = arith.mulf %354, %353 : vector<4x256xf32>
    %cst_227 = arith.constant 1.000000e+00 : f32
    %356 = vector.broadcast %cst_227 : f32 to vector<4x256xf32>
    %357 = arith.subf %355, %356 : vector<4x256xf32>
    %358 = arith.select %214, %357, %353 : vector<4x256xi1>, vector<4x256xf32>
    %359 = vector.extract_strided_slice %358 {offsets = [0, 0], sizes = [4, 64], strides = [1, 1]} : vector<4x256xf32> to vector<4x64xf32>
    %360 = vector.extract_strided_slice %358 {offsets = [0, 64], sizes = [4, 64], strides = [1, 1]} : vector<4x256xf32> to vector<4x64xf32>
    %361 = vector.extract_strided_slice %358 {offsets = [0, 128], sizes = [4, 64], strides = [1, 1]} : vector<4x256xf32> to vector<4x64xf32>
    %362 = vector.extract_strided_slice %358 {offsets = [0, 192], sizes = [4, 64], strides = [1, 1]} : vector<4x256xf32> to vector<4x64xf32>
    %363 = arith.mulf %360, %337 : vector<4x64xf32>
    %364 = arith.mulf %359, %361 : vector<4x64xf32>
    %365 = arith.addf %363, %364 : vector<4x64xf32>
    %366 = math.tanh %365 : vector<4x64xf32>
    %367 = arith.mulf %362, %366 : vector<4x64xf32>
    %368 = arith.select %193, %365, %337 : vector<4x64xi1>, vector<4x64xf32>
    %369 = arith.select %193, %367, %338 : vector<4x64xi1>, vector<4x64xf32>
    %cst_228 = arith.constant 0.000000e+00 : f32
    %370 = vector.broadcast %cst_228 : f32 to vector<4x64xf32>
    %371 = arith.select %193, %367, %370 : vector<4x64xi1>, vector<4x64xf32>
    %c16_229 = arith.constant 16 : index
    %c0_230 = arith.constant 0 : index
    %372 = vector.load %arg11[%c16_229, %c0_230] : memref<32x128xf32, #tpu.memory_space<vmem>>, vector<4x64xf32>
    tpu.vector_store %arg11[%c16_229, %c0_230], %371 {strides = array<i32>} : memref<32x128xf32, #tpu.memory_space<vmem>>, vector<4x64xf32>,
    %c20_231 = arith.constant 20 : index
    %c0_232 = arith.constant 0 : index
    %373 = vector.load %arg10[%c20_231, %c0_232] : memref<32x512xf32, #tpu.memory_space<vmem>>, vector<4x256xf32>
    %374 = arith.truncf %369 : vector<4x64xf32> to vector<4x64xbf16>
    %cst_233 = arith.constant dense<0.000000e+00> : vector<4x256xf32>
    %375 = tpu.matmul %374, %215, %cst_233 {dimension_numbers = #tpu.dot_dimension_numbers<[1], [0], [0], [1], [0, 0, 1, 1], [], []>} : vector<4x64xbf16>, vector<64x256xbf16>, vector<4x256xf32> -> vector<4x256xf32>
    %376 = arith.addf %373, %375 : vector<4x256xf32>
    %cst_234 = arith.constant 2.000000e+00 : f32
    %377 = vector.broadcast %cst_234 : f32 to vector<4x256xf32>
    %378 = arith.mulf %376, %377 : vector<4x256xf32>
    %379 = arith.select %214, %378, %376 : vector<4x256xi1>, vector<4x256xf32>
    %380 = arith.negf %379 : vector<4x256xf32>
    %381 = math.exp %380 : vector<4x256xf32>
    %cst_235 = arith.constant 1.000000e+00 : f32
    %382 = vector.broadcast %cst_235 : f32 to vector<4x256xf32>
    %383 = arith.addf %382, %381 : vector<4x256xf32>
    %384 = arith.divf %382, %383 : vector<4x256xf32>
    %cst_236 = arith.constant 2.000000e+00 : f32
    %385 = vector.broadcast %cst_236 : f32 to vector<4x256xf32>
    %386 = arith.mulf %385, %384 : vector<4x256xf32>
    %cst_237 = arith.constant 1.000000e+00 : f32
    %387 = vector.broadcast %cst_237 : f32 to vector<4x256xf32>
    %388 = arith.subf %386, %387 : vector<4x256xf32>
    %389 = arith.select %214, %388, %384 : vector<4x256xi1>, vector<4x256xf32>
    %390 = vector.extract_strided_slice %389 {offsets = [0, 0], sizes = [4, 64], strides = [1, 1]} : vector<4x256xf32> to vector<4x64xf32>
    %391 = vector.extract_strided_slice %389 {offsets = [0, 64], sizes = [4, 64], strides = [1, 1]} : vector<4x256xf32> to vector<4x64xf32>
    %392 = vector.extract_strided_slice %389 {offsets = [0, 128], sizes = [4, 64], strides = [1, 1]} : vector<4x256xf32> to vector<4x64xf32>
    %393 = vector.extract_strided_slice %389 {offsets = [0, 192], sizes = [4, 64], strides = [1, 1]} : vector<4x256xf32> to vector<4x64xf32>
    %394 = arith.mulf %391, %368 : vector<4x64xf32>
    %395 = arith.mulf %390, %392 : vector<4x64xf32>
    %396 = arith.addf %394, %395 : vector<4x64xf32>
    %397 = math.tanh %396 : vector<4x64xf32>
    %398 = arith.mulf %393, %397 : vector<4x64xf32>
    %399 = arith.select %198, %396, %368 : vector<4x64xi1>, vector<4x64xf32>
    %400 = arith.select %198, %398, %369 : vector<4x64xi1>, vector<4x64xf32>
    %cst_238 = arith.constant 0.000000e+00 : f32
    %401 = vector.broadcast %cst_238 : f32 to vector<4x64xf32>
    %402 = arith.select %198, %398, %401 : vector<4x64xi1>, vector<4x64xf32>
    %c20_239 = arith.constant 20 : index
    %c0_240 = arith.constant 0 : index
    %403 = vector.load %arg11[%c20_239, %c0_240] : memref<32x128xf32, #tpu.memory_space<vmem>>, vector<4x64xf32>
    tpu.vector_store %arg11[%c20_239, %c0_240], %402 {strides = array<i32>} : memref<32x128xf32, #tpu.memory_space<vmem>>, vector<4x64xf32>,
    %c24_241 = arith.constant 24 : index
    %c0_242 = arith.constant 0 : index
    %404 = vector.load %arg10[%c24_241, %c0_242] : memref<32x512xf32, #tpu.memory_space<vmem>>, vector<4x256xf32>
    %405 = arith.truncf %400 : vector<4x64xf32> to vector<4x64xbf16>
    %cst_243 = arith.constant dense<0.000000e+00> : vector<4x256xf32>
    %406 = tpu.matmul %405, %215, %cst_243 {dimension_numbers = #tpu.dot_dimension_numbers<[1], [0], [0], [1], [0, 0, 1, 1], [], []>} : vector<4x64xbf16>, vector<64x256xbf16>, vector<4x256xf32> -> vector<4x256xf32>
    %407 = arith.addf %404, %406 : vector<4x256xf32>
    %cst_244 = arith.constant 2.000000e+00 : f32
    %408 = vector.broadcast %cst_244 : f32 to vector<4x256xf32>
    %409 = arith.mulf %407, %408 : vector<4x256xf32>
    %410 = arith.select %214, %409, %407 : vector<4x256xi1>, vector<4x256xf32>
    %411 = arith.negf %410 : vector<4x256xf32>
    %412 = math.exp %411 : vector<4x256xf32>
    %cst_245 = arith.constant 1.000000e+00 : f32
    %413 = vector.broadcast %cst_245 : f32 to vector<4x256xf32>
    %414 = arith.addf %413, %412 : vector<4x256xf32>
    %415 = arith.divf %413, %414 : vector<4x256xf32>
    %cst_246 = arith.constant 2.000000e+00 : f32
    %416 = vector.broadcast %cst_246 : f32 to vector<4x256xf32>
    %417 = arith.mulf %416, %415 : vector<4x256xf32>
    %cst_247 = arith.constant 1.000000e+00 : f32
    %418 = vector.broadcast %cst_247 : f32 to vector<4x256xf32>
    %419 = arith.subf %417, %418 : vector<4x256xf32>
    %420 = arith.select %214, %419, %415 : vector<4x256xi1>, vector<4x256xf32>
    %421 = vector.extract_strided_slice %420 {offsets = [0, 0], sizes = [4, 64], strides = [1, 1]} : vector<4x256xf32> to vector<4x64xf32>
    %422 = vector.extract_strided_slice %420 {offsets = [0, 64], sizes = [4, 64], strides = [1, 1]} : vector<4x256xf32> to vector<4x64xf32>
    %423 = vector.extract_strided_slice %420 {offsets = [0, 128], sizes = [4, 64], strides = [1, 1]} : vector<4x256xf32> to vector<4x64xf32>
    %424 = vector.extract_strided_slice %420 {offsets = [0, 192], sizes = [4, 64], strides = [1, 1]} : vector<4x256xf32> to vector<4x64xf32>
    %425 = arith.mulf %422, %399 : vector<4x64xf32>
    %426 = arith.mulf %421, %423 : vector<4x64xf32>
    %427 = arith.addf %425, %426 : vector<4x64xf32>
    %428 = math.tanh %427 : vector<4x64xf32>
    %429 = arith.mulf %424, %428 : vector<4x64xf32>
    %430 = arith.select %203, %427, %399 : vector<4x64xi1>, vector<4x64xf32>
    %431 = arith.select %203, %429, %400 : vector<4x64xi1>, vector<4x64xf32>
    %cst_248 = arith.constant 0.000000e+00 : f32
    %432 = vector.broadcast %cst_248 : f32 to vector<4x64xf32>
    %433 = arith.select %203, %429, %432 : vector<4x64xi1>, vector<4x64xf32>
    %c24_249 = arith.constant 24 : index
    %c0_250 = arith.constant 0 : index
    %434 = vector.load %arg11[%c24_249, %c0_250] : memref<32x128xf32, #tpu.memory_space<vmem>>, vector<4x64xf32>
    tpu.vector_store %arg11[%c24_249, %c0_250], %433 {strides = array<i32>} : memref<32x128xf32, #tpu.memory_space<vmem>>, vector<4x64xf32>,
    %c28_251 = arith.constant 28 : index
    %c0_252 = arith.constant 0 : index
    %435 = vector.load %arg10[%c28_251, %c0_252] : memref<32x512xf32, #tpu.memory_space<vmem>>, vector<4x256xf32>
    %436 = arith.truncf %431 : vector<4x64xf32> to vector<4x64xbf16>
    %cst_253 = arith.constant dense<0.000000e+00> : vector<4x256xf32>
    %437 = tpu.matmul %436, %215, %cst_253 {dimension_numbers = #tpu.dot_dimension_numbers<[1], [0], [0], [1], [0, 0, 1, 1], [], []>} : vector<4x64xbf16>, vector<64x256xbf16>, vector<4x256xf32> -> vector<4x256xf32>
    %438 = arith.addf %435, %437 : vector<4x256xf32>
    %cst_254 = arith.constant 2.000000e+00 : f32
    %439 = vector.broadcast %cst_254 : f32 to vector<4x256xf32>
    %440 = arith.mulf %438, %439 : vector<4x256xf32>
    %441 = arith.select %214, %440, %438 : vector<4x256xi1>, vector<4x256xf32>
    %442 = arith.negf %441 : vector<4x256xf32>
    %443 = math.exp %442 : vector<4x256xf32>
    %cst_255 = arith.constant 1.000000e+00 : f32
    %444 = vector.broadcast %cst_255 : f32 to vector<4x256xf32>
    %445 = arith.addf %444, %443 : vector<4x256xf32>
    %446 = arith.divf %444, %445 : vector<4x256xf32>
    %cst_256 = arith.constant 2.000000e+00 : f32
    %447 = vector.broadcast %cst_256 : f32 to vector<4x256xf32>
    %448 = arith.mulf %447, %446 : vector<4x256xf32>
    %cst_257 = arith.constant 1.000000e+00 : f32
    %449 = vector.broadcast %cst_257 : f32 to vector<4x256xf32>
    %450 = arith.subf %448, %449 : vector<4x256xf32>
    %451 = arith.select %214, %450, %446 : vector<4x256xi1>, vector<4x256xf32>
    %452 = vector.extract_strided_slice %451 {offsets = [0, 0], sizes = [4, 64], strides = [1, 1]} : vector<4x256xf32> to vector<4x64xf32>
    %453 = vector.extract_strided_slice %451 {offsets = [0, 64], sizes = [4, 64], strides = [1, 1]} : vector<4x256xf32> to vector<4x64xf32>
    %454 = vector.extract_strided_slice %451 {offsets = [0, 128], sizes = [4, 64], strides = [1, 1]} : vector<4x256xf32> to vector<4x64xf32>
    %455 = vector.extract_strided_slice %451 {offsets = [0, 192], sizes = [4, 64], strides = [1, 1]} : vector<4x256xf32> to vector<4x64xf32>
    %456 = arith.mulf %453, %430 : vector<4x64xf32>
    %457 = arith.mulf %452, %454 : vector<4x64xf32>
    %458 = arith.addf %456, %457 : vector<4x64xf32>
    %459 = math.tanh %458 : vector<4x64xf32>
    %460 = arith.mulf %455, %459 : vector<4x64xf32>
    %cst_258 = arith.constant 0.000000e+00 : f32
    %461 = vector.broadcast %cst_258 : f32 to vector<4x64xf32>
    %462 = arith.select %208, %460, %461 : vector<4x64xi1>, vector<4x64xf32>
    %c28_259 = arith.constant 28 : index
    %c0_260 = arith.constant 0 : index
    %463 = vector.load %arg11[%c28_259, %c0_260] : memref<32x128xf32, #tpu.memory_space<vmem>>, vector<4x64xf32>
    tpu.vector_store %arg11[%c28_259, %c0_260], %462 {strides = array<i32>} : memref<32x128xf32, #tpu.memory_space<vmem>>, vector<4x64xf32>,
    %c0_261 = arith.constant 0 : index
    %c256 = arith.constant 256 : index
    %464 = vector.load %arg4[%c0_261, %c256] : memref<64x512xbf16, #tpu.memory_space<vmem>>, vector<64x256xbf16>
    %cst_262 = arith.constant 0.000000e+00 : f32
    %465 = vector.broadcast %cst_262 : f32 to vector<4x64xf32>
    %cst_263 = arith.constant 0.000000e+00 : f32
    %466 = vector.broadcast %cst_263 : f32 to vector<4x64xf32>
    %c28_264 = arith.constant 28 : index
    %c256_265 = arith.constant 256 : index
    %467 = vector.load %arg10[%c28_264, %c256_265] : memref<32x512xf32, #tpu.memory_space<vmem>>, vector<4x256xf32>
    %468 = arith.truncf %465 : vector<4x64xf32> to vector<4x64xbf16>
    %cst_266 = arith.constant dense<0.000000e+00> : vector<4x256xf32>
    %469 = tpu.matmul %468, %464, %cst_266 {dimension_numbers = #tpu.dot_dimension_numbers<[1], [0], [0], [1], [0, 0, 1, 1], [], []>} : vector<4x64xbf16>, vector<64x256xbf16>, vector<4x256xf32> -> vector<4x256xf32>
    %470 = arith.addf %467, %469 : vector<4x256xf32>
    %cst_267 = arith.constant 2.000000e+00 : f32
    %471 = vector.broadcast %cst_267 : f32 to vector<4x256xf32>
    %472 = arith.mulf %470, %471 : vector<4x256xf32>
    %473 = arith.select %214, %472, %470 : vector<4x256xi1>, vector<4x256xf32>
    %474 = arith.negf %473 : vector<4x256xf32>
    %475 = math.exp %474 : vector<4x256xf32>
    %cst_268 = arith.constant 1.000000e+00 : f32
    %476 = vector.broadcast %cst_268 : f32 to vector<4x256xf32>
    %477 = arith.addf %476, %475 : vector<4x256xf32>
    %478 = arith.divf %476, %477 : vector<4x256xf32>
    %cst_269 = arith.constant 2.000000e+00 : f32
    %479 = vector.broadcast %cst_269 : f32 to vector<4x256xf32>
    %480 = arith.mulf %479, %478 : vector<4x256xf32>
    %cst_270 = arith.constant 1.000000e+00 : f32
    %481 = vector.broadcast %cst_270 : f32 to vector<4x256xf32>
    %482 = arith.subf %480, %481 : vector<4x256xf32>
    %483 = arith.select %214, %482, %478 : vector<4x256xi1>, vector<4x256xf32>
    %484 = vector.extract_strided_slice %483 {offsets = [0, 0], sizes = [4, 64], strides = [1, 1]} : vector<4x256xf32> to vector<4x64xf32>
    %485 = vector.extract_strided_slice %483 {offsets = [0, 64], sizes = [4, 64], strides = [1, 1]} : vector<4x256xf32> to vector<4x64xf32>
    %486 = vector.extract_strided_slice %483 {offsets = [0, 128], sizes = [4, 64], strides = [1, 1]} : vector<4x256xf32> to vector<4x64xf32>
    %487 = vector.extract_strided_slice %483 {offsets = [0, 192], sizes = [4, 64], strides = [1, 1]} : vector<4x256xf32> to vector<4x64xf32>
    %488 = arith.mulf %485, %466 : vector<4x64xf32>
    %489 = arith.mulf %484, %486 : vector<4x64xf32>
    %490 = arith.addf %488, %489 : vector<4x64xf32>
    %491 = math.tanh %490 : vector<4x64xf32>
    %492 = arith.mulf %487, %491 : vector<4x64xf32>
    %493 = arith.select %208, %490, %466 : vector<4x64xi1>, vector<4x64xf32>
    %494 = arith.select %208, %492, %465 : vector<4x64xi1>, vector<4x64xf32>
    %cst_271 = arith.constant 0.000000e+00 : f32
    %495 = vector.broadcast %cst_271 : f32 to vector<4x64xf32>
    %496 = arith.select %208, %492, %495 : vector<4x64xi1>, vector<4x64xf32>
    %c28_272 = arith.constant 28 : index
    %c64 = arith.constant 64 : index
    %497 = vector.load %arg11[%c28_272, %c64] : memref<32x128xf32, #tpu.memory_space<vmem>>, vector<4x64xf32>
    tpu.vector_store %arg11[%c28_272, %c64], %496 {strides = array<i32>} : memref<32x128xf32, #tpu.memory_space<vmem>>, vector<4x64xf32>,
    %c24_273 = arith.constant 24 : index
    %c256_274 = arith.constant 256 : index
    %498 = vector.load %arg10[%c24_273, %c256_274] : memref<32x512xf32, #tpu.memory_space<vmem>>, vector<4x256xf32>
    %499 = arith.truncf %494 : vector<4x64xf32> to vector<4x64xbf16>
    %cst_275 = arith.constant dense<0.000000e+00> : vector<4x256xf32>
    %500 = tpu.matmul %499, %464, %cst_275 {dimension_numbers = #tpu.dot_dimension_numbers<[1], [0], [0], [1], [0, 0, 1, 1], [], []>} : vector<4x64xbf16>, vector<64x256xbf16>, vector<4x256xf32> -> vector<4x256xf32>
    %501 = arith.addf %498, %500 : vector<4x256xf32>
    %cst_276 = arith.constant 2.000000e+00 : f32
    %502 = vector.broadcast %cst_276 : f32 to vector<4x256xf32>
    %503 = arith.mulf %501, %502 : vector<4x256xf32>
    %504 = arith.select %214, %503, %501 : vector<4x256xi1>, vector<4x256xf32>
    %505 = arith.negf %504 : vector<4x256xf32>
    %506 = math.exp %505 : vector<4x256xf32>
    %cst_277 = arith.constant 1.000000e+00 : f32
    %507 = vector.broadcast %cst_277 : f32 to vector<4x256xf32>
    %508 = arith.addf %507, %506 : vector<4x256xf32>
    %509 = arith.divf %507, %508 : vector<4x256xf32>
    %cst_278 = arith.constant 2.000000e+00 : f32
    %510 = vector.broadcast %cst_278 : f32 to vector<4x256xf32>
    %511 = arith.mulf %510, %509 : vector<4x256xf32>
    %cst_279 = arith.constant 1.000000e+00 : f32
    %512 = vector.broadcast %cst_279 : f32 to vector<4x256xf32>
    %513 = arith.subf %511, %512 : vector<4x256xf32>
    %514 = arith.select %214, %513, %509 : vector<4x256xi1>, vector<4x256xf32>
    %515 = vector.extract_strided_slice %514 {offsets = [0, 0], sizes = [4, 64], strides = [1, 1]} : vector<4x256xf32> to vector<4x64xf32>
    %516 = vector.extract_strided_slice %514 {offsets = [0, 64], sizes = [4, 64], strides = [1, 1]} : vector<4x256xf32> to vector<4x64xf32>
    %517 = vector.extract_strided_slice %514 {offsets = [0, 128], sizes = [4, 64], strides = [1, 1]} : vector<4x256xf32> to vector<4x64xf32>
    %518 = vector.extract_strided_slice %514 {offsets = [0, 192], sizes = [4, 64], strides = [1, 1]} : vector<4x256xf32> to vector<4x64xf32>
    %519 = arith.mulf %516, %493 : vector<4x64xf32>
    %520 = arith.mulf %515, %517 : vector<4x64xf32>
    %521 = arith.addf %519, %520 : vector<4x64xf32>
    %522 = math.tanh %521 : vector<4x64xf32>
    %523 = arith.mulf %518, %522 : vector<4x64xf32>
    %524 = arith.select %203, %521, %493 : vector<4x64xi1>, vector<4x64xf32>
    %525 = arith.select %203, %523, %494 : vector<4x64xi1>, vector<4x64xf32>
    %cst_280 = arith.constant 0.000000e+00 : f32
    %526 = vector.broadcast %cst_280 : f32 to vector<4x64xf32>
    %527 = arith.select %203, %523, %526 : vector<4x64xi1>, vector<4x64xf32>
    %c24_281 = arith.constant 24 : index
    %c64_282 = arith.constant 64 : index
    %528 = vector.load %arg11[%c24_281, %c64_282] : memref<32x128xf32, #tpu.memory_space<vmem>>, vector<4x64xf32>
    tpu.vector_store %arg11[%c24_281, %c64_282], %527 {strides = array<i32>} : memref<32x128xf32, #tpu.memory_space<vmem>>, vector<4x64xf32>,
    %c20_283 = arith.constant 20 : index
    %c256_284 = arith.constant 256 : index
    %529 = vector.load %arg10[%c20_283, %c256_284] : memref<32x512xf32, #tpu.memory_space<vmem>>, vector<4x256xf32>
    %530 = arith.truncf %525 : vector<4x64xf32> to vector<4x64xbf16>
    %cst_285 = arith.constant dense<0.000000e+00> : vector<4x256xf32>
    %531 = tpu.matmul %530, %464, %cst_285 {dimension_numbers = #tpu.dot_dimension_numbers<[1], [0], [0], [1], [0, 0, 1, 1], [], []>} : vector<4x64xbf16>, vector<64x256xbf16>, vector<4x256xf32> -> vector<4x256xf32>
    %532 = arith.addf %529, %531 : vector<4x256xf32>
    %cst_286 = arith.constant 2.000000e+00 : f32
    %533 = vector.broadcast %cst_286 : f32 to vector<4x256xf32>
    %534 = arith.mulf %532, %533 : vector<4x256xf32>
    %535 = arith.select %214, %534, %532 : vector<4x256xi1>, vector<4x256xf32>
    %536 = arith.negf %535 : vector<4x256xf32>
    %537 = math.exp %536 : vector<4x256xf32>
    %cst_287 = arith.constant 1.000000e+00 : f32
    %538 = vector.broadcast %cst_287 : f32 to vector<4x256xf32>
    %539 = arith.addf %538, %537 : vector<4x256xf32>
    %540 = arith.divf %538, %539 : vector<4x256xf32>
    %cst_288 = arith.constant 2.000000e+00 : f32
    %541 = vector.broadcast %cst_288 : f32 to vector<4x256xf32>
    %542 = arith.mulf %541, %540 : vector<4x256xf32>
    %cst_289 = arith.constant 1.000000e+00 : f32
    %543 = vector.broadcast %cst_289 : f32 to vector<4x256xf32>
    %544 = arith.subf %542, %543 : vector<4x256xf32>
    %545 = arith.select %214, %544, %540 : vector<4x256xi1>, vector<4x256xf32>
    %546 = vector.extract_strided_slice %545 {offsets = [0, 0], sizes = [4, 64], strides = [1, 1]} : vector<4x256xf32> to vector<4x64xf32>
    %547 = vector.extract_strided_slice %545 {offsets = [0, 64], sizes = [4, 64], strides = [1, 1]} : vector<4x256xf32> to vector<4x64xf32>
    %548 = vector.extract_strided_slice %545 {offsets = [0, 128], sizes = [4, 64], strides = [1, 1]} : vector<4x256xf32> to vector<4x64xf32>
    %549 = vector.extract_strided_slice %545 {offsets = [0, 192], sizes = [4, 64], strides = [1, 1]} : vector<4x256xf32> to vector<4x64xf32>
    %550 = arith.mulf %547, %524 : vector<4x64xf32>
    %551 = arith.mulf %546, %548 : vector<4x64xf32>
    %552 = arith.addf %550, %551 : vector<4x64xf32>
    %553 = math.tanh %552 : vector<4x64xf32>
    %554 = arith.mulf %549, %553 : vector<4x64xf32>
    %555 = arith.select %198, %552, %524 : vector<4x64xi1>, vector<4x64xf32>
    %556 = arith.select %198, %554, %525 : vector<4x64xi1>, vector<4x64xf32>
    %cst_290 = arith.constant 0.000000e+00 : f32
    %557 = vector.broadcast %cst_290 : f32 to vector<4x64xf32>
    %558 = arith.select %198, %554, %557 : vector<4x64xi1>, vector<4x64xf32>
    %c20_291 = arith.constant 20 : index
    %c64_292 = arith.constant 64 : index
    %559 = vector.load %arg11[%c20_291, %c64_292] : memref<32x128xf32, #tpu.memory_space<vmem>>, vector<4x64xf32>
    tpu.vector_store %arg11[%c20_291, %c64_292], %558 {strides = array<i32>} : memref<32x128xf32, #tpu.memory_space<vmem>>, vector<4x64xf32>,
    %c16_293 = arith.constant 16 : index
    %c256_294 = arith.constant 256 : index
    %560 = vector.load %arg10[%c16_293, %c256_294] : memref<32x512xf32, #tpu.memory_space<vmem>>, vector<4x256xf32>
    %561 = arith.truncf %556 : vector<4x64xf32> to vector<4x64xbf16>
    %cst_295 = arith.constant dense<0.000000e+00> : vector<4x256xf32>
    %562 = tpu.matmul %561, %464, %cst_295 {dimension_numbers = #tpu.dot_dimension_numbers<[1], [0], [0], [1], [0, 0, 1, 1], [], []>} : vector<4x64xbf16>, vector<64x256xbf16>, vector<4x256xf32> -> vector<4x256xf32>
    %563 = arith.addf %560, %562 : vector<4x256xf32>
    %cst_296 = arith.constant 2.000000e+00 : f32
    %564 = vector.broadcast %cst_296 : f32 to vector<4x256xf32>
    %565 = arith.mulf %563, %564 : vector<4x256xf32>
    %566 = arith.select %214, %565, %563 : vector<4x256xi1>, vector<4x256xf32>
    %567 = arith.negf %566 : vector<4x256xf32>
    %568 = math.exp %567 : vector<4x256xf32>
    %cst_297 = arith.constant 1.000000e+00 : f32
    %569 = vector.broadcast %cst_297 : f32 to vector<4x256xf32>
    %570 = arith.addf %569, %568 : vector<4x256xf32>
    %571 = arith.divf %569, %570 : vector<4x256xf32>
    %cst_298 = arith.constant 2.000000e+00 : f32
    %572 = vector.broadcast %cst_298 : f32 to vector<4x256xf32>
    %573 = arith.mulf %572, %571 : vector<4x256xf32>
    %cst_299 = arith.constant 1.000000e+00 : f32
    %574 = vector.broadcast %cst_299 : f32 to vector<4x256xf32>
    %575 = arith.subf %573, %574 : vector<4x256xf32>
    %576 = arith.select %214, %575, %571 : vector<4x256xi1>, vector<4x256xf32>
    %577 = vector.extract_strided_slice %576 {offsets = [0, 0], sizes = [4, 64], strides = [1, 1]} : vector<4x256xf32> to vector<4x64xf32>
    %578 = vector.extract_strided_slice %576 {offsets = [0, 64], sizes = [4, 64], strides = [1, 1]} : vector<4x256xf32> to vector<4x64xf32>
    %579 = vector.extract_strided_slice %576 {offsets = [0, 128], sizes = [4, 64], strides = [1, 1]} : vector<4x256xf32> to vector<4x64xf32>
    %580 = vector.extract_strided_slice %576 {offsets = [0, 192], sizes = [4, 64], strides = [1, 1]} : vector<4x256xf32> to vector<4x64xf32>
    %581 = arith.mulf %578, %555 : vector<4x64xf32>
    %582 = arith.mulf %577, %579 : vector<4x64xf32>
    %583 = arith.addf %581, %582 : vector<4x64xf32>
    %584 = math.tanh %583 : vector<4x64xf32>
    %585 = arith.mulf %580, %584 : vector<4x64xf32>
    %586 = arith.select %193, %583, %555 : vector<4x64xi1>, vector<4x64xf32>
    %587 = arith.select %193, %585, %556 : vector<4x64xi1>, vector<4x64xf32>
    %cst_300 = arith.constant 0.000000e+00 : f32
    %588 = vector.broadcast %cst_300 : f32 to vector<4x64xf32>
    %589 = arith.select %193, %585, %588 : vector<4x64xi1>, vector<4x64xf32>
    %c16_301 = arith.constant 16 : index
    %c64_302 = arith.constant 64 : index
    %590 = vector.load %arg11[%c16_301, %c64_302] : memref<32x128xf32, #tpu.memory_space<vmem>>, vector<4x64xf32>
    tpu.vector_store %arg11[%c16_301, %c64_302], %589 {strides = array<i32>} : memref<32x128xf32, #tpu.memory_space<vmem>>, vector<4x64xf32>,
    %c12_303 = arith.constant 12 : index
    %c256_304 = arith.constant 256 : index
    %591 = vector.load %arg10[%c12_303, %c256_304] : memref<32x512xf32, #tpu.memory_space<vmem>>, vector<4x256xf32>
    %592 = arith.truncf %587 : vector<4x64xf32> to vector<4x64xbf16>
    %cst_305 = arith.constant dense<0.000000e+00> : vector<4x256xf32>
    %593 = tpu.matmul %592, %464, %cst_305 {dimension_numbers = #tpu.dot_dimension_numbers<[1], [0], [0], [1], [0, 0, 1, 1], [], []>} : vector<4x64xbf16>, vector<64x256xbf16>, vector<4x256xf32> -> vector<4x256xf32>
    %594 = arith.addf %591, %593 : vector<4x256xf32>
    %cst_306 = arith.constant 2.000000e+00 : f32
    %595 = vector.broadcast %cst_306 : f32 to vector<4x256xf32>
    %596 = arith.mulf %594, %595 : vector<4x256xf32>
    %597 = arith.select %214, %596, %594 : vector<4x256xi1>, vector<4x256xf32>
    %598 = arith.negf %597 : vector<4x256xf32>
    %599 = math.exp %598 : vector<4x256xf32>
    %cst_307 = arith.constant 1.000000e+00 : f32
    %600 = vector.broadcast %cst_307 : f32 to vector<4x256xf32>
    %601 = arith.addf %600, %599 : vector<4x256xf32>
    %602 = arith.divf %600, %601 : vector<4x256xf32>
    %cst_308 = arith.constant 2.000000e+00 : f32
    %603 = vector.broadcast %cst_308 : f32 to vector<4x256xf32>
    %604 = arith.mulf %603, %602 : vector<4x256xf32>
    %cst_309 = arith.constant 1.000000e+00 : f32
    %605 = vector.broadcast %cst_309 : f32 to vector<4x256xf32>
    %606 = arith.subf %604, %605 : vector<4x256xf32>
    %607 = arith.select %214, %606, %602 : vector<4x256xi1>, vector<4x256xf32>
    %608 = vector.extract_strided_slice %607 {offsets = [0, 0], sizes = [4, 64], strides = [1, 1]} : vector<4x256xf32> to vector<4x64xf32>
    %609 = vector.extract_strided_slice %607 {offsets = [0, 64], sizes = [4, 64], strides = [1, 1]} : vector<4x256xf32> to vector<4x64xf32>
    %610 = vector.extract_strided_slice %607 {offsets = [0, 128], sizes = [4, 64], strides = [1, 1]} : vector<4x256xf32> to vector<4x64xf32>
    %611 = vector.extract_strided_slice %607 {offsets = [0, 192], sizes = [4, 64], strides = [1, 1]} : vector<4x256xf32> to vector<4x64xf32>
    %612 = arith.mulf %609, %586 : vector<4x64xf32>
    %613 = arith.mulf %608, %610 : vector<4x64xf32>
    %614 = arith.addf %612, %613 : vector<4x64xf32>
    %615 = math.tanh %614 : vector<4x64xf32>
    %616 = arith.mulf %611, %615 : vector<4x64xf32>
    %617 = arith.select %188, %614, %586 : vector<4x64xi1>, vector<4x64xf32>
    %618 = arith.select %188, %616, %587 : vector<4x64xi1>, vector<4x64xf32>
    %cst_310 = arith.constant 0.000000e+00 : f32
    %619 = vector.broadcast %cst_310 : f32 to vector<4x64xf32>
    %620 = arith.select %188, %616, %619 : vector<4x64xi1>, vector<4x64xf32>
    %c12_311 = arith.constant 12 : index
    %c64_312 = arith.constant 64 : index
    %621 = vector.load %arg11[%c12_311, %c64_312] : memref<32x128xf32, #tpu.memory_space<vmem>>, vector<4x64xf32>
    tpu.vector_store %arg11[%c12_311, %c64_312], %620 {strides = array<i32>} : memref<32x128xf32, #tpu.memory_space<vmem>>, vector<4x64xf32>,
    %c8_313 = arith.constant 8 : index
    %c256_314 = arith.constant 256 : index
    %622 = vector.load %arg10[%c8_313, %c256_314] : memref<32x512xf32, #tpu.memory_space<vmem>>, vector<4x256xf32>
    %623 = arith.truncf %618 : vector<4x64xf32> to vector<4x64xbf16>
    %cst_315 = arith.constant dense<0.000000e+00> : vector<4x256xf32>
    %624 = tpu.matmul %623, %464, %cst_315 {dimension_numbers = #tpu.dot_dimension_numbers<[1], [0], [0], [1], [0, 0, 1, 1], [], []>} : vector<4x64xbf16>, vector<64x256xbf16>, vector<4x256xf32> -> vector<4x256xf32>
    %625 = arith.addf %622, %624 : vector<4x256xf32>
    %cst_316 = arith.constant 2.000000e+00 : f32
    %626 = vector.broadcast %cst_316 : f32 to vector<4x256xf32>
    %627 = arith.mulf %625, %626 : vector<4x256xf32>
    %628 = arith.select %214, %627, %625 : vector<4x256xi1>, vector<4x256xf32>
    %629 = arith.negf %628 : vector<4x256xf32>
    %630 = math.exp %629 : vector<4x256xf32>
    %cst_317 = arith.constant 1.000000e+00 : f32
    %631 = vector.broadcast %cst_317 : f32 to vector<4x256xf32>
    %632 = arith.addf %631, %630 : vector<4x256xf32>
    %633 = arith.divf %631, %632 : vector<4x256xf32>
    %cst_318 = arith.constant 2.000000e+00 : f32
    %634 = vector.broadcast %cst_318 : f32 to vector<4x256xf32>
    %635 = arith.mulf %634, %633 : vector<4x256xf32>
    %cst_319 = arith.constant 1.000000e+00 : f32
    %636 = vector.broadcast %cst_319 : f32 to vector<4x256xf32>
    %637 = arith.subf %635, %636 : vector<4x256xf32>
    %638 = arith.select %214, %637, %633 : vector<4x256xi1>, vector<4x256xf32>
    %639 = vector.extract_strided_slice %638 {offsets = [0, 0], sizes = [4, 64], strides = [1, 1]} : vector<4x256xf32> to vector<4x64xf32>
    %640 = vector.extract_strided_slice %638 {offsets = [0, 64], sizes = [4, 64], strides = [1, 1]} : vector<4x256xf32> to vector<4x64xf32>
    %641 = vector.extract_strided_slice %638 {offsets = [0, 128], sizes = [4, 64], strides = [1, 1]} : vector<4x256xf32> to vector<4x64xf32>
    %642 = vector.extract_strided_slice %638 {offsets = [0, 192], sizes = [4, 64], strides = [1, 1]} : vector<4x256xf32> to vector<4x64xf32>
    %643 = arith.mulf %640, %617 : vector<4x64xf32>
    %644 = arith.mulf %639, %641 : vector<4x64xf32>
    %645 = arith.addf %643, %644 : vector<4x64xf32>
    %646 = math.tanh %645 : vector<4x64xf32>
    %647 = arith.mulf %642, %646 : vector<4x64xf32>
    %648 = arith.select %183, %645, %617 : vector<4x64xi1>, vector<4x64xf32>
    %649 = arith.select %183, %647, %618 : vector<4x64xi1>, vector<4x64xf32>
    %cst_320 = arith.constant 0.000000e+00 : f32
    %650 = vector.broadcast %cst_320 : f32 to vector<4x64xf32>
    %651 = arith.select %183, %647, %650 : vector<4x64xi1>, vector<4x64xf32>
    %c8_321 = arith.constant 8 : index
    %c64_322 = arith.constant 64 : index
    %652 = vector.load %arg11[%c8_321, %c64_322] : memref<32x128xf32, #tpu.memory_space<vmem>>, vector<4x64xf32>
    tpu.vector_store %arg11[%c8_321, %c64_322], %651 {strides = array<i32>} : memref<32x128xf32, #tpu.memory_space<vmem>>, vector<4x64xf32>,
    %c4_323 = arith.constant 4 : index
    %c256_324 = arith.constant 256 : index
    %653 = vector.load %arg10[%c4_323, %c256_324] : memref<32x512xf32, #tpu.memory_space<vmem>>, vector<4x256xf32>
    %654 = arith.truncf %649 : vector<4x64xf32> to vector<4x64xbf16>
    %cst_325 = arith.constant dense<0.000000e+00> : vector<4x256xf32>
    %655 = tpu.matmul %654, %464, %cst_325 {dimension_numbers = #tpu.dot_dimension_numbers<[1], [0], [0], [1], [0, 0, 1, 1], [], []>} : vector<4x64xbf16>, vector<64x256xbf16>, vector<4x256xf32> -> vector<4x256xf32>
    %656 = arith.addf %653, %655 : vector<4x256xf32>
    %cst_326 = arith.constant 2.000000e+00 : f32
    %657 = vector.broadcast %cst_326 : f32 to vector<4x256xf32>
    %658 = arith.mulf %656, %657 : vector<4x256xf32>
    %659 = arith.select %214, %658, %656 : vector<4x256xi1>, vector<4x256xf32>
    %660 = arith.negf %659 : vector<4x256xf32>
    %661 = math.exp %660 : vector<4x256xf32>
    %cst_327 = arith.constant 1.000000e+00 : f32
    %662 = vector.broadcast %cst_327 : f32 to vector<4x256xf32>
    %663 = arith.addf %662, %661 : vector<4x256xf32>
    %664 = arith.divf %662, %663 : vector<4x256xf32>
    %cst_328 = arith.constant 2.000000e+00 : f32
    %665 = vector.broadcast %cst_328 : f32 to vector<4x256xf32>
    %666 = arith.mulf %665, %664 : vector<4x256xf32>
    %cst_329 = arith.constant 1.000000e+00 : f32
    %667 = vector.broadcast %cst_329 : f32 to vector<4x256xf32>
    %668 = arith.subf %666, %667 : vector<4x256xf32>
    %669 = arith.select %214, %668, %664 : vector<4x256xi1>, vector<4x256xf32>
    %670 = vector.extract_strided_slice %669 {offsets = [0, 0], sizes = [4, 64], strides = [1, 1]} : vector<4x256xf32> to vector<4x64xf32>
    %671 = vector.extract_strided_slice %669 {offsets = [0, 64], sizes = [4, 64], strides = [1, 1]} : vector<4x256xf32> to vector<4x64xf32>
    %672 = vector.extract_strided_slice %669 {offsets = [0, 128], sizes = [4, 64], strides = [1, 1]} : vector<4x256xf32> to vector<4x64xf32>
    %673 = vector.extract_strided_slice %669 {offsets = [0, 192], sizes = [4, 64], strides = [1, 1]} : vector<4x256xf32> to vector<4x64xf32>
    %674 = arith.mulf %671, %648 : vector<4x64xf32>
    %675 = arith.mulf %670, %672 : vector<4x64xf32>
    %676 = arith.addf %674, %675 : vector<4x64xf32>
    %677 = math.tanh %676 : vector<4x64xf32>
    %678 = arith.mulf %673, %677 : vector<4x64xf32>
    %679 = arith.select %178, %676, %648 : vector<4x64xi1>, vector<4x64xf32>
    %680 = arith.select %178, %678, %649 : vector<4x64xi1>, vector<4x64xf32>
    %cst_330 = arith.constant 0.000000e+00 : f32
    %681 = vector.broadcast %cst_330 : f32 to vector<4x64xf32>
    %682 = arith.select %178, %678, %681 : vector<4x64xi1>, vector<4x64xf32>
    %c4_331 = arith.constant 4 : index
    %c64_332 = arith.constant 64 : index
    %683 = vector.load %arg11[%c4_331, %c64_332] : memref<32x128xf32, #tpu.memory_space<vmem>>, vector<4x64xf32>
    tpu.vector_store %arg11[%c4_331, %c64_332], %682 {strides = array<i32>} : memref<32x128xf32, #tpu.memory_space<vmem>>, vector<4x64xf32>,
    %c0_333 = arith.constant 0 : index
    %c256_334 = arith.constant 256 : index
    %684 = vector.load %arg10[%c0_333, %c256_334] : memref<32x512xf32, #tpu.memory_space<vmem>>, vector<4x256xf32>
    %685 = arith.truncf %680 : vector<4x64xf32> to vector<4x64xbf16>
    %cst_335 = arith.constant dense<0.000000e+00> : vector<4x256xf32>
    %686 = tpu.matmul %685, %464, %cst_335 {dimension_numbers = #tpu.dot_dimension_numbers<[1], [0], [0], [1], [0, 0, 1, 1], [], []>} : vector<4x64xbf16>, vector<64x256xbf16>, vector<4x256xf32> -> vector<4x256xf32>
    %687 = arith.addf %684, %686 : vector<4x256xf32>
    %cst_336 = arith.constant 2.000000e+00 : f32
    %688 = vector.broadcast %cst_336 : f32 to vector<4x256xf32>
    %689 = arith.mulf %687, %688 : vector<4x256xf32>
    %690 = arith.select %214, %689, %687 : vector<4x256xi1>, vector<4x256xf32>
    %691 = arith.negf %690 : vector<4x256xf32>
    %692 = math.exp %691 : vector<4x256xf32>
    %cst_337 = arith.constant 1.000000e+00 : f32
    %693 = vector.broadcast %cst_337 : f32 to vector<4x256xf32>
    %694 = arith.addf %693, %692 : vector<4x256xf32>
    %695 = arith.divf %693, %694 : vector<4x256xf32>
    %cst_338 = arith.constant 2.000000e+00 : f32
    %696 = vector.broadcast %cst_338 : f32 to vector<4x256xf32>
    %697 = arith.mulf %696, %695 : vector<4x256xf32>
    %cst_339 = arith.constant 1.000000e+00 : f32
    %698 = vector.broadcast %cst_339 : f32 to vector<4x256xf32>
    %699 = arith.subf %697, %698 : vector<4x256xf32>
    %700 = arith.select %214, %699, %695 : vector<4x256xi1>, vector<4x256xf32>
    %701 = vector.extract_strided_slice %700 {offsets = [0, 0], sizes = [4, 64], strides = [1, 1]} : vector<4x256xf32> to vector<4x64xf32>
    %702 = vector.extract_strided_slice %700 {offsets = [0, 64], sizes = [4, 64], strides = [1, 1]} : vector<4x256xf32> to vector<4x64xf32>
    %703 = vector.extract_strided_slice %700 {offsets = [0, 128], sizes = [4, 64], strides = [1, 1]} : vector<4x256xf32> to vector<4x64xf32>
    %704 = vector.extract_strided_slice %700 {offsets = [0, 192], sizes = [4, 64], strides = [1, 1]} : vector<4x256xf32> to vector<4x64xf32>
    %705 = arith.mulf %702, %679 : vector<4x64xf32>
    %706 = arith.mulf %701, %703 : vector<4x64xf32>
    %707 = arith.addf %705, %706 : vector<4x64xf32>
    %708 = math.tanh %707 : vector<4x64xf32>
    %709 = arith.mulf %704, %708 : vector<4x64xf32>
    %cst_340 = arith.constant 0.000000e+00 : f32
    %710 = vector.broadcast %cst_340 : f32 to vector<4x64xf32>
    %711 = arith.select %173, %709, %710 : vector<4x64xi1>, vector<4x64xf32>
    %c0_341 = arith.constant 0 : index
    %c64_342 = arith.constant 64 : index
    %712 = vector.load %arg11[%c0_341, %c64_342] : memref<32x128xf32, #tpu.memory_space<vmem>>, vector<4x64xf32>
    tpu.vector_store %arg11[%c0_341, %c64_342], %711 {strides = array<i32>} : memref<32x128xf32, #tpu.memory_space<vmem>>, vector<4x64xf32>,
    %c0_343 = arith.constant 0 : index
    %c0_344 = arith.constant 0 : index
    %713 = vector.load %arg11[%c0_343, %c0_344] : memref<32x128xf32, #tpu.memory_space<vmem>>, vector<32x128xf32>
    %c0_345 = arith.constant 0 : index
    %c0_346 = arith.constant 0 : index
    %714 = vector.load %arg6[%c0_345, %c0_346] : memref<129x128xf32, #tpu.memory_space<vmem>>, vector<128x128xf32>
    %c128 = arith.constant 128 : index
    %c0_347 = arith.constant 0 : index
    %715 = vector.load %arg6[%c128, %c0_347] : memref<129x128xf32, #tpu.memory_space<vmem>>, vector<1x128xf32>
    %cst_348 = arith.constant dense<0.000000e+00> : vector<32x128xf32>
    %716 = tpu.matmul %713, %714, %cst_348 {dimension_numbers = #tpu.dot_dimension_numbers<[1], [0], [0], [1], [0, 0, 1, 1], [], []>} : vector<32x128xf32>, vector<128x128xf32>, vector<32x128xf32> -> vector<32x128xf32>
    %717 = math.tanh %716 : vector<32x128xf32>
    %718 = vector.broadcast %715 : vector<1x128xf32> to vector<32x128xf32>
    %719 = arith.mulf %717, %718 : vector<32x128xf32>
    %cst_349 = arith.constant dense<0.000000e+00> : vector<32xf32>
    %720 = vector.multi_reduction <add>, %719, %cst_349 [1] : vector<32x128xf32> to vector<32xf32>
    %721 = vector.shape_cast %720 : vector<32xf32> to vector<32x1xf32>
    %722 = math.exp %721 : vector<32x1xf32>
    %723 = tpu.iota {dimensions = array<i32: 1>} : vector<4x32xi32>
    %724 = tpu.iota {dimensions = array<i32: 0>} : vector<4x32xi32>
    %c4_i32 = arith.constant 4 : i32
    %c0_i32_350 = arith.constant 0 : i32
    %725 = arith.cmpi eq, %c4_i32, %c0_i32_350 : i32
    %c1_i32 = arith.constant 1 : i32
    %726 = arith.select %725, %c1_i32, %c4_i32 : i32
    %727 = vector.broadcast %726 : i32 to vector<4x32xi32>
    %728 = arith.remsi %723, %727 : vector<4x32xi32>
    %c0_i32_351 = arith.constant 0 : i32
    %729 = vector.broadcast %c0_i32_351 : i32 to vector<4x32xi32>
    %730 = arith.cmpi ne, %728, %729 : vector<4x32xi32>
    %c0_i32_352 = arith.constant 0 : i32
    %731 = vector.broadcast %c0_i32_352 : i32 to vector<4x32xi32>
    %732 = arith.cmpi slt, %728, %731 : vector<4x32xi32>
    %c0_i32_353 = arith.constant 0 : i32
    %733 = arith.cmpi slt, %726, %c0_i32_353 : i32
    %734 = vector.broadcast %733 : i1 to vector<4x32xi1>
    %735 = vector.broadcast %734 : vector<4x32xi1> to vector<4x32xi1>
    %736 = arith.xori %732, %735 : vector<4x32xi1>
    %737 = arith.andi %736, %730 : vector<4x32xi1>
    %738 = vector.broadcast %726 : i32 to vector<4x32xi32>
    %739 = arith.addi %728, %738 : vector<4x32xi32>
    %740 = arith.select %737, %739, %728 : vector<4x32xi1>, vector<4x32xi32>
    %741 = arith.cmpi eq, %740, %724 : vector<4x32xi32>
    %742 = arith.extui %741 : vector<4x32xi1> to vector<4x32xi32>
    %743 = arith.sitofp %742 : vector<4x32xi32> to vector<4x32xf32>
    %744 = vector.broadcast %722 : vector<32x1xf32> to vector<32x128xf32>
    %745 = arith.mulf %744, %713 : vector<32x128xf32>
    %cst_354 = arith.constant dense<0.000000e+00> : vector<4x128xf32>
    %746 = tpu.matmul %743, %745, %cst_354 {dimension_numbers = #tpu.dot_dimension_numbers<[1], [0], [0], [1], [0, 0, 1, 1], [], []>} : vector<4x32xf32>, vector<32x128xf32>, vector<4x128xf32> -> vector<4x128xf32>
    %cst_355 = arith.constant dense<0.000000e+00> : vector<4x1xf32>
    %747 = tpu.matmul %743, %722, %cst_355 {dimension_numbers = #tpu.dot_dimension_numbers<[1], [0], [0], [1], [0, 0, 1, 1], [], []>} : vector<4x32xf32>, vector<32x1xf32>, vector<4x1xf32> -> vector<4x1xf32>
    %748 = vector.broadcast %747 : vector<4x1xf32> to vector<4x128xf32>
    %749 = arith.divf %746, %748 : vector<4x128xf32>
    %750 = vector.extract_strided_slice %749 {offsets = [0, 0], sizes = [2, 128], strides = [1, 1]} : vector<4x128xf32> to vector<2x128xf32>
    %c0_356 = arith.constant 0 : index
    %c0_357 = arith.constant 0 : index
    %751 = vector.load %arg7[%c0_356, %c0_357] : memref<257x3xf32, #tpu.memory_space<vmem>>, vector<128x3xf32>
    %cst_358 = arith.constant dense<0.000000e+00> : vector<2x3xf32>
    %752 = tpu.matmul %750, %751, %cst_358 {dimension_numbers = #tpu.dot_dimension_numbers<[1], [0], [0], [1], [0, 0, 1, 1], [], []>} : vector<2x128xf32>, vector<128x3xf32>, vector<2x3xf32> -> vector<2x3xf32>
    %753 = vector.extract_strided_slice %749 {offsets = [2, 0], sizes = [2, 128], strides = [1, 1]} : vector<4x128xf32> to vector<2x128xf32>
    %c128_359 = arith.constant 128 : index
    %c0_360 = arith.constant 0 : index
    %754 = vector.load %arg7[%c128_359, %c0_360] : memref<257x3xf32, #tpu.memory_space<vmem>>, vector<128x3xf32>
    %cst_361 = arith.constant dense<0.000000e+00> : vector<2x3xf32>
    %755 = tpu.matmul %753, %754, %cst_361 {dimension_numbers = #tpu.dot_dimension_numbers<[1], [0], [0], [1], [0, 0, 1, 1], [], []>} : vector<2x128xf32>, vector<128x3xf32>, vector<2x3xf32> -> vector<2x3xf32>
    %756 = arith.addf %752, %755 : vector<2x3xf32>
    %c256_362 = arith.constant 256 : index
    %c0_363 = arith.constant 0 : index
    %757 = vector.load %arg7[%c256_362, %c0_363] : memref<257x3xf32, #tpu.memory_space<vmem>>, vector<1x3xf32>
    %758 = vector.broadcast %757 : vector<1x3xf32> to vector<2x3xf32>
    %759 = arith.addf %756, %758 : vector<2x3xf32>
    %c0_364 = arith.constant 0 : index
    %c0_365 = arith.constant 0 : index
    %760 = vector.load %arg8[%c0_364, %c0_365] : memref<2x3xf32, #tpu.memory_space<vmem>>, vector<2x3xf32>
    tpu.vector_store %arg8[%c0_364, %c0_365], %759 {strides = array<i32>} : memref<2x3xf32, #tpu.memory_space<vmem>>, vector<2x3xf32>,
    return
  }
}

</mosaic_0001>

<bundles_post_ra>
// kernel: siamese_forward.1
= control target key start
LH: loop header
LB: loop body
LE: loop exit
PB: predicated region body
PF: predicated region fallthrough
CT: control target
= control target key end

     0   :  { %13 = vsyncpa [#allocation8], 0  ;;  %s5259_s0 = inlined_call_operand.vmem [shape: s32[4,8], index: 0, kind: input, shape index: {}, may-alias: {0,1}]   ;;  %s5260_s1 = inlined_call_operand.vmem [shape: s32[4,8], index: 1, kind: input, shape index: {}, may-alias: {0,1}]   ;;  %s5261_s2 = inlined_call_operand.vmem [shape: f32[50,1,300], index: 2, kind: input, shape index: {}]   ;;  %s5262_s3 = inlined_call_operand.hbm [shape: bf16[300,512], index: 3, kind: input, shape index: {}]   ;;  %s5263_s4 = inlined_call_operand.hbm [shape: bf16[64,512], index: 4, kind: input, shape index: {}]   ;;  %s5264_s5 = inlined_call_operand.vmem [shape: f32[1,512], index: 5, kind: input, shape index: {}]   ;;  %s5265_s6 = inlined_call_operand.hbm [shape: f32[129,128], index: 6, kind: input, shape index: {}]   ;;  %s5266_s7 = inlined_call_operand.vmem [shape: f32[257,3], index: 7, kind: input, shape index: {}]   ;;  %s5267_s8 = inlined_call_operand.hbm [shape: f32[2,3], index: 8, kind: output, shape index: {}]  }
   0x1   :  { %14 = vsyncpa [#allocation6], 0 }
   0x2   :  { %15 = vsyncpa [#allocation11], 0 }
   0x3   :  { %16 = vsyncpa [#allocation7], 0  ;;  %s47_s29 = sshll.u32 %s5263_s4, 4  ;;  %s4237_s30 = smov [#allocation10]   ;;  %s48_s29 = int_to_ptr.hbm [resolvable:$true] %s47_s29 }
   0x4   :  { %s49_s9 = sshll.u32 %s4237_s30, 4  ;;  %s22_s12 = sshll.u32 %s5259_s0, 4  ;;  %s50_s9 = int_to_ptr.vmem [resolvable:$true] %s49_s9  ;;  %s23_s12 = int_to_ptr.vmem [resolvable:$true] %s22_s12 }
   0x5   :  { %s4238_s13 = smov 256   ;;  %s4239_s14 = smov 16  }
   0x6   :  { %55 = dma.hbm_to_vmem [thread:$0]  %s48_s29, 2048, %s50_s9, [#allocation11], %s4238_s13, %s4238_s13, %s4239_s14  }
   0x7   :  { %s4240_s15 = smov [#allocation5]   ;;  %s34_s18 = sshll.u32 %s5262_s3, 4  ;;  %s35_s18 = int_to_ptr.hbm [resolvable:$true] %s34_s18 }
   0x8   :  { %25 = dma.vmem_to_smem %s23_s12, 64, %s4240_s15, [#allocation8]  }
   0x9   :  { %s4241_s4 = smov [#allocation9]   ;;  %s62_s22 = sshll.u32 %s5265_s6, 4  ;;  %s63_s22 = int_to_ptr.hbm [resolvable:$true] %s62_s22 }
   0xa   :  { %s36_s19 = sshll.u32 %s4241_s4, 4  ;;  %s4242_s0 = smov [#allocation12]   ;;  %s37_s19 = int_to_ptr.vmem [resolvable:$true] %s36_s19 }
   0xb   :  { %42 = dma.hbm_to_vmem [thread:$0]  %s35_s18, 9728, %s37_s19, [#allocation6], %s4238_s13, %s4238_s13, %s4239_s14  }
   0xc   :  { %s64_s23 = sshll.u32 %s4242_s0, 4  ;;  %s4243_s24 = smov 128   ;;  %s65_s23 = int_to_ptr.vmem [resolvable:$true] %s64_s23 }
   0xd   :  { %s4244_s25 = smov 8  }
   0xe   :  { %70 = dma.hbm_to_vmem [thread:$0]  %s63_s22, 2176, %s65_s23, [#allocation11], %s4243_s24, %s4243_s24, %s4244_s25  }
   0xf   :  { %4229 = dma.done.wait [#allocation8], 64  }
  0x10   :  { %4230 = vsyncadd [#allocation8], 4294967232 }
  0x11   :  { %4231 = dma.done.wait [#allocation6], 9728  }
  0x12   :  { %4232 = vsyncadd [#allocation6], 4294957568 }
  0x13   :  { %4233 = dma.done.wait [#allocation11], 4224  }
  0x14   :  { %4234 = vsyncadd [#allocation11], 4294963072 }
  0x15   :  { %89 = sfence }
  0x16   :  { %v3463_v0 = vld [vmem:[#allocation9 + $0xe0] sm:$0xf]  ;;  %v3850_v1 = vld [vmem:[#allocation9 + $0xec] sm:$0xf0]  ;;  %vm805_vm0 = vcmask 1045504   ;;  %s91_s3 = sld [smem:[#allocation5]]  ;;  %v95_v39 = vlaneseq }
  0x17   :  { %v3591_v2 = vld [vmem:[#allocation9 + $0x1e0] sm:$0xf]  ;;  %v3464_v3 = vor.u32 %v3850_v1, %v3463_v0  ;;  %v3882_v4 = vld [vmem:[#allocation9 + $0x1ec] sm:$0xf0]  ;;  %v3848_v31 = vld [vmem:[#allocation9 + $0xe4] sm:$0xf] }
  0x18   :  { %v3447_v5 = vld [vmem:[#allocation9 + $0xc0] sm:$0xf]  ;;  %v3846_v6 = vld [vmem:[#allocation9 + $0xcc] sm:$0xf0]  ;;  %v3592_v7 = vor.u32 %v3882_v4, %v3591_v2  ;;  %v3465_v32 = vld [vmem:[#allocation9 + $0xf0] sm:$0xf0] }
  0x19   :  { %v3575_v8 = vld [vmem:[#allocation9 + $0x1c0] sm:$0xf]  ;;  %v3878_v9 = vld [vmem:[#allocation9 + $0x1cc] sm:$0xf0]  ;;  %818 = vmatpush.bf16.msra.mxu0 %v3464_v3  ;;  %v3448_v11 = vor.u32 %v3846_v6, %v3447_v5  ;;  %v3468_v33 = vor.u32 %v3848_v31, %v3465_v32  ;;  %s3318_s6 = sld [smem:[#allocation5 + $0x80]]  ;;  %vm4319_vm1 = vcmp.lt.s32.totalorder %v95_v39, 300 }
  0x1a   :  { %v3639_v10 = vld [vmem:[#allocation9 + $0x240] sm:$0xf]  ;;  %v3894_v12 = vld [vmem:[#allocation9 + $0x24c] sm:$0x30]  ;;  %837 = vmatpush.bf16.msra.mxu1 %v3592_v7  ;;  %v3576_v13 = vor.u32 %v3878_v9, %v3575_v8  ;;  %s3319_s26 = sld [smem:[#allocation5 + $0x100]]  ;;  %vm798_vm2 = vcmask 359424  }
  0x1b   :  { %v3640_v14 = vor.u32 %v3894_v12, %v3639_v10  ;;  %v3431_v15 = vld [vmem:[#allocation9 + $0xa0] sm:$0xf]  ;;  %v3842_v16 = vld [vmem:[#allocation9 + $0xac] sm:$0xf0]  ;;  %875 = vmatpush.bf16.msra.mxu3 %v3468_v33  ;;  %s3320_s27 = sld [smem:[#allocation5 + $0x180]]  ;;  %vm5270_vm13 = vcmask 519168  }
  0x1c   :  { %v3559_v17 = vld [vmem:[#allocation9 + $0x1a0] sm:$0xf]  ;;  %v3874_v18 = vld [vmem:[#allocation9 + $0x1ac] sm:$0xf0]  ;;  %v3432_v23 = vor.u32 %v3842_v16, %v3431_v15  ;;  %s3321_s28 = sld [smem:[#allocation5 + $0x1]]  ;;  %s92_s30 = smul.u32 3, %s91_s3 }
  0x1d   :  { %v3623_v19 = vld [vmem:[#allocation9 + $0x220] sm:$0xf]  ;;  %v3890_v20 = vld [vmem:[#allocation9 + $0x22c] sm:$0xf0]  ;;  %v807_v21 = vsel %vm805_vm0, %v3640_v14, 0  ;;  %819 = vmatpush.bf16.msra.mxu0 %v3448_v11  ;;  %v3560_v28 = vor.u32 %v3874_v18, %v3559_v17  ;;  %s4314_s29 = sld [smem:[#allocation5 + $0x81]] }
  0x1e   :  { %v3415_v22 = vld [vmem:[#allocation9 + $0x80] sm:$0xf]  ;;  %861 = vmatpush.bf16.msra.mxu2 %v807_v21  ;;  %v3624_v24 = vor.u32 %v3890_v20, %v3623_v19  ;;  %v3838_v25 = vld [vmem:[#allocation9 + $0x8c] sm:$0xf0]  ;;  %838 = vmatpush.bf16.msra.mxu1 %v3576_v13  ;;  %s4316_s9 = sld [smem:[#allocation5 + $0x101]]  ;;  %s93_s14 = scalar_lea.vmem %s5261_s2, %s92_s30  ;;  %vm1154_vm14 = vcmask 523264  }
  0x1f   :  { %v3543_v26 = vld [vmem:[#allocation9 + $0x180] sm:$0xf]  ;;  %v3870_v27 = vld [vmem:[#allocation9 + $0x18c] sm:$0xf0]  ;;  %v3416_v34 = vor.u32 %v3838_v25, %v3415_v22  ;;  %s102_s10 = smul.u32 3, %s3318_s6  ;;  %s4323_s11 = sld [smem:[#allocation5 + $0x181]] }
  0x20   :  { %v3607_v29 = vld [vmem:[#allocation9 + $0x200] sm:$0xf]  ;;  %v3886_v30 = vld [vmem:[#allocation9 + $0x20c] sm:$0xf0]  ;;  %v3544_v36 = vor.u32 %v3870_v27, %v3543_v26  ;;  %s109_s15 = smul.u32 3, %s3319_s26  ;;  %s4370_s17 = sld [smem:[#allocation5 + $0x82]] }
  0x21   :  { %820 = vmatpush.bf16.msra.mxu0 %v3432_v23  ;;  %v3608_v35 = vor.u32 %v3886_v30, %v3607_v29  ;;  %v3399_v37 = vld [vmem:[#allocation9 + $0x60] sm:$0xf]  ;;  %v3834_v38 = vld [vmem:[#allocation9 + $0x6c] sm:$0xf0]  ;;  %s103_s18 = scalar_lea.vmem %s5261_s2, %s102_s10  ;;  %s116_s4 = smul.u32 3, %s3320_s27 }
  0x22   :  { %862 = vmatpush.bf16.msra.mxu2 %v3624_v24  ;;  %839 = vmatpush.bf16.msra.mxu1 %v3560_v28  ;;  %v3400_v40 = vor.u32 %v3834_v38, %v3399_v37  ;;  %v94_v42 = vld [vmem:[%s93_s14] sm:$0x7]  ;;  %s110_s21 = scalar_lea.vmem %s5261_s2, %s109_s15  ;;  %s123_s22 = smul.u32 3, %s3321_s28  ;;  %v3866_v51 = vld [vmem:[#allocation9 + $0x16c] sm:$0xf0] }
  0x23   :  { %99 = vst.msk [vmem:[#allocation2] ss:$8 sm:$0x7] %vm4319_vm1, %v94_v42  ;;  %v104_v43 = vld [vmem:[%s103_s18] sm:$0x7]  ;;  %s117_s24 = scalar_lea.vmem %s5261_s2, %s116_s4  ;;  %s130_s25 = smul.u32 3, %s4314_s29 }
  0x24   :  { %106 = vst.msk [vmem:[#allocation2 + $0x1] ss:$8 sm:$0x7] %vm4319_vm1, %v104_v43  ;;  %v111_v44 = vld [vmem:[%s110_s21] sm:$0x7]  ;;  %s124_s26 = scalar_lea.vmem %s5261_s2, %s123_s22  ;;  %s137_s27 = smul.u32 3, %s4316_s9 }
  0x25   :  { %821 = vmatpush.bf16.msra.mxu0 %v3416_v34  ;;  %113 = vst.msk [vmem:[#allocation2 + $0x2] ss:$8 sm:$0x7] %vm4319_vm1, %v111_v44  ;;  %v118_v45 = vld [vmem:[%s117_s24] sm:$0x7]  ;;  %s131_s10 = scalar_lea.vmem %s5261_s2, %s130_s25  ;;  %s144_s12 = smul.u32 3, %s4323_s11 }
  0x26   :  { %863 = vmatpush.bf16.msra.mxu2 %v3608_v35  ;;  %840 = vmatpush.bf16.msra.mxu1 %v3544_v36  ;;  %120 = vst.msk [vmem:[#allocation2 + $0x3] ss:$8 sm:$0x7] %vm4319_vm1, %v118_v45  ;;  %v125_v46 = vld [vmem:[%s124_s26] sm:$0x7]  ;;  %s138_s14 = scalar_lea.vmem %s5261_s2, %s137_s27  ;;  %s4368_s11 = sld [smem:[#allocation5 + $0x2]] }
  0x27   :  { %127 = vst.msk [vmem:[#allocation2 + $0x4] ss:$8 sm:$0x7] %vm4319_vm1, %v125_v46  ;;  %v132_v47 = vld [vmem:[%s131_s10] sm:$0x7]  ;;  %s145_s16 = scalar_lea.vmem %s5261_s2, %s144_s12  ;;  %s4372_s18 = sld [smem:[#allocation5 + $0x102]] }
  0x28   :  { %134 = vst.msk [vmem:[#allocation2 + $0x5] ss:$8 sm:$0x7] %vm4319_vm1, %v132_v47  ;;  %v139_v48 = vld [vmem:[%s138_s14] sm:$0x7]  ;;  %s4374_s4 = sld [smem:[#allocation5 + $0x182]] }
  0x29   :  { %822 = vmatpush.bf16.msra.mxu0 %v3400_v40  ;;  %141 = vst.msk [vmem:[#allocation2 + $0x6] ss:$8 sm:$0x7] %vm4319_vm1, %v139_v48  ;;  %v146_v49 = vld [vmem:[%s145_s16] sm:$0x7]  ;;  %s4376_s19 = sld [smem:[#allocation5 + $0x3]] }
  0x2a   :  { %148 = vst.msk [vmem:[#allocation2 + $0x7] ss:$8 sm:$0x7] %vm4319_vm1, %v146_v49  ;;  %v3527_v50 = vld [vmem:[#allocation9 + $0x160] sm:$0xf]  ;;  %s4378_s20 = sld [smem:[#allocation5 + $0x83]] }
  0x2b   :  { %v3528_v52 = vor.u32 %v3866_v51, %v3527_v50  ;;  %v3880_v53 = vld [vmem:[#allocation9 + $0x1e4] sm:$0xf]  ;;  %v3593_v54 = vld [vmem:[#allocation9 + $0x1f0] sm:$0xf0]  ;;  %v3383_v56 = vld [vmem:[#allocation9 + $0x40] sm:$0xf] }
  0x2c   :  { %v3596_v55 = vor.u32 %v3880_v53, %v3593_v54  ;;  %v3830_v57 = vld [vmem:[#allocation9 + $0x4c] sm:$0xf0]  ;;  %v3844_v59 = vld [vmem:[#allocation9 + $0xc4] sm:$0xf]  ;;  %v3449_v60 = vld [vmem:[#allocation9 + $0xd0] sm:$0xf0] }
  0x2d   :  { %841 = vmatpush.bf16.msra.mxu1 %v3528_v52  ;;  %v3384_v58 = vor.u32 %v3830_v57, %v3383_v56  ;;  %v3452_v61 = vor.u32 %v3844_v59, %v3449_v60  ;;  %v3511_v62 = vld [vmem:[#allocation9 + $0x140] sm:$0xf]  ;;  %v3862_v63 = vld [vmem:[#allocation9 + $0x14c] sm:$0xf0]  ;;  %s151_s21 = smul.u32 3, %s4368_s11  ;;  %s4381_s22 = sld [smem:[#allocation5 + $0x103]] }
  0x2e   :  { %894 = vmatpush.bf16.msrb.mxu2 %v3596_v55  ;;  %v3512_v0 = vor.u32 %v3862_v63, %v3511_v62  ;;  %v3876_v1 = vld [vmem:[#allocation9 + $0x1c4] sm:$0xf]  ;;  %s158_s0 = smul.u32 3, %s4370_s17  ;;  %s4384_s23 = sld [smem:[#allocation5 + $0x183]]  ;;  %v3577_v2 = vld [vmem:[#allocation9 + $0x1d0] sm:$0xf0] }
  0x2f   :  { %823 = vmatpush.bf16.msra.mxu0 %v3384_v58  ;;  %876 = vmatpush.bf16.msra.mxu3 %v3452_v61  ;;  %s152_s3 = scalar_lea.vmem %s5261_s2, %s151_s21  ;;  %s165_s6 = smul.u32 3, %s4372_s18  ;;  %v3580_v3 = vor.u32 %v3876_v1, %v3577_v2  ;;  %v3367_v4 = vld [vmem:[#allocation9 + $0x20] sm:$0xf]  ;;  %v3826_v5 = vld [vmem:[#allocation9 + $0x2c] sm:$0xf0] }
  0x30   :  { %v153_v6 = vld [vmem:[%s152_s3] sm:$0x7]  ;;  %s159_s28 = scalar_lea.vmem %s5261_s2, %s158_s0  ;;  %s172_s30 = smul.u32 3, %s4374_s4  ;;  %v3368_v7 = vor.u32 %v3826_v5, %v3367_v4  ;;  %v3840_v12 = vld [vmem:[#allocation9 + $0xa4] sm:$0xf] }
  0x31   :  { %842 = vmatpush.bf16.msra.mxu1 %v3512_v0  ;;  %155 = vst.msk [vmem:[#allocation2 + $0x18] ss:$8 sm:$0x7] %vm4319_vm1, %v153_v6  ;;  %v160_v8 = vld [vmem:[%s159_s28] sm:$0x7]  ;;  %s166_s29 = scalar_lea.vmem %s5261_s2, %s165_s6  ;;  %s179_s13 = smul.u32 3, %s4376_s19 }
  0x32   :  { %895 = vmatpush.bf16.msrb.mxu2 %v3580_v3  ;;  %162 = vst.msk [vmem:[#allocation2 + $0x19] ss:$8 sm:$0x7] %vm4319_vm1, %v160_v8  ;;  %v167_v9 = vld [vmem:[%s166_s29] sm:$0x7]  ;;  %s173_s15 = scalar_lea.vmem %s5261_s2, %s172_s30  ;;  %s186_s16 = smul.u32 3, %s4378_s20 }
  0x33   :  { %824 = vmatpush.bf16.msra.mxu0 %v3368_v7  ;;  %169 = vst.msk [vmem:[#allocation2 + $0x1a] ss:$8 sm:$0x7] %vm4319_vm1, %v167_v9  ;;  %v174_v10 = vld [vmem:[%s173_s15] sm:$0x7]  ;;  %s180_s18 = scalar_lea.vmem %s5261_s2, %s179_s13  ;;  %s193_s4 = smul.u32 3, %s4381_s22 }
  0x34   :  { %176 = vst.msk [vmem:[#allocation2 + $0x1b] ss:$8 sm:$0x7] %vm4319_vm1, %v174_v10  ;;  %v181_v11 = vld [vmem:[%s180_s18] sm:$0x7]  ;;  %s187_s0 = scalar_lea.vmem %s5261_s2, %s186_s16  ;;  %s200_s24 = smul.u32 3, %s4384_s23 }
  0x35   :  { %183 = vst.msk [vmem:[#allocation2 + $0x1c] ss:$8 sm:$0x7] %vm4319_vm1, %v181_v11  ;;  %v188_v13 = vld [vmem:[%s187_s0] sm:$0x7]  ;;  %s194_s3 = scalar_lea.vmem %s5261_s2, %s193_s4  ;;  %v320_v25 = vld [vmem:[#allocation2 + $0x10] sm:$0xff] }
  0x36   :  { %190 = vst.msk [vmem:[#allocation2 + $0x1d] ss:$8 sm:$0x7] %vm4319_vm1, %v188_v13  ;;  %v195_v14 = vld [vmem:[%s194_s3] sm:$0x7]  ;;  %s201_s26 = scalar_lea.vmem %s5261_s2, %s200_s24  ;;  %v319_v32 = vld [vmem:[#allocation2 + $0x8] sm:$0xff] }
  0x37   :  { %197 = vst.msk [vmem:[#allocation2 + $0x1e] ss:$8 sm:$0x7] %vm4319_vm1, %v195_v14  ;;  %v202_v15 = vld [vmem:[%s201_s26] sm:$0x7]  ;;  %s3333_s23 = sld [smem:[#allocation5 + $0x4]] }
  0x38   :  { %204 = vst.msk [vmem:[#allocation2 + $0x1f] ss:$8 sm:$0x7] %vm4319_vm1, %v202_v15  ;;  %v3433_v16 = vld [vmem:[#allocation9 + $0xb0] sm:$0xf0]  ;;  %v318_v31 = vld [vmem:[#allocation2] sm:$0xff] }
  0x39   :  { %v3436_v17 = vor.u32 %v3840_v12, %v3433_v16  ;;  %v3495_v18 = vld [vmem:[#allocation9 + $0x120] sm:$0xf]  ;;  %v3858_v19 = vld [vmem:[#allocation9 + $0x12c] sm:$0xf0]  ;;  %v3872_v20 = vld [vmem:[#allocation9 + $0x1a4] sm:$0xf] }
  0x3a   :  { %v3496_v21 = vor.u32 %v3858_v19, %v3495_v18  ;;  %v3561_v22 = vld [vmem:[#allocation9 + $0x1b0] sm:$0xf0]  ;;  %v3351_v23 = vld [vmem:[#allocation9] sm:$0xf]  ;;  %v3822_v24 = vld [vmem:[#allocation9 + $0xc] sm:$0xf0] }
  0x3b   :  { %877 = vmatpush.bf16.msra.mxu3 %v3436_v17  ;;  %v3564_v26 = vor.u32 %v3872_v20, %v3561_v22  ;;  %v3352_v27 = vor.u32 %v3822_v24, %v3351_v23  ;;  %v3836_v28 = vld [vmem:[#allocation9 + $0x84] sm:$0xf]  ;;  %v3417_v29 = vld [vmem:[#allocation9 + $0x90] sm:$0xf0]  ;;  %v3479_v30 = vld [vmem:[#allocation9 + $0x100] sm:$0xf] }
  0x3c   :  { %843 = vmatpush.bf16.msra.mxu1 %v3496_v21  ;;  %v3420_v33 = vor.u32 %v3836_v28, %v3417_v29  ;;  %v3854_v34 = vld [vmem:[#allocation9 + $0x10c] sm:$0xf0]  ;;  %v3868_v35 = vld [vmem:[#allocation9 + $0x184] sm:$0xf]  ;;  %v3545_v36 = vld [vmem:[#allocation9 + $0x190] sm:$0xf0] }
  0x3d   :  { %896 = vmatpush.bf16.msrb.mxu2 %v3564_v26  ;;  %825 = vmatpush.bf16.msra.mxu0 %v3352_v27  ;;  %v3480_v37 = vor.u32 %v3854_v34, %v3479_v30  ;;  %v3548_v38 = vor.u32 %v3868_v35, %v3545_v36  ;;  %v3832_v40 = vld [vmem:[#allocation9 + $0x64] sm:$0xf]  ;;  %v3401_v42 = vld [vmem:[#allocation9 + $0x70] sm:$0xf0]  ;;  %s3334_s27 = sld [smem:[#allocation5 + $0x84]]  ;;  %s207_s29 = smul.u32 3, %s3333_s23 }
  0x3e   :  { %v3404_v45 = vor.u32 %v3832_v40, %v3401_v42  ;;  %s3335_s28 = sld [smem:[#allocation5 + $0x104]]  ;;  %v3864_v58 = vld [vmem:[#allocation9 + $0x164] sm:$0xf]  ;;  %v3529_v59 = vld [vmem:[#allocation9 + $0x170] sm:$0xf0] }
  0x3f   :  { %v323_v43 = vld [vmem:[#allocation2 + $0x28] sm:$0xff]  ;;  %878 = vmatpush.bf16.msra.mxu3 %v3420_v33  ;;  %v321_v44 = vld [vmem:[#allocation2 + $0x18] sm:$0xff]  ;;  %v322_v46 = vld [vmem:[#allocation2 + $0x20] sm:$0xff]  ;;  %s3336_s30 = sld [smem:[#allocation5 + $0x184]]  ;;  %s208_s11 = scalar_lea.vmem %s5261_s2, %s207_s29  ;;  %v3532_v60 = vor.u32 %v3864_v58, %v3529_v59 }
  0x40   :  { %v4432_v47 = vpack.c.bf16 %v323_v43, %v320_v25  ;;  %844 = vmatpush.bf16.msra.mxu1 %v3480_v37  ;;  %v4434_v48 = vpack.c.bf16 %v321_v44, %v318_v31  ;;  %v4436_v49 = vpack.c.bf16 %v322_v46, %v319_v32  ;;  %s3337_s10 = sld [smem:[#allocation5 + $0x5]]  ;;  %v209_v50 = vld [vmem:[%s208_s11] sm:$0x7]  ;;  %v3828_v61 = vld [vmem:[#allocation9 + $0x44] sm:$0xf] }
  0x41   :  { %897 = vmatpush.bf16.msrb.mxu2 %v3548_v38  ;;  %s3338_s12 = sld [smem:[#allocation5 + $0x85]]  ;;  %211 = vst.msk [vmem:[#allocation2 + $0x30] ss:$8 sm:$0x7] %vm4319_vm1, %v209_v50  ;;  %v3385_v62 = vld [vmem:[#allocation9 + $0x50] sm:$0xf0] }
  0x42   :  { %3653 = vmatmul.msk.bf16.vlgmr.msra.gmra.mxu2 %vm798_vm2, %v4432_v47  ;;  %826 = vmatmul.bf16.vlgmr.msra.gmra.mxu0 %v4434_v48  ;;  %s3339_s13 = sld [smem:[#allocation5 + $0x105]]  ;;  %v3388_v63 = vor.u32 %v3828_v61, %v3385_v62  ;;  %v3860_v0 = vld [vmem:[#allocation9 + $0x144] sm:$0xf]  ;;  %v3513_v1 = vld [vmem:[#allocation9 + $0x150] sm:$0xf0] }
  0x43   :  { %879 = vmatpush.bf16.msra.mxu3 %v3404_v45  ;;  %845 = vmatmul.bf16.vlgmr.msra.gmra.mxu1 %v4436_v49  ;;  %s214_s14 = smul.u32 3, %s3334_s27  ;;  %s3340_s9 = sld [smem:[#allocation5 + $0x185]]  ;;  %v3516_v2 = vor.u32 %v3860_v0, %v3513_v1  ;;  %v3824_v3 = vld [vmem:[#allocation9 + $0x24] sm:$0xf]  ;;  %v3369_v4 = vld [vmem:[#allocation9 + $0x30] sm:$0xf0] }
  0x44   :  { %s221_s17 = smul.u32 3, %s3335_s28  ;;  %s4484_s4 = sld [smem:[#allocation5 + $0x86]]  ;;  %v3372_v5 = vor.u32 %v3824_v3, %v3369_v4  ;;  %v3856_v6 = vld [vmem:[#allocation9 + $0x124] sm:$0xf]  ;;  %v3497_v7 = vld [vmem:[#allocation9 + $0x130] sm:$0xf0] }
  0x45   :  { %s215_s19 = scalar_lea.vmem %s5261_s2, %s214_s14  ;;  %s228_s21 = smul.u32 3, %s3336_s30  ;;  %898 = vmatpush.bf16.msrb.mxu2 %v3532_v60  ;;  %v3820_v8 = vld [vmem:[#allocation9 + $0x4] sm:$0xf]  ;;  %v3353_v9 = vld [vmem:[#allocation9 + $0x10] sm:$0xf0]  ;;  %v3500_v10 = vor.u32 %v3856_v6, %v3497_v7 }
  0x46   :  { %v216_v51 = vld [vmem:[%s215_s19] sm:$0x7]  ;;  %s222_s20 = scalar_lea.vmem %s5261_s2, %s221_s17  ;;  %s235_s25 = smul.u32 3, %s3337_s10  ;;  %v3852_v11 = vld [vmem:[#allocation9 + $0x104] sm:$0xf]  ;;  %v3356_v13 = vor.u32 %v3820_v8, %v3353_v9 }
  0x47   :  { %218 = vst.msk [vmem:[#allocation2 + $0x31] ss:$8 sm:$0x7] %vm4319_vm1, %v216_v51  ;;  %v223_v52 = vld [vmem:[%s222_s20] sm:$0x7]  ;;  %s229_s6 = scalar_lea.vmem %s5261_s2, %s228_s21  ;;  %s242_s26 = smul.u32 3, %s3338_s12  ;;  %880 = vmatpush.bf16.msra.mxu3 %v3388_v63 }
  0x48   :  { %225 = vst.msk [vmem:[#allocation2 + $0x32] ss:$8 sm:$0x7] %vm4319_vm1, %v223_v52  ;;  %v230_v53 = vld [vmem:[%s229_s6] sm:$0x7]  ;;  %s236_s28 = scalar_lea.vmem %s5261_s2, %s235_s25  ;;  %s249_s30 = smul.u32 3, %s3339_s13 }
  0x49   :  { %232 = vst.msk [vmem:[#allocation2 + $0x33] ss:$8 sm:$0x7] %vm4319_vm1, %v230_v53  ;;  %v237_v54 = vld [vmem:[%s236_s28] sm:$0x7]  ;;  %s243_s14 = scalar_lea.vmem %s5261_s2, %s242_s26  ;;  %s256_s15 = smul.u32 3, %s3340_s9  ;;  %899 = vmatpush.bf16.msrb.mxu2 %v3516_v2 }
  0x4a   :  { %239 = vst.msk [vmem:[#allocation2 + $0x34] ss:$8 sm:$0x7] %vm4319_vm1, %v237_v54  ;;  %v244_v55 = vld [vmem:[%s243_s14] sm:$0x7]  ;;  %s250_s11 = scalar_lea.vmem %s5261_s2, %s249_s30  ;;  %s4482_s9 = sld [smem:[#allocation5 + $0x6]] }
  0x4b   :  { %246 = vst.msk [vmem:[#allocation2 + $0x35] ss:$8 sm:$0x7] %vm4319_vm1, %v244_v55  ;;  %v251_v56 = vld [vmem:[%s250_s11] sm:$0x7]  ;;  %s257_s18 = scalar_lea.vmem %s5261_s2, %s256_s15  ;;  %s4486_s19 = sld [smem:[#allocation5 + $0x106]]  ;;  %881 = vmatpush.bf16.msra.mxu3 %v3372_v5 }
  0x4c   :  { %253 = vst.msk [vmem:[#allocation2 + $0x36] ss:$8 sm:$0x7] %vm4319_vm1, %v251_v56  ;;  %v258_v57 = vld [vmem:[%s257_s18] sm:$0x7]  ;;  %s4488_s21 = sld [smem:[#allocation5 + $0x186]] }
  0x4d   :  { %260 = vst.msk [vmem:[#allocation2 + $0x37] ss:$8 sm:$0x7] %vm4319_vm1, %v258_v57  ;;  %s4490_s0 = sld [smem:[#allocation5 + $0x7]]  ;;  %s270_s3 = smul.u32 3, %s4484_s4  ;;  %900 = vmatpush.bf16.msrb.mxu2 %v3500_v10 }
  0x4e   :  { %s4492_s24 = sld [smem:[#allocation5 + $0x87]]  ;;  %v3481_v14 = vld [vmem:[#allocation9 + $0x110] sm:$0xf0]  ;;  %v3599_v20 = vld [vmem:[#allocation9 + $0x1e8] sm:$0xf] }
  0x4f   :  { %s4495_s25 = sld [smem:[#allocation5 + $0x107]]  ;;  %s271_s10 = scalar_lea.vmem %s5261_s2, %s270_s3  ;;  %v3484_v18 = vor.u32 %v3852_v11, %v3481_v14  ;;  %882 = vmatpush.bf16.msra.mxu3 %v3356_v13  ;;  %v3883_v24 = vld [vmem:[#allocation9 + $0x1f4] sm:$0xf0]  ;;  %v3892_v26 = vld [vmem:[#allocation9 + $0x244] sm:$0xf] }
  0x50   :  { %s263_s20 = smul.u32 3, %s4482_s9  ;;  %s4498_s22 = sld [smem:[#allocation5 + $0x187]]  ;;  %v272_v15 = vld [vmem:[%s271_s10] sm:$0x7]  ;;  %v3600_v25 = vor.u32 %v3883_v24, %v3599_v20  ;;  %v3641_v27 = vld [vmem:[#allocation9 + $0x250] sm:$0x30] }
  0x51   :  { %s277_s27 = smul.u32 3, %s4486_s19  ;;  %274 = vst.msk [vmem:[#allocation2 + $0x49] ss:$8 sm:$0x7] %vm4319_vm1, %v272_v15  ;;  %901 = vmatpush.bf16.msrb.mxu2 %v3484_v18  ;;  %v3471_v28 = vld [vmem:[#allocation9 + $0xe8] sm:$0xf]  ;;  %v3644_v29 = vor.u32 %v3892_v26, %v3641_v27 }
  0x52   :  { %s264_s23 = scalar_lea.vmem %s5261_s2, %s263_s20  ;;  %s284_s29 = smul.u32 3, %s4488_s21  ;;  %883 = vmatmul.bf16.vlgmr.msra.gmra.mxu3 %v4434_v48  ;;  %v3851_v30 = vld [vmem:[#allocation9 + $0xf4] sm:$0xf0]  ;;  %v3583_v31 = vld [vmem:[#allocation9 + $0x1c8] sm:$0xf] }
  0x53   :  { %v265_v12 = vld [vmem:[%s264_s23] sm:$0x7]  ;;  %s278_s12 = scalar_lea.vmem %s5261_s2, %s277_s27  ;;  %s291_s16 = smul.u32 3, %s4490_s0  ;;  %v3879_v32 = vld [vmem:[#allocation9 + $0x1d4] sm:$0xf0]  ;;  %951 = vmatpush.bf16.msrb.mxu3 %v3600_v25  ;;  %v3472_v35 = vor.u32 %v3851_v30, %v3471_v28  ;;  %v810_v41 = vsel %vm805_vm0, %v3644_v29, 0 }
  0x54   :  { %267 = vst.msk [vmem:[#allocation2 + $0x48] ss:$8 sm:$0x7] %vm4319_vm1, %v265_v12  ;;  %v279_v16 = vld [vmem:[%s278_s12] sm:$0x7]  ;;  %s285_s17 = scalar_lea.vmem %s5261_s2, %s284_s29  ;;  %s298_s18 = smul.u32 3, %s4492_s24  ;;  %v3584_v36 = vor.u32 %v3879_v32, %v3583_v31  ;;  %918 = vmatpush.bf16.msrb.mxu0 %v810_v41 }
  0x55   :  { %281 = vst.msk [vmem:[#allocation2 + $0x4a] ss:$8 sm:$0x7] %vm4319_vm1, %v279_v16  ;;  %v286_v17 = vld [vmem:[%s285_s17] sm:$0x7]  ;;  %s292_s19 = scalar_lea.vmem %s5261_s2, %s291_s16  ;;  %s305_s21 = smul.u32 3, %s4495_s25  ;;  %932 = vmatpush.bf16.msrb.mxu1 %v3472_v35 }
  0x56   :  { %288 = vst.msk [vmem:[#allocation2 + $0x4b] ss:$8 sm:$0x7] %vm4319_vm1, %v286_v17  ;;  %v293_v19 = vld [vmem:[%s292_s19] sm:$0x7]  ;;  %s299_s3 = scalar_lea.vmem %s5261_s2, %s298_s18  ;;  %s312_s24 = smul.u32 3, %s4498_s22 }
  0x57   :  { %295 = vst.msk [vmem:[#allocation2 + $0x4c] ss:$8 sm:$0x7] %vm4319_vm1, %v293_v19  ;;  %v300_v21 = vld [vmem:[%s299_s3] sm:$0x7]  ;;  %s306_s25 = scalar_lea.vmem %s5261_s2, %s305_s21  ;;  %v324_v34 = vld [vmem:[#allocation2 + $0x30] sm:$0xff]  ;;  %952 = vmatpush.bf16.msrb.mxu3 %v3584_v36 }
  0x58   :  { %302 = vst.msk [vmem:[#allocation2 + $0x4d] ss:$8 sm:$0x7] %vm4319_vm1, %v300_v21  ;;  %v307_v22 = vld [vmem:[%s306_s25] sm:$0x7]  ;;  %s313_s28 = scalar_lea.vmem %s5261_s2, %s312_s24  ;;  %v325_v42 = vld [vmem:[#allocation2 + $0x38] sm:$0xff] }
  0x59   :  { %309 = vst.msk [vmem:[#allocation2 + $0x4e] ss:$8 sm:$0x7] %vm4319_vm1, %v307_v22  ;;  %v314_v23 = vld [vmem:[%s313_s28] sm:$0x7]  ;;  %s4255_s9 = smov [#allocation13]  }
  0x5a   :  { %316 = vst.msk [vmem:[#allocation2 + $0x4f] ss:$8 sm:$0x7] %vm4319_vm1, %v314_v23  ;;  %v326_v33 = vld [vmem:[#allocation2 + $0x40] sm:$0xff]  ;;  %v3625_v38 = vld [vmem:[#allocation9 + $0x230] sm:$0xf0] }
  0x5b   :  { %v3888_v37 = vld [vmem:[#allocation9 + $0x224] sm:$0xf]  ;;  %v3455_v40 = vld [vmem:[#allocation9 + $0xc8] sm:$0xf]  ;;  %v3847_v43 = vld [vmem:[#allocation9 + $0xd4] sm:$0xf0] }
  0x5c   :  { %v3567_v44 = vld [vmem:[#allocation9 + $0x1a8] sm:$0xf]  ;;  %v3628_v45 = vor.u32 %v3888_v37, %v3625_v38  ;;  %v3456_v46 = vor.u32 %v3847_v43, %v3455_v40  ;;  %v3875_v50 = vld [vmem:[#allocation9 + $0x1b4] sm:$0xf0]  ;;  %v3884_v54 = vld [vmem:[#allocation9 + $0x204] sm:$0xf] }
  0x5d   :  { %v3647_v51 = vld [vmem:[#allocation9 + $0x248] sm:$0xf]  ;;  %v3895_v52 = vld [vmem:[#allocation9 + $0x254] sm:$0x30]  ;;  %v3609_v55 = vld [vmem:[#allocation9 + $0x210] sm:$0xf0]  ;;  %v3568_v60 = vor.u32 %v3875_v50, %v3567_v44 }
  0x5e   :  { %v3648_v53 = vor.u32 %v3895_v52, %v3647_v51  ;;  %v3439_v56 = vld [vmem:[#allocation9 + $0xa8] sm:$0xf]  ;;  %v3843_v0 = vld [vmem:[#allocation9 + $0xb4] sm:$0xf0]  ;;  %919 = vmatpush.bf16.msrb.mxu0 %v3628_v45  ;;  %933 = vmatpush.bf16.msrb.mxu1 %v3456_v46  ;;  %v3612_v3 = vor.u32 %v3884_v54, %v3609_v55  ;;  %v3687_v38 = vld [vmem:[#allocation10 + $0x60] sm:$0xf] }
  0x5f   :  { %v3551_v1 = vld [vmem:[#allocation9 + $0x188] sm:$0xf]  ;;  %v3440_v4 = vor.u32 %v3843_v0, %v3439_v56  ;;  %v3871_v5 = vld [vmem:[#allocation9 + $0x194] sm:$0xf0]  ;;  %953 = vmatpush.bf16.msrb.mxu3 %v3568_v60  ;;  %v3903_v40 = vld [vmem:[#allocation10 + $0x6c] sm:$0xf0] }
  0x60   :  { %v813_v2 = vsel %vm805_vm0, %v3648_v53, 0  ;;  %v3423_v6 = vld [vmem:[#allocation9 + $0x88] sm:$0xf]  ;;  %v3839_v7 = vld [vmem:[#allocation9 + $0x94] sm:$0xf0]  ;;  %v3552_v8 = vor.u32 %v3871_v5, %v3551_v1  ;;  %v4563_v41 = vor.u32 %v3903_v40, %v3687_v38  ;;  %v4245_v53 = vmov 0  }
  0x61   :  { %v329_v57 = vld [vmem:[#allocation2 + $0x58] sm:$0xff]  ;;  %v327_v58 = vld [vmem:[#allocation2 + $0x48] sm:$0xff]  ;;  %v328_v59 = vld [vmem:[#allocation2 + $0x50] sm:$0xff]  ;;  %975 = vmatpush.bf16.msra.mxu2 %v813_v2  ;;  %v3424_v13 = vor.u32 %v3839_v7, %v3423_v6  ;;  %3931 = vset.pattern.permute.xlu0 %v4245_v53  ;;  %s3240_s4 = sshll.u32 %s4255_s9, 4  ;;  %s3242_s0 = sshll.u32 %s5267_s8, 4  ;;  %s3241_s4 = int_to_ptr.vmem [resolvable:$true] %s3240_s4  ;;  %s3243_s0 = int_to_ptr.hbm [resolvable:$true] %s3242_s0 }
  0x62   :  { %v4548_v61 = vpack.c.bf16 %v329_v57, %v326_v33  ;;  %v4550_v62 = vpack.c.bf16 %v327_v58, %v324_v34  ;;  %v4552_v63 = vpack.c.bf16 %v328_v59, %v325_v42  ;;  %v3535_v9 = vld [vmem:[#allocation9 + $0x168] sm:$0xf]  ;;  %v3867_v10 = vld [vmem:[#allocation9 + $0x174] sm:$0xf0]  ;;  %920 = vmatpush.bf16.msrb.mxu0 %v3612_v3  ;;  %934 = vmatpush.bf16.msrb.mxu1 %v3440_v4  ;;  %v3679_v44 = vld [vmem:[#allocation10 + $0x40] sm:$0xf] }
  0x63   :  { %v3631_v11 = vld [vmem:[#allocation9 + $0x228] sm:$0xf]  ;;  %v3891_v12 = vld [vmem:[#allocation9 + $0x234] sm:$0xf0]  ;;  %954 = vmatpush.bf16.msrb.mxu3 %v3552_v8  ;;  %v3536_v17 = vor.u32 %v3867_v10, %v3535_v9  ;;  %v3901_v45 = vld [vmem:[#allocation10 + $0x4c] sm:$0xf0] }
  0x64   :  { %3654 = vmatmul.msk.bf16.gmra.mxu2 %vm798_vm2, %v4548_v61  ;;  %831 = vmatmul.bf16.gmra.mxu0 %v4550_v62  ;;  %v3632_v14 = vor.u32 %v3891_v12, %v3631_v11  ;;  %v3407_v15 = vld [vmem:[#allocation9 + $0x68] sm:$0xf]  ;;  %v3835_v16 = vld [vmem:[#allocation9 + $0x74] sm:$0xf0]  ;;  %v3671_v46 = vld [vmem:[#allocation10 + $0x20] sm:$0xf]  ;;  %v4571_v50 = vor.u32 %v3901_v45, %v3679_v44 }
  0x65   :  { %850 = vmatmul.bf16.gmra.mxu1 %v4552_v63  ;;  %v3615_v18 = vld [vmem:[#allocation9 + $0x208] sm:$0xf]  ;;  %v3887_v19 = vld [vmem:[#allocation9 + $0x214] sm:$0xf0]  ;;  %888 = vmatmul.bf16.gmra.mxu3 %v4550_v62  ;;  %v3408_v23 = vor.u32 %v3835_v16, %v3407_v15  ;;  %v3899_v51 = vld [vmem:[#allocation10 + $0x2c] sm:$0xf0] }
  0x66   :  { %v3519_v20 = vld [vmem:[#allocation9 + $0x148] sm:$0xf]  ;;  %v3863_v21 = vld [vmem:[#allocation9 + $0x154] sm:$0xf0]  ;;  %976 = vmatpush.bf16.msra.mxu2 %v3632_v14  ;;  %v3616_v22 = vor.u32 %v3887_v19, %v3615_v18  ;;  %935 = vmatpush.bf16.msrb.mxu1 %v3424_v13  ;;  %v4574_v52 = vor.u32 %v3899_v51, %v3671_v46  ;;  %v3663_v54 = vld [vmem:[#allocation10] sm:$0xf] }
  0x67   :  { %v3391_v24 = vld [vmem:[#allocation9 + $0x48] sm:$0xf]  ;;  %v3831_v25 = vld [vmem:[#allocation9 + $0x54] sm:$0xf0]  ;;  %955 = vmatpush.bf16.msrb.mxu3 %v3536_v17  ;;  %v3520_v26 = vor.u32 %v3863_v21, %v3519_v20  ;;  %v3897_v55 = vld [vmem:[#allocation10 + $0xc] sm:$0xf0] }
  0x68   :  { %v3503_v27 = vld [vmem:[#allocation9 + $0x128] sm:$0xf]  ;;  %v3859_v28 = vld [vmem:[#allocation9 + $0x134] sm:$0xf0]  ;;  %v3392_v29 = vor.u32 %v3831_v25, %v3391_v24  ;;  %v4578_v56 = vor.u32 %v3897_v55, %v3663_v54  ;;  %v3902_v57 = vld [vmem:[#allocation10 + $0x64] sm:$0xf] }
  0x69   :  { %v3375_v30 = vld [vmem:[#allocation9 + $0x28] sm:$0xf]  ;;  %v3827_v31 = vld [vmem:[#allocation9 + $0x34] sm:$0xf0]  ;;  %v3504_v32 = vor.u32 %v3859_v28, %v3503_v27  ;;  %v3689_v58 = vld [vmem:[#allocation10 + $0x70] sm:$0xf0] }
  0x6a   :  { %977 = vmatpush.bf16.msra.mxu2 %v3616_v22  ;;  %936 = vmatpush.bf16.msrb.mxu1 %v3408_v23  ;;  %v3487_v33 = vld [vmem:[#allocation9 + $0x108] sm:$0xf]  ;;  %v3855_v34 = vld [vmem:[#allocation9 + $0x114] sm:$0xf0]  ;;  %v3376_v35 = vor.u32 %v3827_v31, %v3375_v30  ;;  %v4583_v59 = vor.u32 %v3902_v57, %v3689_v58  ;;  %v3900_v60 = vld [vmem:[#allocation10 + $0x44] sm:$0xf] }
  0x6b   :  { %956 = vmatpush.bf16.msrb.mxu3 %v3520_v26  ;;  %v3359_v36 = vld [vmem:[#allocation9 + $0x8] sm:$0xf]  ;;  %v3823_v37 = vld [vmem:[#allocation9 + $0x14] sm:$0xf0]  ;;  %v3488_v42 = vor.u32 %v3855_v34, %v3487_v33  ;;  %v3681_v0 = vld [vmem:[#allocation10 + $0x50] sm:$0xf0] }
  0x6c   :  { %v3360_v43 = vor.u32 %v3823_v37, %v3359_v36  ;;  %v4588_v1 = vor.u32 %v3900_v60, %v3681_v0  ;;  %v3898_v2 = vld [vmem:[#allocation10 + $0x24] sm:$0xf]  ;;  %v3673_v3 = vld [vmem:[#allocation10 + $0x30] sm:$0xf0]  ;;  %v4603_v8 = vld [vmem:[%s5264_s5] sm:$0xf] }
  0x6d   :  { %v4591_v4 = vor.u32 %v3898_v2, %v3673_v3  ;;  %v3896_v5 = vld [vmem:[#allocation10 + $0x4] sm:$0xf]  ;;  %v3665_v6 = vld [vmem:[#allocation10 + $0x10] sm:$0xf0]  ;;  %v414_v9 = vperm.slane %v4603_v8, 0  ;;  %s4246_s5 = smov 64  }
  0x6e   :  { %937 = vmatpush.bf16.msrb.mxu1 %v3392_v29  ;;  %v4594_v7 = vor.u32 %v3896_v5, %v3665_v6 }
  0x6f   :  { %957 = vmatpush.bf16.msrb.mxu3 %v3504_v32 }
  0x72   :  { %938 = vmatpush.bf16.msrb.mxu1 %v3376_v35  ;;  %v415_v35 = vperm.slane %v4603_v8, 1 }
  0x73   :  { %958 = vmatpush.bf16.msrb.mxu3 %v3488_v42 }
  0x74   :  { %902 = vmatmul.bf16.vlgmr.msrb.gmra.mxu2 %v4436_v49  ;;  %3655 = vmatmul.msk.bf16.vlgmr.msrb.gmra.mxu0 %vm798_vm2, %v4432_v47 }
  0x75   :  { %1162 = vmatpush.bf16.msrb.mxu2 %v4563_v41 }
  0x76   :  { %939 = vmatpush.bf16.msrb.mxu1 %v3360_v43  ;;  %959 = vmatmul.bf16.vlgmr.msrb.gmra.mxu3 %v4436_v49 }
  0x79   :  { %940 = vmatmul.bf16.vlgmr.msrb.gmra.mxu1 %v4434_v48  ;;  %1163 = vmatpush.bf16.msrb.mxu2 %v4571_v50 }
  0x7d   :  { %1164 = vmatpush.bf16.msrb.mxu2 %v4574_v52 }
  0x81   :  { %1165 = vmatpush.bf16.msrb.mxu2 %v4578_v56 }
  0x84   :  { %907 = vmatmul.bf16.gmra.mxu2 %v4552_v63  ;;  %3656 = vmatmul.msk.bf16.gmra.mxu0 %vm798_vm2, %v4548_v61 }
  0x86   :  { %964 = vmatmul.bf16.gmra.mxu3 %v4552_v63 }
  0x89   :  { %945 = vmatmul.bf16.gmra.mxu1 %v4550_v62 }
  0x94   :  { %3657 = vmatmul.msk.bf16.vlgmr.msra.gmra.mxu2 %vm798_vm2, %v4432_v47 }
  0x95   :  { %1175 = vmatpush.bf16.msra.mxu2 %v4583_v59 }
  0x99   :  { %1176 = vmatpush.bf16.msra.mxu2 %v4588_v1 }
  0x9d   :  { %1177 = vmatpush.bf16.msra.mxu2 %v4591_v4 }
  0xa1   :  { %1178 = vmatpush.bf16.msra.mxu2 %v4594_v7 }
  0xa4   :  { %3658 = vmatmul.msk.bf16.gmra.mxu2 %vm798_vm2, %v4548_v61 }
  0xb4   :  { %1166 = vmatmul.bf16.vlgmr.msrb.gmra.mxu2 %v4245_v53 }
  0xb5   :  { %1394 = vmatpush.bf16.msrb.mxu2 %v4583_v59 }
  0xb9   :  { %1395 = vmatpush.bf16.msrb.mxu2 %v4588_v1 }
  0xbd   :  { %1396 = vmatpush.bf16.msrb.mxu2 %v4591_v4 }
  0xbf   :  { %v827_v10 = vpop.f32.mrf.mxu0 }
  0xc0   :  { %v828_v11 = vadd.f32 %v827_v10, %v414_v9  ;;  %v846_v12 = vpop.f32.mrf.mxu1  ;;  %v416_v10 = vperm.slane %v4603_v8, 2 }
  0xc1   :  { %1397 = vmatpush.bf16.msrb.mxu2 %v4594_v7 }
  0xc2   :  { %v847_v13 = vadd.f32 %v846_v12, %v828_v11 }
  0xc4   :  { %1179 = vmatmul.bf16.vlgmr.msra.gmra.mxu2 %v4245_v53 }
  0xc5   :  { %v865_v14 = vpop.f32.mrf.mxu2  ;;  %1625 = vmatpush.bf16.msra.mxu2 %v4583_v59 }
  0xc6   :  { %v866_v15 = vadd.f32 %v865_v14, %v847_v13 }
  0xc7   :  { %v829_v16 = vpop.f32.mrf.mxu0 }
  0xc8   :  { %1046 = vst [vmem:[#allocation3 + $0x30] sm:$0xff] %v866_v15  ;;  %v830_v17 = vadd.f32 %v829_v16, %v414_v9  ;;  %v848_v18 = vpop.f32.mrf.mxu1 }
  0xc9   :  { %1626 = vmatpush.bf16.msra.mxu2 %v4588_v1 }
  0xca   :  { %v849_v19 = vadd.f32 %v848_v18, %v830_v17 }
  0xcd   :  { %v867_v20 = vpop.f32.mrf.mxu2  ;;  %1627 = vmatpush.bf16.msra.mxu2 %v4591_v4 }
  0xce   :  { %v868_v21 = vadd.f32 %v867_v20, %v849_v19 }
  0xd0   :  { %1050 = vst [vmem:[#allocation3 + $0x50] sm:$0xff] %v868_v21 }
  0xd1   :  { %1628 = vmatpush.bf16.msra.mxu2 %v4594_v7 }
  0xd5   :  { %v884_v25 = vpop.f32.mrf.mxu3 }
  0xd6   :  { %v885_v38 = vadd.f32 %v884_v25, %v415_v35 }
  0xdd   :  { %v886_v33 = vpop.f32.mrf.mxu3 }
  0xde   :  { %v887_v46 = vadd.f32 %v886_v33, %v415_v35 }
  0xe1   :  { %v832_v22 = vpop.f32.mrf.mxu0 }
  0xe2   :  { %v833_v23 = vadd.f32 %v832_v22, %v414_v9  ;;  %v851_v24 = vpop.f32.mrf.mxu1 }
  0xe4   :  { %v852_v26 = vadd.f32 %v851_v24, %v833_v23 }
  0xe7   :  { %v870_v27 = vpop.f32.mrf.mxu2 }
  0xe8   :  { %v871_v28 = vadd.f32 %v870_v27, %v852_v26  ;;  %v889_v42 = vpop.f32.mrf.mxu3 }
  0xe9   :  { %v834_v29 = vpop.f32.mrf.mxu0  ;;  %v890_v58 = vadd.f32 %v889_v42, %v415_v35 }
  0xea   :  { %1054 = vst [vmem:[#allocation3 + $0x40] sm:$0xff] %v871_v28  ;;  %v835_v30 = vadd.f32 %v834_v29, %v414_v9  ;;  %v853_v31 = vpop.f32.mrf.mxu1 }
  0xec   :  { %v854_v32 = vadd.f32 %v853_v31, %v835_v30 }
  0xef   :  { %v872_v34 = vpop.f32.mrf.mxu2 }
  0xf0   :  { %v873_v36 = vadd.f32 %v872_v34, %v854_v32  ;;  %v891_v55 = vpop.f32.mrf.mxu3 }
  0xf1   :  { %v922_v37 = vpop.f32.mrf.mxu0  ;;  %v892_v9 = vadd.f32 %v891_v55, %v415_v35 }
  0xf2   :  { %1058 = vst [vmem:[#allocation3 + $0x60] sm:$0xff] %v873_v36 }
  0xf6   :  { %v941_v2 = vpop.f32.mrf.mxu1 }
  0xf7   :  { %v903_v40 = vpop.f32.mrf.mxu2  ;;  %v942_v14 = vadd.f32 %v941_v2, %v416_v10 }
  0xf8   :  { %v904_v43 = vadd.f32 %v903_v40, %v885_v38  ;;  %v1112_v38 = vld [vmem:[#allocation3 + $0x30] sm:$0xf] }
  0xf9   :  { %v924_v45 = vpop.f32.mrf.mxu0  ;;  %v960_v6 = vpop.f32.mrf.mxu3 }
  0xfa   :  { %v923_v44 = vadd.f32 %v922_v37, %v904_v43  ;;  %v961_v17 = vadd.f32 %v960_v6, %v942_v14 }
  0xfc   :  { %1047 = vst [vmem:[#allocation3] sm:$0xff] %v923_v44  ;;  %v4618_v44 = vand.u32 127, %v95_v39 }
  0xfe   :  { %v943_v15 = vpop.f32.mrf.mxu1 }
  0xff   :  { %v905_v51 = vpop.f32.mrf.mxu2  ;;  %v944_v21 = vadd.f32 %v943_v15, %v416_v10 }
 0x100   :  { %v906_v54 = vadd.f32 %v905_v51, %v887_v46 }
 0x101   :  { %v927_v60 = vpop.f32.mrf.mxu0  ;;  %v962_v18 = vpop.f32.mrf.mxu3 }
 0x102   :  { %v925_v57 = vadd.f32 %v924_v45, %v906_v54  ;;  %v963_v23 = vadd.f32 %v962_v18, %v944_v21  ;;  %v4621_v45 = vadd.s32 128, %v4618_v44 }
 0x103   :  { %v1113_v46 = vld [vmem:[#allocation3] sm:$0xf] }
 0x104   :  { %1051 = vst [vmem:[#allocation3 + $0x68] sm:$0xff] %v925_v57  ;;  %vm1101_vm3 = vcmp.lt.s32.totalorder %v4621_v45, 192  ;;  %v3007_v45 = vld [vmem:[#allocation12 + $0x40] sm:$0xff] }
 0x106   :  { %v946_v22 = vpop.f32.mrf.mxu1 }
 0x107   :  { %v908_v0 = vpop.f32.mrf.mxu2  ;;  %v947_v27 = vadd.f32 %v946_v22, %v416_v10 }
 0x108   :  { %v909_v3 = vadd.f32 %v908_v0, %v890_v58 }
 0x109   :  { %v929_v12 = vpop.f32.mrf.mxu0  ;;  %v965_v25 = vpop.f32.mrf.mxu3 }
 0x10a   :  { %v928_v5 = vadd.f32 %v927_v60, %v909_v3  ;;  %v966_v28 = vadd.f32 %v965_v25, %v947_v27 }
 0x10c   :  { %1055 = vst [vmem:[#allocation3 + $0x20] sm:$0xff] %v928_v5 }
 0x10e   :  { %v948_v29 = vpop.f32.mrf.mxu1 }
 0x10f   :  { %v910_v11 = vpop.f32.mrf.mxu2  ;;  %v949_v32 = vadd.f32 %v948_v29, %v416_v10 }
 0x110   :  { %v911_v13 = vadd.f32 %v910_v11, %v892_v9 }
 0x111   :  { %v967_v33 = vpop.f32.mrf.mxu3 }
 0x112   :  { %v930_v16 = vadd.f32 %v929_v12, %v911_v13  ;;  %v968_v34 = vadd.f32 %v967_v33, %v949_v32  ;;  %v4635_v32 = vld [vmem:[%s5260_s1] sm:$0xf]  ;;  %v4247_v33 = vmov 1  }
 0x113   :  { %3932 = vset.pattern.permute.xlu2 %v4247_v33  ;;  %v3829_v33 = vld [vmem:[#allocation9 + $0x4c] sm:$0xf] }
 0x114   :  { %1059 = vst [vmem:[#allocation3 + $0x70] sm:$0xff] %v930_v16  ;;  %1068 = vperm.xlu2 %3932, %v4635_v32  }
 0x117   :  { %v979_v19 = vpop.f32.mrf.mxu2 }
 0x118   :  { %v980_v20 = vadd.f32 %v979_v19, %v961_v17 }
 0x11a   :  { %1048 = vst [vmem:[#allocation3 + $0x58] sm:$0xff] %v980_v20 }
 0x11f   :  { %v981_v24 = vpop.f32.mrf.mxu2 }
 0x120   :  { %v982_v26 = vadd.f32 %v981_v24, %v963_v23 }
 0x122   :  { %1052 = vst [vmem:[#allocation3 + $0x8] sm:$0xff] %v982_v26 }
 0x127   :  { %v984_v30 = vpop.f32.mrf.mxu2 }
 0x128   :  { %v985_v31 = vadd.f32 %v984_v30, %v966_v28 }
 0x12a   :  { %1056 = vst [vmem:[#allocation3 + $0x10] sm:$0xff] %v985_v31 }
 0x12f   :  { %v986_v35 = vpop.f32.mrf.mxu2 }
 0x130   :  { %v987_v36 = vadd.f32 %v986_v35, %v968_v34  ;;  %v3849_v34 = vld [vmem:[#allocation9 + $0xec] sm:$0xf]  ;;  %v3473_v35 = vld [vmem:[#allocation9 + $0xf8] sm:$0xf0] }
 0x132   :  { %1060 = vst [vmem:[#allocation3 + $0x78] sm:$0xff] %v987_v36  ;;  %v3881_v36 = vld [vmem:[#allocation9 + $0x1ec] sm:$0xf] }
 0x137   :  { %v1167_v37 = vpop.f32.mrf.mxu2 }
 0x138   :  { %v1184_v40 = vadd.f32 %v1167_v37, %v1112_v38  ;;  %v3476_v37 = vor.u32 %v3849_v34, %v3473_v35  ;;  %v3601_v38 = vld [vmem:[#allocation9 + $0x1f8] sm:$0xf0] }
 0x139   :  { %v3393_v34 = vld [vmem:[#allocation9 + $0x58] sm:$0xf0] }
 0x13a   :  { %v3693_v43 = vmul.f32 -1.442695, %v1184_v40  ;;  %v3845_v40 = vld [vmem:[#allocation9 + $0xcc] sm:$0xf]  ;;  %989 = vmatpush.bf16.msra.mxu0 %v3476_v37  ;;  %v3521_v37 = vld [vmem:[#allocation9 + $0x158] sm:$0xf0] }
 0x13c   :  { %3942 = vpow2.f32 %v3693_v43  ;;  %v3604_v43 = vor.u32 %v3881_v36, %v3601_v38  ;;  %v3861_v36 = vld [vmem:[#allocation9 + $0x14c] sm:$0xf] }
 0x13e   :  { %1008 = vmatpush.bf16.msra.mxu1 %v3604_v43  ;;  %v3825_v43 = vld [vmem:[#allocation9 + $0x2c] sm:$0xf] }
 0x13f   :  { %v1169_v42 = vpop.f32.mrf.mxu2 }
 0x140   :  { %v3457_v42 = vld [vmem:[#allocation9 + $0xd8] sm:$0xf0] }
 0x142   :  { %v3943_v55 = vpop.eup %3942 }
 0x143   :  { %v1196_v60 = vadd.f32 1.0, %v3943_v55 }
 0x145   :  { %v1209_v21 = vand.u32 2147483648, %v1196_v60  ;;  %vm1203_vm9 = vweird.f32 %v1196_v60  ;;  %v1207_v23 = vand.u32 2147483647, %v1196_v60 }
 0x147   :  { %v1180_v51 = vpop.f32.mrf.mxu2  ;;  %v1210_v27 = vor.u32 1.1754944e-38, %v1209_v21  ;;  %vm1208_vm11 = vcmp.eq.f32.partialorder %v1207_v23, 8.507059e+37  ;;  %v3409_v21 = vld [vmem:[#allocation9 + $0x78] sm:$0xf0] }
 0x148   :  { %v1185_v54 = vadd.f32 %v1180_v51, %v1113_v46  ;;  %v3877_v46 = vld [vmem:[#allocation9 + $0x1cc] sm:$0xf]  ;;  %v3585_v51 = vld [vmem:[#allocation9 + $0x1d8] sm:$0xf0] }
 0x149   :  { %v3588_v55 = vor.u32 %v3877_v46, %v3585_v51  ;;  %v3617_v23 = vld [vmem:[#allocation9 + $0x218] sm:$0xf0]  ;;  %v3857_v51 = vld [vmem:[#allocation9 + $0x12c] sm:$0xf] }
 0x14a   :  { %v1187_v57 = vmul.f32 2.0, %v1185_v54  ;;  %v3377_v46 = vld [vmem:[#allocation9 + $0x38] sm:$0xf0] }
 0x14b   :  { %1009 = vmatpush.bf16.msra.mxu1 %v3588_v55 }
 0x14c   :  { %v1189_v58 = vsel %vm1101_vm3, %v1187_v57, %v1185_v54  ;;  %v3460_v54 = vor.u32 %v3845_v40, %v3457_v42  ;;  %v3841_v57 = vld [vmem:[#allocation9 + $0xac] sm:$0xf]  ;;  %v3396_v40 = vor.u32 %v3829_v33, %v3393_v34  ;;  %v3524_v42 = vor.u32 %v3861_v36, %v3521_v37 }
 0x14d   :  { %v3694_v0 = vmul.f32 -1.442695, %v1189_v58  ;;  %v3441_v58 = vld [vmem:[#allocation9 + $0xb8] sm:$0xf0] }
 0x14e   :  { %990 = vmatpush.bf16.msra.mxu0 %v3460_v54  ;;  %v3380_v54 = vor.u32 %v3825_v43, %v3377_v46  ;;  %v1252_v43 = vld [vmem:[#allocation3] sm:$0xf0] }
 0x14f   :  { %3944 = vpow2.f32 %v3694_v0  ;;  %v1182_v2 = vpop.f32.mrf.mxu2  ;;  %v3569_v0 = vld [vmem:[#allocation9 + $0x1b8] sm:$0xf0] }
 0x150   :  { %3946 = vrcp.f32 %v1196_v60  ;;  %v3893_v2 = vld [vmem:[#allocation9 + $0x24c] sm:$0xf] }
 0x155   :  { %v3945_v3 = vpop.eup %3944 }
 0x156   :  { %v1197_v5 = vadd.f32 1.0, %v3945_v3  ;;  %v3947_v6 = vpop.eup %3946  ;;  %v3444_v3 = vor.u32 %v3841_v57, %v3441_v58  ;;  %v3821_v57 = vld [vmem:[#allocation9 + $0xc] sm:$0xf]  ;;  %v3361_v58 = vld [vmem:[#allocation9 + $0x18] sm:$0xf0] }
 0x157   :  { %v1199_v9 = vmul.f32 %v3947_v6, %v1196_v60  ;;  %vm1204_vm6 = vweird.f32 %v3947_v6  ;;  %v3873_v60 = vld [vmem:[#allocation9 + $0x1ac] sm:$0xf] }
 0x158   :  { %3948 = vrcp.f32 %v1197_v5  ;;  %v1224_v15 = vand.u32 2147483648, %v1197_v5  ;;  %v1222_v17 = vand.u32 2147483647, %v1197_v5  ;;  %vm1218_vm5 = vweird.f32 %v1197_v5  ;;  %vm1205_vm10 = vmor %vm1203_vm9, %vm1204_vm6  ;;  %991 = vmatpush.bf16.msra.mxu0 %v3444_v3 }
 0x159   :  { %v1200_v11 = vsub.f32 1.0, %v1199_v9  ;;  %v3837_v9 = vld [vmem:[#allocation9 + $0x8c] sm:$0xf] }
 0x15a   :  { %v1225_v20 = vor.u32 1.1754944e-38, %v1224_v15  ;;  %vm1223_vm8 = vcmp.eq.f32.partialorder %v1222_v17, 8.507059e+37  ;;  %v3633_v15 = vld [vmem:[#allocation9 + $0x238] sm:$0xf0] }
 0x15b   :  { %v1201_v14 = vmul.f32 %v3947_v6, %v1200_v11 }
 0x15d   :  { %v1202_v19 = vadd.f32 %v3947_v6, %v1201_v14  ;;  %v3553_v14 = vld [vmem:[#allocation9 + $0x198] sm:$0xf0] }
 0x15e   :  { %v3949_v10 = vpop.eup %3948 }
 0x15f   :  { %v1214_v12 = vmul.f32 %v3949_v10, %v1197_v5  ;;  %vm1219_vm4 = vweird.f32 %v3949_v10  ;;  %v1206_v26 = vsel %vm1205_vm10, %v3947_v6, %v1202_v19  ;;  %v3649_v5 = vld [vmem:[#allocation9 + $0x258] sm:$0x30]  ;;  %v3572_v6 = vor.u32 %v3873_v60, %v3569_v0  ;;  %v3853_v0 = vld [vmem:[#allocation9 + $0x10c] sm:$0xf] }
 0x160   :  { %vm1220_vm7 = vmor %vm1218_vm5, %vm1219_vm4  ;;  %v1211_v29 = vsel %vm1208_vm11, %v1210_v27, %v1206_v26  ;;  %v3652_v11 = vor.u32 %v3893_v2, %v3649_v5  ;;  %v3489_v2 = vld [vmem:[#allocation9 + $0x118] sm:$0xf0] }
 0x161   :  { %v1215_v13 = vsub.f32 1.0, %v1214_v12  ;;  %v3889_v12 = vld [vmem:[#allocation9 + $0x22c] sm:$0xf]  ;;  %1010 = vmatpush.bf16.msra.mxu1 %v3572_v6  ;;  %v3364_v6 = vor.u32 %v3821_v57, %v3361_v58 }
 0x162   :  { %v3636_v19 = vor.u32 %v3889_v12, %v3633_v15 }
 0x163   :  { %v1216_v16 = vmul.f32 %v3949_v10, %v1215_v13  ;;  %v3869_v13 = vld [vmem:[#allocation9 + $0x18c] sm:$0xf] }
 0x165   :  { %v1217_v18 = vadd.f32 %v3949_v10, %v1216_v16  ;;  %v816_v16 = vsel %vm805_vm0, %v3652_v11, 0 }
 0x166   :  { %1032 = vmatpush.bf16.msra.mxu3 %v816_v16 }
 0x167   :  { %v1221_v22 = vsel %vm1220_vm7, %v3949_v10, %v1217_v18  ;;  %v3425_v10 = vld [vmem:[#allocation9 + $0x98] sm:$0xf0]  ;;  %v3833_v18 = vld [vmem:[#allocation9 + $0x6c] sm:$0xf] }
 0x168   :  { %v1226_v24 = vsel %vm1223_vm8, %v1225_v20, %v1221_v22  ;;  %v3428_v17 = vor.u32 %v3837_v9, %v3425_v10  ;;  %v3556_v20 = vor.u32 %v3869_v13, %v3553_v14  ;;  %v3885_v22 = vld [vmem:[#allocation9 + $0x20c] sm:$0xf]  ;;  %v3412_v26 = vor.u32 %v3833_v18, %v3409_v21 }
 0x169   :  { %v1229_v25 = vmul.f32 2.0, %v1226_v24  ;;  %v3620_v27 = vor.u32 %v3885_v22, %v3617_v23  ;;  %v3492_v9 = vor.u32 %v3853_v0, %v3489_v2 }
 0x16a   :  { %992 = vmatpush.bf16.msra.mxu0 %v3428_v17  ;;  %1033 = vmatpush.bf16.msra.mxu3 %v3636_v19 }
 0x16b   :  { %v3696_v28 = vadd.f32 -1.0, %v1229_v25  ;;  %v3537_v25 = vld [vmem:[#allocation9 + $0x178] sm:$0xf0]  ;;  %1011 = vmatpush.bf16.msra.mxu1 %v3556_v20 }
 0x16d   :  { %v4628_v30 = vsel %vm1101_vm3, %v3696_v28, %v1226_v24  ;;  %v3865_v24 = vld [vmem:[#allocation9 + $0x16c] sm:$0xf]  ;;  %v1234_v28 = vmul.f32 0.0, %v1211_v29 }
 0x16e   :  { %v1235_v31 = vmul.f32 %v4628_v30, %v1211_v29  ;;  %993 = vmatpush.bf16.msra.mxu0 %v3412_v26  ;;  %1034 = vmatpush.bf16.msra.mxu3 %v3620_v27  ;;  %v3505_v29 = vld [vmem:[#allocation9 + $0x138] sm:$0xf0] }
 0x16f   :  { %v3508_v55 = vor.u32 %v3857_v51, %v3505_v29 }
 0x170   :  { %1237 = vrot.lane.b32.xlu0 %v1235_v31, %s4246_s5  ;;  %v3540_v31 = vor.u32 %v3865_v24, %v3537_v25 }
 0x171   :  { %3659 = vmatmul.msk.bf16.vlgmr.msra.gmra.mxu3 %vm798_vm2, %v4432_v47 }
 0x172   :  { %1012 = vmatpush.bf16.msra.mxu1 %v3540_v31  ;;  %1381 = vmatpush.bf16.msrb.mxu3 %v4563_v41 }
 0x173   :  { %994 = vmatpush.bf16.msra.mxu0 %v3396_v40 }
 0x176   :  { %1013 = vmatpush.bf16.msra.mxu1 %v3524_v42  ;;  %1382 = vmatpush.bf16.msrb.mxu3 %v4571_v50  ;;  %v1251_v42 = vld [vmem:[#allocation3 + $0x30] sm:$0xf0] }
 0x177   :  { %995 = vmatpush.bf16.msra.mxu0 %v3380_v54 }
 0x178   :  { %1064 = vperm.xlu0 %3931, %v4635_v32  }
 0x17a   :  { %1014 = vmatpush.bf16.msra.mxu1 %v3508_v55  ;;  %1383 = vmatpush.bf16.msrb.mxu3 %v4574_v52 }
 0x17b   :  { %996 = vmatpush.bf16.msra.mxu0 %v3364_v6 }
 0x17e   :  { %1015 = vmatpush.bf16.msra.mxu1 %v3492_v9  ;;  %997 = vmatmul.bf16.vlgmr.msra.gmra.mxu0 %v4434_v48  ;;  %v4686_v48 = vpop.permute.xlu2 %1068 }
 0x17f   :  { %1264 = vmatpush.bf16.msrb.mxu0 %v4563_v41  ;;  %1384 = vmatpush.bf16.msrb.mxu3 %v4578_v56  ;;  %vm1070_vm8 = vcmp.ne.s32.totalorder %v4686_v48, 0 }
 0x181   :  { %1016 = vmatmul.bf16.vlgmr.msra.gmra.mxu1 %v4436_v49  ;;  %3660 = vmatmul.msk.bf16.gmra.mxu3 %vm798_vm2, %v4548_v61 }
 0x182   :  { %1277 = vmatpush.bf16.msrb.mxu1 %v4583_v59 }
 0x183   :  { %1612 = vmatpush.bf16.msra.mxu3 %v4563_v41  ;;  %1265 = vmatpush.bf16.msrb.mxu0 %v4571_v50 }
 0x186   :  { %1278 = vmatpush.bf16.msrb.mxu1 %v4588_v1 }
 0x187   :  { %1613 = vmatpush.bf16.msra.mxu3 %v4571_v50  ;;  %1266 = vmatpush.bf16.msrb.mxu0 %v4574_v52 }
 0x18a   :  { %1279 = vmatpush.bf16.msrb.mxu1 %v4591_v4 }
 0x18b   :  { %1614 = vmatpush.bf16.msra.mxu3 %v4574_v52  ;;  %1267 = vmatpush.bf16.msrb.mxu0 %v4578_v56 }
 0x18e   :  { %1280 = vmatpush.bf16.msrb.mxu1 %v4594_v7  ;;  %1002 = vmatmul.bf16.gmra.mxu0 %v4550_v62 }
 0x18f   :  { %1491 = vmatpush.bf16.msra.mxu0 %v4563_v41  ;;  %1615 = vmatpush.bf16.msra.mxu3 %v4578_v56 }
 0x191   :  { %1021 = vmatmul.bf16.gmra.mxu1 %v4552_v63  ;;  %v417_v63 = vperm.slane %v4603_v8, 3 }
 0x192   :  { %1504 = vmatpush.bf16.msra.mxu1 %v4583_v59 }
 0x193   :  { %1492 = vmatpush.bf16.msra.mxu0 %v4571_v50 }
 0x196   :  { %1505 = vmatpush.bf16.msra.mxu1 %v4588_v1 }
 0x197   :  { %1493 = vmatpush.bf16.msra.mxu0 %v4574_v52 }
 0x19a   :  { %1506 = vmatpush.bf16.msra.mxu1 %v4591_v4 }
 0x19b   :  { %1494 = vmatpush.bf16.msra.mxu0 %v4578_v56 }
 0x19e   :  { %1507 = vmatpush.bf16.msra.mxu1 %v4594_v7 }
 0x1e2   :  { %v1238_v35 = vpop.permute.xlu0 %1237 }
 0x1e3   :  { %v1240_v38 = vadd.f32 %v1238_v35, %v1234_v28 }
 0x1e5   :  { %3950 = vtanh.f32 %v1240_v38 }
 0x1ea   :  { %v4644_v60 = vpop.permute.xlu0 %1064 }
 0x1eb   :  { %v3951_v3 = vpop.eup %3950  ;;  %vm5268_vm12 = vcmp.ne.s32.totalorder %v4644_v60, 0 }
 0x1ec   :  { %v4649_v5 = vsel %vm5268_vm12, %v1240_v38, 0.0  ;;  %v1242_v47 = vmul.f32 %v3951_v3, %v4628_v30 }
 0x1ed   :  { %1359 = vrot.lane.b32.xlu0 %v4649_v5, %s4246_s5 }
 0x1ee   :  { %v1244_v10 = vsel %vm5268_vm12, %v1242_v47, 0.0 }
 0x1ef   :  { %1246 = vrot.lane.b32.xlu2 %v1244_v10, %s4246_s5  ;;  %v1253_v11 = vpack.c.bf16 %v1244_v10, %v1244_v10 }
 0x1f1   :  { %1255 = vrot.lane.b32.xlu1 %v1253_v11, %s4246_s5 }
 0x1f4   :  { %v1036_v62 = vpop.f32.mrf.mxu3 }
 0x1fb   :  { %v998_v30 = vpop.f32.mrf.mxu0 }
 0x1fc   :  { %v999_v12 = vadd.f32 %v998_v30, %v417_v63  ;;  %v1038_v16 = vpop.f32.mrf.mxu3 }
 0x1fe   :  { %v1017_v13 = vpop.f32.mrf.mxu1 }
 0x1ff   :  { %v1018_v14 = vadd.f32 %v1017_v13, %v999_v12 }
 0x201   :  { %v1037_v15 = vadd.f32 %v1036_v62, %v1018_v14 }
 0x203   :  { %1049 = vst [vmem:[#allocation3 + $0x18] sm:$0xff] %v1037_v15  ;;  %v1000_v17 = vpop.f32.mrf.mxu0 }
 0x204   :  { %v1001_v18 = vadd.f32 %v1000_v17, %v417_v63  ;;  %v1041_v22 = vpop.f32.mrf.mxu3 }
 0x206   :  { %v1019_v19 = vpop.f32.mrf.mxu1 }
 0x207   :  { %v1020_v20 = vadd.f32 %v1019_v19, %v1001_v18  ;;  %v1343_v19 = vrot.slane %v4649_v5, 4 }
 0x209   :  { %v1039_v8 = vadd.f32 %v1038_v16, %v1020_v20 }
 0x20b   :  { %1053 = vst [vmem:[#allocation3 + $0x48] sm:$0xff] %v1039_v8  ;;  %v1003_v21 = vpop.f32.mrf.mxu0 }
 0x20c   :  { %v1004_v23 = vadd.f32 %v1003_v21, %v417_v63  ;;  %v1043_v33 = vpop.f32.mrf.mxu3 }
 0x20e   :  { %v1022_v24 = vpop.f32.mrf.mxu1 }
 0x20f   :  { %v1023_v25 = vadd.f32 %v1022_v24, %v1004_v23 }
 0x211   :  { %v1042_v26 = vadd.f32 %v1041_v22, %v1023_v25 }
 0x213   :  { %1057 = vst [vmem:[#allocation3 + $0x38] sm:$0xff] %v1042_v26  ;;  %v1005_v27 = vpop.f32.mrf.mxu0 }
 0x214   :  { %v1006_v28 = vadd.f32 %v1005_v27, %v417_v63 }
 0x216   :  { %v1024_v31 = vpop.f32.mrf.mxu1 }
 0x217   :  { %v1025_v34 = vadd.f32 %v1024_v31, %v1006_v28 }
 0x219   :  { %v1044_v35 = vadd.f32 %v1043_v33, %v1025_v34 }
 0x21b   :  { %1061 = vst [vmem:[#allocation3 + $0x28] sm:$0xff] %v1044_v35 }
 0x249   :  { %v4688_v49 = vpop.permute.xlu2 %1246 }
 0x24a   :  { %1250 = vst.msk [vmem:[#allocation4] sm:$0xf] %vm5270_vm13, %v4688_v49 }
 0x263   :  { %v1256_v61 = vpop.permute.xlu1 %1255 }
 0x264   :  { %3697 = vmatmul.msk.bf16.vlgmr.msrb.gmra.mxu0 %vm1154_vm14, %v1256_v61  ;;  %3698 = vmatmul.msk.bf16.vlgmr.msrb.gmra.mxu1 %vm1154_vm14, %v1256_v61 }
 0x265   :  { %1722 = vmatpush.bf16.msrb.mxu0 %v4563_v41  ;;  %1735 = vmatpush.bf16.msrb.mxu1 %v4583_v59 }
 0x269   :  { %1723 = vmatpush.bf16.msrb.mxu0 %v4571_v50  ;;  %1736 = vmatpush.bf16.msrb.mxu1 %v4588_v1 }
 0x26d   :  { %1724 = vmatpush.bf16.msrb.mxu0 %v4574_v52  ;;  %1737 = vmatpush.bf16.msrb.mxu1 %v4591_v4 }
 0x271   :  { %1725 = vmatpush.bf16.msrb.mxu0 %v4578_v56  ;;  %1738 = vmatpush.bf16.msrb.mxu1 %v4594_v7 }
 0x2e1   :  { %v1269_v36 = vpop.f32.mrf.mxu0  ;;  %v1282_v37 = vpop.f32.mrf.mxu1 }
 0x2e2   :  { %v1288_v38 = vrot.slane %v1269_v36, 4  ;;  %v1289_v40 = vrot.slane %v1282_v37, 4 }
 0x2e4   :  { %v1292_v46 = vadd.f32 %v1288_v38, %v1251_v42  ;;  %v1293_v51 = vadd.f32 %v1289_v40, %v1252_v43  ;;  %v1360_v38 = vpop.permute.xlu0 %1359 }
 0x2e6   :  { %v3699_v29 = vmul.f32 -1.442695, %v1292_v46  ;;  %v1295_v54 = vmul.f32 2.0, %v1293_v51 }
 0x2e8   :  { %3952 = vpow2.f32 %v3699_v29  ;;  %v1297_v55 = vsel %vm1101_vm3, %v1295_v54, %v1293_v51  ;;  %v1371_v54 = vld [vmem:[#allocation3 + $0x50] sm:$0xf] }
 0x2e9   :  { %v3700_v57 = vmul.f32 -1.442695, %v1297_v55  ;;  %v1271_v58 = vpop.f32.mrf.mxu0  ;;  %v1284_v0 = vpop.f32.mrf.mxu1 }
 0x2eb   :  { %3954 = vpow2.f32 %v3700_v57  ;;  %v1372_v57 = vld [vmem:[#allocation3 + $0x68] sm:$0xf] }
 0x2ee   :  { %v3953_v2 = vpop.eup %3952 }
 0x2ef   :  { %v1304_v3 = vadd.f32 1.0, %v3953_v2 }
 0x2f1   :  { %v3955_v47 = vpop.eup %3954  ;;  %3956 = vrcp.f32 %v1304_v3  ;;  %v1317_v62 = vand.u32 2147483648, %v1304_v3  ;;  %v1315_v12 = vand.u32 2147483647, %v1304_v3  ;;  %vm1311_vm0 = vweird.f32 %v1304_v3 }
 0x2f2   :  { %v1305_v6 = vadd.f32 1.0, %v3955_v47 }
 0x2f3   :  { %v1318_v16 = vor.u32 1.1754944e-38, %v1317_v62  ;;  %vm1316_vm4 = vcmp.eq.f32.partialorder %v1315_v12, 8.507059e+37 }
 0x2f4   :  { %3958 = vrcp.f32 %v1305_v6  ;;  %v1332_v15 = vand.u32 2147483648, %v1305_v6  ;;  %v1330_v18 = vand.u32 2147483647, %v1305_v6  ;;  %vm1326_vm5 = vweird.f32 %v1305_v6 }
 0x2f6   :  { %v1333_v22 = vor.u32 1.1754944e-38, %v1332_v15  ;;  %vm1331_vm7 = vcmp.eq.f32.partialorder %v1330_v18, 8.507059e+37 }
 0x2f7   :  { %v3957_v9 = vpop.eup %3956 }
 0x2f8   :  { %v1307_v10 = vmul.f32 %v3957_v9, %v1304_v3  ;;  %vm1312_vm15 = vweird.f32 %v3957_v9 }
 0x2f9   :  { %vm1313_vm1 = vmor %vm1311_vm0, %vm1312_vm15 }
 0x2fa   :  { %v3959_v11 = vpop.eup %3958  ;;  %v1308_v61 = vsub.f32 1.0, %v1307_v10 }
 0x2fb   :  { %v1322_v63 = vmul.f32 %v3959_v11, %v1305_v6  ;;  %vm1327_vm2 = vweird.f32 %v3959_v11 }
 0x2fc   :  { %v1309_v30 = vmul.f32 %v3957_v9, %v1308_v61  ;;  %vm1328_vm6 = vmor %vm1326_vm5, %vm1327_vm2 }
 0x2fd   :  { %v1323_v13 = vsub.f32 1.0, %v1322_v63 }
 0x2fe   :  { %v1310_v14 = vadd.f32 %v3957_v9, %v1309_v30 }
 0x2ff   :  { %v1324_v17 = vmul.f32 %v3959_v11, %v1323_v13 }
 0x300   :  { %v1314_v20 = vsel %vm1313_vm1, %v3957_v9, %v1310_v14 }
 0x301   :  { %v1319_v8 = vsel %vm1316_vm4, %v1318_v16, %v1314_v20  ;;  %v1325_v21 = vadd.f32 %v3959_v11, %v1324_v17 }
 0x302   :  { %v1345_v23 = vmul.f32 %v1343_v19, %v1319_v8 }
 0x303   :  { %v1329_v24 = vsel %vm1328_vm6, %v3959_v11, %v1325_v21 }
 0x304   :  { %v1334_v25 = vsel %vm1331_vm7, %v1333_v22, %v1329_v24 }
 0x305   :  { %v1337_v26 = vmul.f32 2.0, %v1334_v25 }
 0x307   :  { %v3702_v27 = vadd.f32 -1.0, %v1337_v26 }
 0x309   :  { %v1341_v28 = vsel %vm1101_vm3, %v3702_v27, %v1334_v25 }
 0x30a   :  { %v1346_v31 = vmul.f32 %v1341_v28, %v1319_v8 }
 0x30c   :  { %1348 = vrot.lane.b32.xlu1 %v1346_v31, %s4246_s5 }
 0x37e   :  { %v1349_v5 = vpop.permute.xlu1 %1348 }
 0x37f   :  { %v1351_v33 = vadd.f32 %v1349_v5, %v1345_v23 }
 0x381   :  { %3960 = vtanh.f32 %v1351_v33  ;;  %v1355_v34 = vrot.slane %v1351_v33, 4 }
 0x383   :  { %1356 = vrot.lane.b32.xlu2 %v1355_v34, %s4246_s5 }
 0x387   :  { %v3961_v35 = vpop.eup %3960 }
 0x388   :  { %v1353_v36 = vmul.f32 %v3961_v35, %v1341_v28 }
 0x38a   :  { %v1364_v37 = vrot.slane %v1353_v36, 4 }
 0x38c   :  { %1365 = vrot.lane.b32.xlu1 %v1364_v37, %s4246_s5 }
 0x3dd   :  { %v1357_v40 = vpop.permute.xlu2 %1356 }
 0x3de   :  { %v1362_v42 = vsel %vm1070_vm8, %v1357_v40, %v1360_v38 }
 0x3df   :  { %1454 = vrot.lane.b32.xlu1 %v1362_v42, %s4246_s5 }
 0x3fe   :  { %v1366_v43 = vpop.permute.xlu1 %1365 }
 0x3ff   :  { %v1369_v46 = vsel %vm1070_vm8, %v1366_v43, 0.0  ;;  %v1368_v51 = vsel %vm1070_vm8, %v1366_v43, %v4688_v49  ;;  %v4248_v49 = vmov 2  }
 0x400   :  { %1370 = vst.msk [vmem:[#allocation4 + $0x4] sm:$0xf] %vm5270_vm13, %v1369_v46  ;;  %1468 = vrot.lane.b32.xlu1 %v1368_v51, %s4246_s5  ;;  %v1373_v29 = vpack.c.bf16 %v1368_v51, %v1368_v51  ;;  %3933 = vset.pattern.permute.xlu0 %v4248_v49 }
 0x401   :  { %1072 = vperm.xlu0 %3933, %v4635_v32  }
 0x402   :  { %3703 = vmatmul.msk.bf16.vlgmr.msrb.gmra.mxu3 %vm1154_vm14, %v1373_v29  ;;  %3704 = vmatmul.msk.bf16.vlgmr.msrb.gmra.mxu2 %vm1154_vm14, %v1373_v29 }
 0x403   :  { %1843 = vmatpush.bf16.msrb.mxu3 %v4563_v41  ;;  %1856 = vmatpush.bf16.msrb.mxu2 %v4583_v59 }
 0x407   :  { %1844 = vmatpush.bf16.msrb.mxu3 %v4571_v50  ;;  %1857 = vmatpush.bf16.msrb.mxu2 %v4588_v1 }
 0x40b   :  { %1845 = vmatpush.bf16.msrb.mxu3 %v4574_v52  ;;  %1858 = vmatpush.bf16.msrb.mxu2 %v4591_v4 }
 0x40f   :  { %1846 = vmatpush.bf16.msrb.mxu3 %v4578_v56  ;;  %1859 = vmatpush.bf16.msrb.mxu2 %v4594_v7 }
 0x451   :  { %v1455_v37 = vpop.permute.xlu1 %1454 }
 0x472   :  { %v1469_v29 = vpop.permute.xlu1 %1468 }
 0x473   :  { %v4738_v43 = vpop.permute.xlu0 %1072 }
 0x474   :  { %vm1074_vm5 = vcmp.ne.s32.totalorder %v4738_v43, 0 }
 0x485   :  { %v1386_v55 = vpop.f32.mrf.mxu3  ;;  %v1399_v58 = vpop.f32.mrf.mxu2 }
 0x486   :  { %v1403_v0 = vadd.f32 %v1386_v55, %v1371_v54  ;;  %v1404_v2 = vadd.f32 %v1399_v58, %v1372_v57 }
 0x488   :  { %v3705_v3 = vmul.f32 -1.442695, %v1403_v0  ;;  %v1406_v47 = vmul.f32 2.0, %v1404_v2 }
 0x48a   :  { %3962 = vpow2.f32 %v3705_v3  ;;  %v1408_v6 = vsel %vm1101_vm3, %v1406_v47, %v1404_v2  ;;  %v1478_v3 = vld [vmem:[#allocation3 + $0x50] sm:$0xf0] }
 0x48b   :  { %v3706_v9 = vmul.f32 -1.442695, %v1408_v6 }
 0x48d   :  { %3964 = vpow2.f32 %v3706_v9  ;;  %v1388_v10 = vpop.f32.mrf.mxu3  ;;  %v1401_v11 = vpop.f32.mrf.mxu2 }
 0x490   :  { %v3963_v61 = vpop.eup %3962 }
 0x491   :  { %v1415_v62 = vadd.f32 1.0, %v3963_v61  ;;  %v4249_v61 = vmov 3  }
 0x492   :  { %3934 = vset.pattern.permute.xlu2 %v4249_v61 }
 0x493   :  { %v3965_v63 = vpop.eup %3964  ;;  %3966 = vrcp.f32 %v1415_v62  ;;  %v1428_v24 = vand.u32 2147483648, %v1415_v62  ;;  %vm1422_vm1 = vweird.f32 %v1415_v62  ;;  %v1426_v26 = vand.u32 2147483647, %v1415_v62 }
 0x494   :  { %v1416_v30 = vadd.f32 1.0, %v3965_v63 }
 0x495   :  { %v1429_v5 = vor.u32 1.1754944e-38, %v1428_v24  ;;  %vm1427_vm4 = vcmp.eq.f32.partialorder %v1426_v26, 8.507059e+37 }
 0x496   :  { %3968 = vrcp.f32 %v1416_v30  ;;  %v1443_v19 = vand.u32 2147483648, %v1416_v30  ;;  %v1441_v8 = vand.u32 2147483647, %v1416_v30  ;;  %vm1437_vm10 = vweird.f32 %v1416_v30 }
 0x498   :  { %v1444_v23 = vor.u32 1.1754944e-38, %v1443_v19  ;;  %vm1442_vm0 = vcmp.eq.f32.partialorder %v1441_v8, 8.507059e+37 }
 0x499   :  { %v3967_v12 = vpop.eup %3966 }
 0x49a   :  { %v1418_v13 = vmul.f32 %v3967_v12, %v1415_v62  ;;  %vm1423_vm11 = vweird.f32 %v3967_v12 }
 0x49b   :  { %vm1424_vm2 = vmor %vm1422_vm1, %vm1423_vm11 }
 0x49c   :  { %v3969_v14 = vpop.eup %3968  ;;  %v1419_v15 = vsub.f32 1.0, %v1418_v13 }
 0x49d   :  { %v1433_v16 = vmul.f32 %v3969_v14, %v1416_v30  ;;  %vm1438_vm9 = vweird.f32 %v3969_v14 }
 0x49e   :  { %v1420_v18 = vmul.f32 %v3967_v12, %v1419_v15  ;;  %vm1439_vm15 = vmor %vm1437_vm10, %vm1438_vm9 }
 0x49f   :  { %v1434_v17 = vsub.f32 1.0, %v1433_v16 }
 0x4a0   :  { %v1421_v22 = vadd.f32 %v3967_v12, %v1420_v18 }
 0x4a1   :  { %v1435_v20 = vmul.f32 %v3969_v14, %v1434_v17 }
 0x4a2   :  { %v1425_v31 = vsel %vm1424_vm2, %v3967_v12, %v1421_v22 }
 0x4a3   :  { %v1436_v21 = vadd.f32 %v3969_v14, %v1435_v20  ;;  %v1430_v34 = vsel %vm1427_vm4, %v1429_v5, %v1425_v31 }
 0x4a4   :  { %v1457_v38 = vmul.f32 %v1455_v37, %v1430_v34 }
 0x4a5   :  { %v1440_v25 = vsel %vm1439_vm15, %v3969_v14, %v1436_v21 }
 0x4a6   :  { %v1445_v27 = vsel %vm1442_vm0, %v1444_v23, %v1440_v25 }
 0x4a7   :  { %v1448_v28 = vmul.f32 2.0, %v1445_v27 }
 0x4a9   :  { %v3708_v33 = vadd.f32 -1.0, %v1448_v28 }
 0x4ab   :  { %v1452_v35 = vsel %vm1101_vm3, %v3708_v33, %v1445_v27 }
 0x4ac   :  { %v1458_v36 = vmul.f32 %v1452_v35, %v1430_v34 }
 0x4ae   :  { %1460 = vrot.lane.b32.xlu2 %v1458_v36, %s4246_s5 }
 0x508   :  { %v1461_v40 = vpop.permute.xlu2 %1460 }
 0x509   :  { %v1463_v42 = vadd.f32 %v1461_v40, %v1457_v38 }
 0x50b   :  { %3970 = vtanh.f32 %v1463_v42  ;;  %v1466_v18 = vsel %vm1074_vm5, %v1463_v42, %v1455_v37 }
 0x50c   :  { %v1570_v24 = vrot.slane %v1466_v18, 4 }
 0x511   :  { %v3971_v46 = vpop.eup %3970 }
 0x512   :  { %v4740_v51 = vmul.f32 %v3971_v46, %v1452_v35 }
 0x514   :  { %v4746_v49 = vsel %vm1074_vm5, %v4740_v51, %v1469_v29 }
 0x515   :  { %v1480_v54 = vpack.c.bf16 %v4746_v49, %v4746_v49 }
 0x517   :  { %1482 = vrot.lane.b32.xlu2 %v1480_v54, %s4246_s5 }
 0x51f   :  { %1076 = vperm.xlu2 %3934, %v4635_v32  }
 0x571   :  { %v1483_v55 = vpop.permute.xlu2 %1482 }
 0x572   :  { %3709 = vmatmul.msk.bf16.vlgmr.msra.gmra.mxu0 %vm1154_vm14, %v1483_v55  ;;  %3710 = vmatmul.msk.bf16.vlgmr.msra.gmra.mxu1 %vm1154_vm14, %v1483_v55 }
 0x573   :  { %1953 = vmatpush.bf16.msra.mxu0 %v4563_v41  ;;  %1966 = vmatpush.bf16.msra.mxu1 %v4583_v59  ;;  %v1479_v41 = vld [vmem:[#allocation3 + $0x68] sm:$0xf0] }
 0x577   :  { %1954 = vmatpush.bf16.msra.mxu0 %v4571_v50  ;;  %1967 = vmatpush.bf16.msra.mxu1 %v4588_v1 }
 0x579   :  { %v4774_v54 = vpop.permute.xlu2 %1076 }
 0x57a   :  { %vm1078_vm2 = vcmp.ne.s32.totalorder %v4774_v54, 0  ;;  %v3002_v54 = vld [vmem:[#allocation12 + $0x18] sm:$0xff] }
 0x57b   :  { %1955 = vmatpush.bf16.msra.mxu0 %v4574_v52  ;;  %1968 = vmatpush.bf16.msra.mxu1 %v4591_v4 }
 0x57f   :  { %1956 = vmatpush.bf16.msra.mxu0 %v4578_v56  ;;  %1969 = vmatpush.bf16.msra.mxu1 %v4594_v7 }
 0x5ef   :  { %v1496_v57 = vpop.f32.mrf.mxu0  ;;  %v1509_v58 = vpop.f32.mrf.mxu1 }
 0x5f0   :  { %v1515_v0 = vrot.slane %v1496_v57, 4  ;;  %v1516_v2 = vrot.slane %v1509_v58, 4 }
 0x5f2   :  { %v1519_v47 = vadd.f32 %v1515_v0, %v1478_v3  ;;  %v1520_v59 = vadd.f32 %v1516_v2, %v1479_v41 }
 0x5f4   :  { %v3711_v6 = vmul.f32 -1.442695, %v1519_v47  ;;  %v1522_v50 = vmul.f32 2.0, %v1520_v59  ;;  %v4250_v47 = vmov 4  }
 0x5f5   :  { %3935 = vset.pattern.permute.xlu0 %v4250_v47 }
 0x5f6   :  { %3972 = vpow2.f32 %v3711_v6  ;;  %v1524_v52 = vsel %vm1101_vm3, %v1522_v50, %v1520_v59  ;;  %v1602_v59 = vld [vmem:[#allocation3 + $0x40] sm:$0xf] }
 0x5f7   :  { %v3712_v1 = vmul.f32 -1.442695, %v1524_v52  ;;  %v1498_v4 = vpop.f32.mrf.mxu0  ;;  %v1511_v9 = vpop.f32.mrf.mxu1  ;;  %v1603_v50 = vld [vmem:[#allocation3 + $0x20] sm:$0xf] }
 0x5f9   :  { %3974 = vpow2.f32 %v3712_v1 }
 0x5fc   :  { %v3973_v56 = vpop.eup %3972 }
 0x5fd   :  { %v1531_v7 = vadd.f32 1.0, %v3973_v56 }
 0x5ff   :  { %v3975_v10 = vpop.eup %3974  ;;  %3976 = vrcp.f32 %v1531_v7  ;;  %v1544_v13 = vand.u32 2147483648, %v1531_v7  ;;  %v1542_v16 = vand.u32 2147483647, %v1531_v7  ;;  %vm1538_vm7 = vweird.f32 %v1531_v7 }
 0x600   :  { %v1532_v11 = vadd.f32 1.0, %v3975_v10 }
 0x601   :  { %v1545_v8 = vor.u32 1.1754944e-38, %v1544_v13  ;;  %vm1543_vm11 = vcmp.eq.f32.partialorder %v1542_v16, 8.507059e+37 }
 0x602   :  { %3978 = vrcp.f32 %v1532_v11  ;;  %v1559_v20 = vand.u32 2147483648, %v1532_v11  ;;  %v1557_v22 = vand.u32 2147483647, %v1532_v11  ;;  %vm1553_vm15 = vweird.f32 %v1532_v11 }
 0x604   :  { %v1560_v27 = vor.u32 1.1754944e-38, %v1559_v20  ;;  %vm1558_vm1 = vcmp.eq.f32.partialorder %v1557_v22, 8.507059e+37 }
 0x605   :  { %v3977_v62 = vpop.eup %3976 }
 0x606   :  { %v1534_v63 = vmul.f32 %v3977_v62, %v1531_v7  ;;  %vm1539_vm6 = vweird.f32 %v3977_v62 }
 0x607   :  { %vm1540_vm9 = vmor %vm1538_vm7, %vm1539_vm6 }
 0x608   :  { %v3979_v30 = vpop.eup %3978  ;;  %v1535_v12 = vsub.f32 1.0, %v1534_v63 }
 0x609   :  { %v1549_v14 = vmul.f32 %v3979_v30, %v1532_v11  ;;  %vm1554_vm10 = vweird.f32 %v3979_v30 }
 0x60a   :  { %v1536_v15 = vmul.f32 %v3977_v62, %v1535_v12  ;;  %vm1555_vm0 = vmor %vm1553_vm15, %vm1554_vm10 }
 0x60b   :  { %v1550_v17 = vsub.f32 1.0, %v1549_v14 }
 0x60c   :  { %v1537_v19 = vadd.f32 %v3977_v62, %v1536_v15 }
 0x60d   :  { %v1551_v21 = vmul.f32 %v3979_v30, %v1550_v17 }
 0x60e   :  { %v1541_v23 = vsel %vm1540_vm9, %v3977_v62, %v1537_v19 }
 0x60f   :  { %v1546_v25 = vsel %vm1543_vm11, %v1545_v8, %v1541_v23  ;;  %v1552_v26 = vadd.f32 %v3979_v30, %v1551_v21 }
 0x610   :  { %v1572_v28 = vmul.f32 %v1570_v24, %v1546_v25 }
 0x611   :  { %v1556_v31 = vsel %vm1555_vm0, %v3979_v30, %v1552_v26 }
 0x612   :  { %v1561_v5 = vsel %vm1558_vm1, %v1560_v27, %v1556_v31 }
 0x613   :  { %v1564_v33 = vmul.f32 2.0, %v1561_v5 }
 0x615   :  { %v3714_v34 = vadd.f32 -1.0, %v1564_v33 }
 0x617   :  { %v1568_v35 = vsel %vm1101_vm3, %v3714_v34, %v1561_v5 }
 0x618   :  { %v1573_v36 = vmul.f32 %v1568_v35, %v1546_v25 }
 0x61a   :  { %1575 = vrot.lane.b32.xlu1 %v1573_v36, %s4246_s5 }
 0x622   :  { %1596 = vrot.lane.b32.xlu1 %v4746_v49, %s4246_s5 }
 0x68c   :  { %v1576_v37 = vpop.permute.xlu1 %1575 }
 0x68d   :  { %v1578_v38 = vadd.f32 %v1576_v37, %v1572_v28 }
 0x68f   :  { %3980 = vtanh.f32 %v1578_v38  ;;  %v1582_v40 = vrot.slane %v1578_v38, 4 }
 0x691   :  { %1583 = vrot.lane.b32.xlu2 %v1582_v40, %s4246_s5 }
 0x694   :  { %v1597_v55 = vpop.permute.xlu1 %1596 }
 0x695   :  { %v3981_v42 = vpop.eup %3980 }
 0x696   :  { %v1580_v46 = vmul.f32 %v3981_v42, %v1568_v35 }
 0x698   :  { %v1591_v29 = vrot.slane %v1580_v46, 4 }
 0x69a   :  { %1592 = vrot.lane.b32.xlu0 %v1591_v29, %s4246_s5 }
 0x6a2   :  { %1586 = vrot.lane.b32.xlu0 %v1466_v18, %s4246_s5 }
 0x6aa   :  { %1080 = vperm.xlu0 %3935, %v4635_v32  }
 0x6eb   :  { %v1584_v2 = vpop.permute.xlu2 %1583 }
 0x70c   :  { %v1593_v57 = vpop.permute.xlu0 %1592 }
 0x70d   :  { %v1599_v49 = vsel %vm1078_vm2, %v1593_v57, %v1597_v55  ;;  %v1600_v58 = vsel %vm1078_vm2, %v1593_v57, 0.0 }
 0x70e   :  { %1601 = vst.msk [vmem:[#allocation4 + $0xc] sm:$0xf] %vm5270_vm13, %v1600_v58  ;;  %v1604_v0 = vpack.c.bf16 %v1599_v49, %v1599_v49 }
 0x710   :  { %3715 = vmatmul.msk.bf16.vlgmr.msra.gmra.mxu3 %vm1154_vm14, %v1604_v0  ;;  %3716 = vmatmul.msk.bf16.vlgmr.msra.gmra.mxu2 %vm1154_vm14, %v1604_v0 }
 0x714   :  { %v1587_v3 = vpop.permute.xlu0 %1586 }
 0x715   :  { %v1589_v41 = vsel %vm1078_vm2, %v1584_v2, %v1587_v3 }
 0x716   :  { %1685 = vrot.lane.b32.xlu1 %v1589_v41, %s4246_s5 }
 0x71c   :  { %v4794_v46 = vpop.permute.xlu0 %1080 }
 0x71d   :  { %vm1082_vm1 = vcmp.ne.s32.totalorder %v4794_v46, 0 }
 0x71e   :  { %1699 = vrot.lane.b32.xlu1 %v1599_v49, %s4246_s5 }
 0x788   :  { %v1686_v37 = vpop.permute.xlu1 %1685 }
 0x790   :  { %v1700_v57 = vpop.permute.xlu1 %1699 }
 0x793   :  { %v1617_v6 = vpop.f32.mrf.mxu3  ;;  %v1630_v52 = vpop.f32.mrf.mxu2 }
 0x794   :  { %v1634_v1 = vadd.f32 %v1617_v6, %v1602_v59  ;;  %v1635_v4 = vadd.f32 %v1630_v52, %v1603_v50  ;;  %v1709_v59 = vld [vmem:[#allocation3 + $0x40] sm:$0xf0] }
 0x795   :  { %v1710_v6 = vld [vmem:[#allocation3 + $0x20] sm:$0xf0] }
 0x796   :  { %v3717_v9 = vmul.f32 -1.442695, %v1634_v1  ;;  %v1637_v56 = vmul.f32 2.0, %v1635_v4 }
 0x798   :  { %3982 = vpow2.f32 %v3717_v9  ;;  %v1639_v7 = vsel %vm1101_vm3, %v1637_v56, %v1635_v4 }
 0x799   :  { %v3718_v10 = vmul.f32 -1.442695, %v1639_v7 }
 0x79b   :  { %3984 = vpow2.f32 %v3718_v10  ;;  %v1619_v11 = vpop.f32.mrf.mxu3  ;;  %v1632_v61 = vpop.f32.mrf.mxu2 }
 0x79e   :  { %v3983_v62 = vpop.eup %3982 }
 0x79f   :  { %v1646_v63 = vadd.f32 1.0, %v3983_v62 }
 0x7a1   :  { %v3985_v30 = vpop.eup %3984  ;;  %3986 = vrcp.f32 %v1646_v63  ;;  %v1659_v24 = vand.u32 2147483648, %v1646_v63  ;;  %vm1653_vm11 = vweird.f32 %v1646_v63  ;;  %v1657_v26 = vand.u32 2147483647, %v1646_v63 }
 0x7a2   :  { %v1647_v32 = vadd.f32 1.0, %v3985_v30  ;;  %v4251_v30 = vmov 5  }
 0x7a3   :  { %v1660_v5 = vor.u32 1.1754944e-38, %v1659_v24  ;;  %vm1658_vm0 = vcmp.eq.f32.partialorder %v1657_v26, 8.507059e+37  ;;  %3936 = vset.pattern.permute.xlu2 %v4251_v30  ;;  %v3905_v30 = vld [vmem:[#allocation10 + $0x14] sm:$0xf0] }
 0x7a4   :  { %3988 = vrcp.f32 %v1647_v32  ;;  %v1674_v19 = vand.u32 2147483648, %v1647_v32  ;;  %v1672_v8 = vand.u32 2147483647, %v1647_v32  ;;  %vm1668_vm6 = vweird.f32 %v1647_v32 }
 0x7a6   :  { %v1675_v23 = vor.u32 1.1754944e-38, %v1674_v19  ;;  %vm1673_vm10 = vcmp.eq.f32.partialorder %v1672_v8, 8.507059e+37 }
 0x7a7   :  { %v3987_v12 = vpop.eup %3986 }
 0x7a8   :  { %v1649_v13 = vmul.f32 %v3987_v12, %v1646_v63  ;;  %vm1654_vm7 = vweird.f32 %v3987_v12 }
 0x7a9   :  { %vm1655_vm15 = vmor %vm1653_vm11, %vm1654_vm7 }
 0x7aa   :  { %v3989_v14 = vpop.eup %3988  ;;  %v1650_v15 = vsub.f32 1.0, %v1649_v13 }
 0x7ab   :  { %v1664_v16 = vmul.f32 %v3989_v14, %v1647_v32  ;;  %vm1669_vm4 = vweird.f32 %v3989_v14 }
 0x7ac   :  { %v1651_v18 = vmul.f32 %v3987_v12, %v1650_v15  ;;  %vm1670_vm9 = vmor %vm1668_vm6, %vm1669_vm4 }
 0x7ad   :  { %v1665_v17 = vsub.f32 1.0, %v1664_v16 }
 0x7ae   :  { %v1652_v22 = vadd.f32 %v3987_v12, %v1651_v18 }
 0x7af   :  { %v1666_v20 = vmul.f32 %v3989_v14, %v1665_v17 }
 0x7b0   :  { %v1656_v31 = vsel %vm1655_vm15, %v3987_v12, %v1652_v22  ;;  %v4814_v12 = vld [vmem:[%s5260_s1] sm:$0xf] }
 0x7b1   :  { %v1667_v21 = vadd.f32 %v3989_v14, %v1666_v20  ;;  %v1661_v34 = vsel %vm1658_vm0, %v1660_v5, %v1656_v31 }
 0x7b2   :  { %v1688_v38 = vmul.f32 %v1686_v37, %v1661_v34 }
 0x7b3   :  { %v1671_v25 = vsel %vm1670_vm9, %v3989_v14, %v1667_v21 }
 0x7b4   :  { %v1676_v27 = vsel %vm1673_vm10, %v1675_v23, %v1671_v25 }
 0x7b5   :  { %v1679_v28 = vmul.f32 2.0, %v1676_v27 }
 0x7b7   :  { %v3720_v33 = vadd.f32 -1.0, %v1679_v28 }
 0x7b9   :  { %v1683_v35 = vsel %vm1101_vm3, %v3720_v33, %v1676_v27 }
 0x7ba   :  { %v1689_v36 = vmul.f32 %v1683_v35, %v1661_v34 }
 0x7bc   :  { %1691 = vrot.lane.b32.xlu2 %v1689_v36, %s4246_s5 }
 0x816   :  { %v1692_v40 = vpop.permute.xlu2 %1691 }
 0x817   :  { %v1694_v42 = vadd.f32 %v1692_v40, %v1688_v38 }
 0x819   :  { %3990 = vtanh.f32 %v1694_v42  ;;  %v1697_v8 = vsel %vm1082_vm1, %v1694_v42, %v1686_v37 }
 0x81a   :  { %v1801_v27 = vrot.slane %v1697_v8, 4 }
 0x81f   :  { %v3991_v29 = vpop.eup %3990 }
 0x820   :  { %v4796_v55 = vmul.f32 %v3991_v29, %v1683_v35 }
 0x822   :  { %v4802_v49 = vsel %vm1082_vm1, %v4796_v55, %v1700_v57 }
 0x823   :  { %v1711_v58 = vpack.c.bf16 %v4802_v49, %v4802_v49 }
 0x825   :  { %1713 = vrot.lane.b32.xlu2 %v1711_v58, %s4246_s5 }
 0x82d   :  { %1084 = vperm.xlu2 %3936, %v4814_v12  }
 0x87f   :  { %v1714_v0 = vpop.permute.xlu2 %1713 }
 0x880   :  { %3721 = vmatmul.msk.bf16.vlgmr.msrb.gmra.mxu0 %vm1154_vm14, %v1714_v0  ;;  %3722 = vmatmul.msk.bf16.vlgmr.msrb.gmra.mxu1 %vm1154_vm14, %v1714_v0 }
 0x8fd   :  { %v1727_v2 = vpop.f32.mrf.mxu0  ;;  %v1740_v3 = vpop.f32.mrf.mxu1 }
 0x8fe   :  { %v1746_v41 = vrot.slane %v1727_v2, 4  ;;  %v1747_v47 = vrot.slane %v1740_v3, 4  ;;  %v3765_v3 = vld [vmem:[#allocation10 + $0x68] sm:$0xf] }
 0x900   :  { %v1750_v50 = vadd.f32 %v1746_v41, %v1709_v59  ;;  %v1751_v52 = vadd.f32 %v1747_v47, %v1710_v6  ;;  %v3911_v41 = vld [vmem:[#allocation10 + $0x74] sm:$0xf0]  ;;  %v3910_v47 = vld [vmem:[#allocation10 + $0x6c] sm:$0xf]  ;;  %v3767_v6 = vld [vmem:[#allocation10 + $0x78] sm:$0xf0] }
 0x901   :  { %v4827_v59 = vor.u32 %v3911_v41, %v3765_v3  ;;  %v2058_v41 = vld [vmem:[#allocation3 + $0x78] sm:$0xf0] }
 0x902   :  { %v3723_v1 = vmul.f32 -1.442695, %v1750_v50  ;;  %v1753_v4 = vmul.f32 2.0, %v1751_v52  ;;  %v3757_v50 = vld [vmem:[#allocation10 + $0x48] sm:$0xf] }
 0x903   :  { %2104 = vmatpush.bf16.msra.mxu3 %v4827_v59  ;;  %2219 = vmatpush.bf16.msrb.mxu0 %v4827_v59 }
 0x904   :  { %3992 = vpow2.f32 %v3723_v1  ;;  %v1755_v9 = vsel %vm1101_vm3, %v1753_v4, %v1751_v52  ;;  %v3909_v52 = vld [vmem:[#allocation10 + $0x54] sm:$0xf0]  ;;  %v3908_v1 = vld [vmem:[#allocation10 + $0x4c] sm:$0xf] }
 0x905   :  { %v3724_v56 = vmul.f32 -1.442695, %v1755_v9  ;;  %v1729_v7 = vpop.f32.mrf.mxu0  ;;  %v1742_v10 = vpop.f32.mrf.mxu1  ;;  %v4835_v4 = vor.u32 %v3909_v52, %v3757_v50  ;;  %v3759_v9 = vld [vmem:[#allocation10 + $0x58] sm:$0xf0] }
 0x906   :  { %v3749_v7 = vld [vmem:[#allocation10 + $0x28] sm:$0xf]  ;;  %v3907_v10 = vld [vmem:[#allocation10 + $0x34] sm:$0xf0] }
 0x907   :  { %3994 = vpow2.f32 %v3724_v56  ;;  %v4837_v56 = vor.u32 %v3908_v1, %v3759_v9  ;;  %2105 = vmatpush.bf16.msra.mxu3 %v4835_v4  ;;  %2220 = vmatpush.bf16.msrb.mxu0 %v4835_v4 }
 0x90a   :  { %v3993_v11 = vpop.eup %3992 }
 0x90b   :  { %v1762_v61 = vadd.f32 1.0, %v3993_v11  ;;  %v3906_v11 = vld [vmem:[#allocation10 + $0x2c] sm:$0xf] }
 0x90d   :  { %v3995_v62 = vpop.eup %3994  ;;  %3996 = vrcp.f32 %v1762_v61  ;;  %v1775_v16 = vand.u32 2147483648, %v1762_v61  ;;  %v1773_v19 = vand.u32 2147483647, %v1762_v61  ;;  %vm1769_vm6 = vweird.f32 %v1762_v61 }
 0x90e   :  { %v1763_v63 = vadd.f32 1.0, %v3995_v62  ;;  %v3751_v62 = vld [vmem:[#allocation10 + $0x38] sm:$0xf0] }
 0x90f   :  { %v1776_v23 = vor.u32 1.1754944e-38, %v1775_v16  ;;  %vm1774_vm10 = vcmp.eq.f32.partialorder %v1773_v19, 8.507059e+37 }
 0x910   :  { %3998 = vrcp.f32 %v1763_v63  ;;  %v1790_v22 = vand.u32 2147483648, %v1763_v63  ;;  %v1788_v25 = vand.u32 2147483647, %v1763_v63  ;;  %vm1784_vm11 = vweird.f32 %v1763_v63 }
 0x912   :  { %v1791_v5 = vor.u32 1.1754944e-38, %v1790_v22  ;;  %vm1789_vm0 = vcmp.eq.f32.partialorder %v1788_v25, 8.507059e+37  ;;  %v4252_v25 = vmov 6  }
 0x913   :  { %v3997_v32 = vpop.eup %3996  ;;  %3937 = vset.pattern.permute.xlu0 %v4252_v25 }
 0x914   :  { %v1765_v13 = vmul.f32 %v3997_v32, %v1762_v61  ;;  %vm1770_vm4 = vweird.f32 %v3997_v32  ;;  %v4843_v61 = vor.u32 %v3907_v10, %v3749_v7 }
 0x915   :  { %vm1771_vm7 = vmor %vm1769_vm6, %vm1770_vm4 }
 0x916   :  { %v3999_v14 = vpop.eup %3998  ;;  %v1766_v15 = vsub.f32 1.0, %v1765_v13  ;;  %v3904_v13 = vld [vmem:[#allocation10 + $0xc] sm:$0xf]  ;;  %2106 = vmatpush.bf16.msra.mxu3 %v4843_v61  ;;  %2221 = vmatpush.bf16.msrb.mxu0 %v4843_v61 }
 0x917   :  { %v1780_v17 = vmul.f32 %v3999_v14, %v1763_v63  ;;  %vm1785_vm9 = vweird.f32 %v3999_v14  ;;  %v3741_v63 = vld [vmem:[#allocation10 + $0x8] sm:$0xf] }
 0x918   :  { %v1767_v18 = vmul.f32 %v3997_v32, %v1766_v15  ;;  %vm1786_vm15 = vmor %vm1784_vm11, %vm1785_vm9  ;;  %v4848_v15 = vor.u32 %v3905_v30, %v3741_v63 }
 0x919   :  { %v1781_v20 = vsub.f32 1.0, %v1780_v17  ;;  %v4859_v17 = vpop.permute.xlu2 %1084 }
 0x91a   :  { %v1768_v21 = vadd.f32 %v3997_v32, %v1767_v18  ;;  %2107 = vmatpush.bf16.msra.mxu3 %v4848_v15  ;;  %2222 = vmatpush.bf16.msrb.mxu0 %v4848_v15  ;;  %vm1086_vm4 = vcmp.ne.s32.totalorder %v4859_v17, 0 }
 0x91b   :  { %v1782_v24 = vmul.f32 %v3999_v14, %v1781_v20 }
 0x91c   :  { %v1772_v26 = vsel %vm1771_vm7, %v3997_v32, %v1768_v21  ;;  %v4845_v32 = vor.u32 %v3906_v11, %v3751_v62 }
 0x91d   :  { %v1777_v28 = vsel %vm1774_vm10, %v1776_v23, %v1772_v26  ;;  %v1783_v31 = vadd.f32 %v3999_v14, %v1782_v24  ;;  %v1833_v26 = vld [vmem:[#allocation3 + $0x60] sm:$0xf] }
 0x91e   :  { %v1803_v33 = vmul.f32 %v1801_v27, %v1777_v28 }
 0x91f   :  { %v1787_v34 = vsel %vm1786_vm15, %v3999_v14, %v1783_v31  ;;  %v3743_v14 = vld [vmem:[#allocation10 + $0x18] sm:$0xf0] }
 0x920   :  { %v1792_v35 = vsel %vm1789_vm0, %v1791_v5, %v1787_v34  ;;  %v4852_v16 = vor.u32 %v3904_v13, %v3743_v14 }
 0x921   :  { %v1795_v36 = vmul.f32 2.0, %v1792_v35 }
 0x923   :  { %v3726_v37 = vadd.f32 -1.0, %v1795_v36 }
 0x925   :  { %v1799_v38 = vsel %vm1101_vm3, %v3726_v37, %v1792_v35 }
 0x926   :  { %v1804_v40 = vmul.f32 %v1799_v38, %v1777_v28  ;;  %v1834_v28 = vld [vmem:[#allocation3 + $0x70] sm:$0xf] }
 0x928   :  { %1806 = vrot.lane.b32.xlu1 %v1804_v40, %s4246_s5 }
 0x930   :  { %1827 = vrot.lane.b32.xlu1 %v4802_v49, %s4246_s5  ;;  %v4829_v49 = vor.u32 %v3910_v47, %v3767_v6  ;;  %v2059_v47 = vld [vmem:[#allocation3 + $0x28] sm:$0xf0] }
 0x932   :  { %2117 = vmatpush.bf16.msra.mxu2 %v4829_v49  ;;  %2232 = vmatpush.bf16.msrb.mxu1 %v4829_v49 }
 0x936   :  { %2118 = vmatpush.bf16.msra.mxu2 %v4837_v56  ;;  %2233 = vmatpush.bf16.msrb.mxu1 %v4837_v56 }
 0x93a   :  { %2119 = vmatpush.bf16.msra.mxu2 %v4845_v32  ;;  %2234 = vmatpush.bf16.msrb.mxu1 %v4845_v32 }
 0x93e   :  { %2120 = vmatpush.bf16.msra.mxu2 %v4852_v16  ;;  %2235 = vmatpush.bf16.msrb.mxu1 %v4852_v16 }
 0x99a   :  { %v1807_v42 = vpop.permute.xlu1 %1806 }
 0x99b   :  { %v1809_v29 = vadd.f32 %v1807_v42, %v1803_v33 }
 0x99d   :  { %4000 = vtanh.f32 %v1809_v29  ;;  %v1813_v57 = vrot.slane %v1809_v29, 4 }
 0x99f   :  { %1814 = vrot.lane.b32.xlu2 %v1813_v57, %s4246_s5 }
 0x9a2   :  { %v1828_v18 = vpop.permute.xlu1 %1827 }
 0x9a3   :  { %v4001_v58 = vpop.eup %4000 }
 0x9a4   :  { %v1811_v0 = vmul.f32 %v4001_v58, %v1799_v38 }
 0x9a6   :  { %v1822_v2 = vrot.slane %v1811_v0, 4 }
 0x9a8   :  { %1823 = vrot.lane.b32.xlu0 %v1822_v2, %s4246_s5 }
 0x9b0   :  { %1817 = vrot.lane.b32.xlu0 %v1697_v8, %s4246_s5 }
 0x9b8   :  { %1088 = vperm.xlu0 %3937, %v4814_v12  }
 0x9c0   :  { %3939 = vset.pattern.permute.xlu0 %v4245_v53 }
 0x9f9   :  { %v1815_v22 = vpop.permute.xlu2 %1814 }
 0xa1a   :  { %v1824_v19 = vpop.permute.xlu0 %1823 }
 0xa1b   :  { %v1830_v20 = vsel %vm1086_vm4, %v1824_v19, %v1828_v18  ;;  %v1831_v8 = vsel %vm1086_vm4, %v1824_v19, 0.0 }
 0xa1c   :  { %1832 = vst.msk [vmem:[#allocation4 + $0x14] sm:$0xf] %vm5270_vm13, %v1831_v8  ;;  %v1835_v21 = vpack.c.bf16 %v1830_v20, %v1830_v20 }
 0xa1e   :  { %3727 = vmatmul.msk.bf16.vlgmr.msrb.gmra.mxu3 %vm1154_vm14, %v1835_v21  ;;  %3728 = vmatmul.msk.bf16.vlgmr.msrb.gmra.mxu2 %vm1154_vm14, %v1835_v21 }
 0xa1f   :  { %2321 = vmatpush.bf16.msrb.mxu3 %v4827_v59  ;;  %2334 = vmatpush.bf16.msrb.mxu2 %v4829_v49 }
 0xa22   :  { %v1818_v23 = vpop.permute.xlu0 %1817 }
 0xa23   :  { %v1820_v24 = vsel %vm1086_vm4, %v1815_v22, %v1818_v23  ;;  %2322 = vmatpush.bf16.msrb.mxu3 %v4835_v4  ;;  %2335 = vmatpush.bf16.msrb.mxu2 %v4837_v56 }
 0xa24   :  { %1916 = vrot.lane.b32.xlu1 %v1820_v24, %s4246_s5 }
 0xa27   :  { %2323 = vmatpush.bf16.msrb.mxu3 %v4843_v61  ;;  %2336 = vmatpush.bf16.msrb.mxu2 %v4845_v32 }
 0xa2b   :  { %2324 = vmatpush.bf16.msrb.mxu3 %v4848_v15  ;;  %2337 = vmatpush.bf16.msrb.mxu2 %v4852_v16 }
 0xa2c   :  { %1930 = vrot.lane.b32.xlu1 %v1830_v20, %s4246_s5 }
 0xa2e   :  { %2108 = vmatmul.bf16.vlgmr.msra.gmra.mxu3 %v4245_v53  ;;  %2121 = vmatmul.bf16.vlgmr.msra.gmra.mxu2 %v4245_v53 }
 0xa2f   :  { %2552 = vmatpush.bf16.msra.mxu3 %v4827_v59  ;;  %2565 = vmatpush.bf16.msra.mxu2 %v4829_v49 }
 0xa33   :  { %2553 = vmatpush.bf16.msra.mxu3 %v4835_v4  ;;  %2566 = vmatpush.bf16.msra.mxu2 %v4837_v56 }
 0xa37   :  { %2554 = vmatpush.bf16.msra.mxu3 %v4843_v61  ;;  %2567 = vmatpush.bf16.msra.mxu2 %v4845_v32 }
 0xa3b   :  { %2555 = vmatpush.bf16.msra.mxu3 %v4848_v15  ;;  %2568 = vmatpush.bf16.msra.mxu2 %v4852_v16 }
 0xaa1   :  { %v1848_v27 = vpop.f32.mrf.mxu3  ;;  %v1861_v31 = vpop.f32.mrf.mxu2 }
 0xaa2   :  { %v1865_v5 = vadd.f32 %v1848_v27, %v1833_v26  ;;  %v1866_v33 = vadd.f32 %v1861_v31, %v1834_v28 }
 0xaa4   :  { %v3729_v34 = vmul.f32 -1.442695, %v1865_v5  ;;  %v1868_v35 = vmul.f32 2.0, %v1866_v33 }
 0xaa6   :  { %4002 = vpow2.f32 %v3729_v34  ;;  %v1870_v36 = vsel %vm1101_vm3, %v1868_v35, %v1866_v33 }
 0xaa7   :  { %v3730_v37 = vmul.f32 -1.442695, %v1870_v36 }
 0xaa9   :  { %4004 = vpow2.f32 %v3730_v37  ;;  %v1850_v38 = vpop.f32.mrf.mxu3  ;;  %v1863_v40 = vpop.f32.mrf.mxu2 }
 0xaac   :  { %v4003_v42 = vpop.eup %4002 }
 0xaad   :  { %v1877_v29 = vadd.f32 1.0, %v4003_v42 }
 0xaaf   :  { %v4005_v57 = vpop.eup %4004  ;;  %4006 = vrcp.f32 %v1877_v29  ;;  %v1890_v28 = vand.u32 2147483648, %v1877_v29  ;;  %vm1884_vm15 = vweird.f32 %v1877_v29  ;;  %v1888_v33 = vand.u32 2147483647, %v1877_v29 }
 0xab0   :  { %v1878_v53 = vadd.f32 1.0, %v4005_v57 }
 0xab1   :  { %v2109_v58 = vpop.f32.mrf.mxu3  ;;  %v2122_v0 = vpop.f32.mrf.mxu2  ;;  %v1891_v37 = vor.u32 1.1754944e-38, %v1890_v28  ;;  %vm1889_vm12 = vcmp.eq.f32.partialorder %v1888_v33, 8.507059e+37 }
 0xab2   :  { %4008 = vrcp.f32 %v1878_v53  ;;  %v2128_v2 = vrot.slane %v2109_v58, 4  ;;  %v2129_v3 = vrot.slane %v2122_v0, 4  ;;  %v1905_v20 = vand.u32 2147483648, %v1878_v53 }
 0xab3   :  { %v1903_v21 = vand.u32 2147483647, %v1878_v53  ;;  %vm1899_vm7 = vweird.f32 %v1878_v53 }
 0xab4   :  { %v2132_v6 = vadd.f32 %v2128_v2, %v2058_v41  ;;  %v2133_v50 = vadd.f32 %v2129_v3, %v2059_v47  ;;  %v1906_v26 = vor.u32 1.1754944e-38, %v1905_v20 }
 0xab5   :  { %v4007_v52 = vpop.eup %4006  ;;  %vm1904_vm11 = vcmp.eq.f32.partialorder %v1903_v21, 8.507059e+37 }
 0xab6   :  { %v1880_v1 = vmul.f32 %v4007_v52, %v1877_v29  ;;  %v3771_v9 = vmul.f32 -1.442695, %v2132_v6  ;;  %v2135_v7 = vmul.f32 2.0, %v2133_v50  ;;  %vm1885_vm9 = vweird.f32 %v4007_v52 }
 0xab7   :  { %vm1886_vm0 = vmor %vm1884_vm15, %vm1885_vm9 }
 0xab8   :  { %v4009_v10 = vpop.eup %4008  ;;  %4010 = vpow2.f32 %v3771_v9  ;;  %v2137_v11 = vsel %vm1101_vm3, %v2135_v7, %v2133_v50  ;;  %v1881_v62 = vsub.f32 1.0, %v1880_v1 }
 0xab9   :  { %v3772_v63 = vmul.f32 -1.442695, %v2137_v11  ;;  %v2111_v30 = vpop.f32.mrf.mxu3  ;;  %v2124_v13 = vpop.f32.mrf.mxu2  ;;  %v1895_v14 = vmul.f32 %v4009_v10, %v1878_v53  ;;  %vm1900_vm6 = vweird.f32 %v4009_v10 }
 0xaba   :  { %v1882_v19 = vmul.f32 %v4007_v52, %v1881_v62  ;;  %vm1901_vm10 = vmor %vm1899_vm7, %vm1900_vm6 }
 0xabb   :  { %4012 = vpow2.f32 %v3772_v63  ;;  %v1896_v18 = vsub.f32 1.0, %v1895_v14 }
 0xabc   :  { %v1883_v25 = vadd.f32 %v4007_v52, %v1882_v19 }
 0xabd   :  { %v1897_v8 = vmul.f32 %v4009_v10, %v1896_v18 }
 0xabe   :  { %v4011_v22 = vpop.eup %4010  ;;  %v1887_v36 = vsel %vm1886_vm0, %v4007_v52, %v1883_v25  ;;  %v4910_v25 = vpop.permute.xlu0 %1088 }
 0xabf   :  { %v2144_v23 = vadd.f32 1.0, %v4011_v22  ;;  %v1898_v24 = vadd.f32 %v4009_v10, %v1897_v8  ;;  %v1892_v42 = vsel %vm1889_vm12, %v1891_v37, %v1887_v36  ;;  %v4903_v8 = vpop.permute.xlu1 %1916 }
 0xac0   :  { %v1919_v21 = vmul.f32 %v4903_v8, %v1892_v42 }
 0xac1   :  { %v4013_v27 = vpop.eup %4012  ;;  %4014 = vrcp.f32 %v2144_v23  ;;  %v1902_v31 = vsel %vm1901_vm10, %v4009_v10, %v1898_v24  ;;  %v2157_v7 = vand.u32 2147483648, %v2144_v23  ;;  %v2155_v11 = vand.u32 2147483647, %v2144_v23 }
 0xac2   :  { %v2145_v5 = vadd.f32 1.0, %v4013_v27  ;;  %v1907_v34 = vsel %vm1904_vm11, %v1906_v26, %v1902_v31  ;;  %vm2151_vm11 = vweird.f32 %v2144_v23  ;;  %v4253_v24 = vmov 7  }
 0xac3   :  { %v1910_v35 = vmul.f32 2.0, %v1907_v34  ;;  %v2158_v13 = vor.u32 1.1754944e-38, %v2157_v7  ;;  %vm2156_vm0 = vcmp.eq.f32.partialorder %v2155_v11, 8.507059e+37  ;;  %3938 = vset.pattern.permute.xlu2 %v4253_v24 }
 0xac4   :  { %4016 = vrcp.f32 %v2145_v5  ;;  %v2172_v47 = vand.u32 2147483648, %v2145_v5  ;;  %v2170_v50 = vand.u32 2147483647, %v2145_v5  ;;  %vm2166_vm7 = vweird.f32 %v2145_v5 }
 0xac5   :  { %v3732_v38 = vadd.f32 -1.0, %v1910_v35 }
 0xac6   :  { %v2173_v9 = vor.u32 1.1754944e-38, %v2172_v47  ;;  %vm2171_vm10 = vcmp.eq.f32.partialorder %v2170_v50, 8.507059e+37  ;;  %v1940_v47 = vld [vmem:[#allocation3 + $0x60] sm:$0xf0] }
 0xac7   :  { %v4015_v40 = vpop.eup %4014  ;;  %v1914_v57 = vsel %vm1101_vm3, %v3732_v38, %v1907_v34  ;;  %v1931_v28 = vpop.permute.xlu1 %1930 }
 0xac8   :  { %v1920_v53 = vmul.f32 %v1914_v57, %v1892_v42  ;;  %v2147_v58 = vmul.f32 %v4015_v40, %v2144_v23  ;;  %vm2152_vm12 = vweird.f32 %v4015_v40 }
 0xac9   :  { %vm2153_vm15 = vmor %vm2151_vm11, %vm2152_vm12 }
 0xaca   :  { %v4017_v0 = vpop.eup %4016  ;;  %1922 = vrot.lane.b32.xlu2 %v1920_v53, %s4246_s5  ;;  %v2148_v2 = vsub.f32 1.0, %v2147_v58 }
 0xacb   :  { %v2162_v29 = vmul.f32 %v4017_v0, %v2145_v5  ;;  %vm2167_vm6 = vweird.f32 %v4017_v0 }
 0xacc   :  { %v2149_v41 = vmul.f32 %v4015_v40, %v2148_v2  ;;  %vm2168_vm9 = vmor %vm2166_vm7, %vm2167_vm6  ;;  %vm1090_vm6 = vcmp.ne.s32.totalorder %v4910_v25, 0 }
 0xacd   :  { %v2163_v3 = vsub.f32 1.0, %v2162_v29 }
 0xace   :  { %v2150_v1 = vadd.f32 %v4015_v40, %v2149_v41 }
 0xacf   :  { %v2164_v6 = vmul.f32 %v4017_v0, %v2163_v3 }
 0xad0   :  { %v2154_v30 = vsel %vm2153_vm15, %v4015_v40, %v2150_v1 }
 0xad1   :  { %v2165_v52 = vadd.f32 %v4017_v0, %v2164_v6  ;;  %v2159_v18 = vsel %vm2156_vm0, %v2158_v13, %v2154_v30 }
 0xad2   :  { %v2182_v33 = vmul.f32 0.0, %v2159_v18 }
 0xad3   :  { %v2169_v10 = vsel %vm2168_vm9, %v4017_v0, %v2165_v52 }
 0xad4   :  { %v2174_v62 = vsel %vm2171_vm10, %v2173_v9, %v2169_v10  ;;  %v2209_v10 = vld [vmem:[#allocation3 + $0x78] sm:$0xf] }
 0xad5   :  { %v2177_v63 = vmul.f32 2.0, %v2174_v62 }
 0xad7   :  { %v3774_v14 = vadd.f32 -1.0, %v2177_v63 }
 0xad9   :  { %v2181_v19 = vsel %vm1101_vm3, %v3774_v14, %v2174_v62  ;;  %v2210_v62 = vld [vmem:[#allocation3 + $0x28] sm:$0xf] }
 0xada   :  { %v2183_v20 = vmul.f32 %v2181_v19, %v2159_v18 }
 0xadc   :  { %2185 = vrot.lane.b32.xlu2 %v2183_v20, %s4246_s5 }
 0xae4   :  { %1092 = vperm.xlu2 %3938, %v4814_v12  }
 0xb24   :  { %v1923_v22 = vpop.permute.xlu2 %1922 }
 0xb25   :  { %v4906_v23 = vadd.f32 %v1923_v22, %v1919_v21 }
 0xb27   :  { %4018 = vtanh.f32 %v4906_v23 }
 0xb2d   :  { %v4019_v26 = vpop.eup %4018 }
 0xb2e   :  { %v4912_v27 = vmul.f32 %v4019_v26, %v1914_v57 }
 0xb30   :  { %v1933_v31 = vsel %vm1090_vm6, %v4912_v27, %v1931_v28 }
 0xb31   :  { %v1942_v5 = vpack.c.bf16 %v1933_v31, %v1933_v31 }
 0xb33   :  { %1944 = vrot.lane.b32.xlu1 %v1942_v5, %s4246_s5 }
 0xb36   :  { %v2186_v34 = vpop.permute.xlu2 %2185 }
 0xb37   :  { %v2188_v12 = vadd.f32 %v2186_v34, %v2182_v33  ;;  %v1928_v34 = vsel %vm1090_vm6, %v4906_v23, %v4903_v8 }
 0xb39   :  { %4020 = vtanh.f32 %v2188_v12  ;;  %v2192_v35 = vrot.slane %v2188_v12, 4 }
 0xb3b   :  { %2193 = vrot.lane.b32.xlu1 %v2192_v35, %s4246_s5 }
 0xb3e   :  { %v4925_v42 = vpop.permute.xlu2 %1092 }
 0xb3f   :  { %v4021_v36 = vpop.eup %4020  ;;  %vm5269_vm7 = vcmp.ne.s32.totalorder %v4925_v42, 0 }
 0xb40   :  { %v2190_v37 = vmul.f32 %v4021_v36, %v2181_v19 }
 0xb42   :  { %v2198_v38 = vrot.slane %v2190_v37, 4 }
 0xb44   :  { %2199 = vrot.lane.b32.xlu0 %v2198_v38, %s4246_s5  ;;  %v2032_v38 = vrot.slane %v1928_v34, 4 }
 0xba5   :  { %v1945_v40 = vpop.permute.xlu1 %1944 }
 0xba6   :  { %3733 = vmatmul.msk.bf16.vlgmr.msra.gmra.mxu0 %vm1154_vm14, %v1945_v40  ;;  %3734 = vmatmul.msk.bf16.vlgmr.msra.gmra.mxu1 %vm1154_vm14, %v1945_v40 }
 0xba7   :  { %2446 = vmatpush.bf16.msra.mxu0 %v4827_v59  ;;  %2459 = vmatpush.bf16.msra.mxu1 %v4829_v49 }
 0xbab   :  { %2447 = vmatpush.bf16.msra.mxu0 %v4835_v4  ;;  %2460 = vmatpush.bf16.msra.mxu1 %v4837_v56 }
 0xbad   :  { %v2194_v57 = vpop.permute.xlu1 %2193 }
 0xbae   :  { %v2196_v53 = vsel %vm5269_vm7, %v2194_v57, 0.0 }
 0xbaf   :  { %2292 = vrot.lane.b32.xlu2 %v2196_v53, %s4246_s5  ;;  %2448 = vmatpush.bf16.msra.mxu0 %v4843_v61 }
 0xbb0   :  { %2461 = vmatpush.bf16.msra.mxu1 %v4845_v32 }
 0xbb3   :  { %2449 = vmatpush.bf16.msra.mxu0 %v4848_v15 }
 0xbb4   :  { %2462 = vmatpush.bf16.msra.mxu1 %v4852_v16 }
 0xbb6   :  { %v2200_v58 = vpop.permute.xlu0 %2199 }
 0xbb7   :  { %v2202_v0 = vsel %vm5269_vm7, %v2200_v58, 0.0 }
 0xbb8   :  { %v2211_v2 = vpack.c.bf16 %v2202_v0, %v2202_v0  ;;  %2204 = vrot.lane.b32.xlu1 %v2202_v0, %s4246_s5 }
 0xbba   :  { %3775 = vmatmul.msk.bf16.vlgmr.msrb.gmra.mxu0 %vm1154_vm14, %v2211_v2  ;;  %3776 = vmatmul.msk.bf16.vlgmr.msrb.gmra.mxu1 %vm1154_vm14, %v2211_v2 }
 0xbbb   :  { %2677 = vmatpush.bf16.msrb.mxu0 %v4827_v59  ;;  %2690 = vmatpush.bf16.msrb.mxu1 %v4829_v49 }
 0xbbf   :  { %2678 = vmatpush.bf16.msrb.mxu0 %v4835_v4  ;;  %2691 = vmatpush.bf16.msrb.mxu1 %v4837_v56 }
 0xbc3   :  { %2679 = vmatpush.bf16.msrb.mxu0 %v4843_v61  ;;  %2692 = vmatpush.bf16.msrb.mxu1 %v4845_v32 }
 0xbc7   :  { %2680 = vmatpush.bf16.msrb.mxu0 %v4848_v15  ;;  %2693 = vmatpush.bf16.msrb.mxu1 %v4852_v16 }
 0xc23   :  { %v1958_v29 = vpop.f32.mrf.mxu0  ;;  %v4950_v3 = vpop.f32.mrf.mxu1 }
 0xc24   :  { %v1977_v41 = vrot.slane %v1958_v29, 4 }
 0xc26   :  { %v1981_v6 = vadd.f32 %v1977_v41, %v1940_v47 }
 0xc28   :  { %v3735_v50 = vmul.f32 -1.442695, %v1981_v6 }
 0xc2a   :  { %4022 = vpow2.f32 %v3735_v50  ;;  %v4968_v34 = vpop.permute.xlu1 %2204 }
 0xc2b   :  { %v1960_v52 = vpop.f32.mrf.mxu0  ;;  %v1973_v1 = vpop.f32.mrf.mxu1 }
 0xc30   :  { %v4023_v9 = vpop.eup %4022 }
 0xc31   :  { %v1993_v7 = vadd.f32 1.0, %v4023_v9 }
 0xc33   :  { %4024 = vrcp.f32 %v1993_v7  ;;  %v2006_v26 = vand.u32 2147483648, %v1993_v7  ;;  %v2004_v31 = vand.u32 2147483647, %v1993_v7  ;;  %vm2000_vm9 = vweird.f32 %v1993_v7 }
 0xc35   :  { %v2007_v35 = vor.u32 1.1754944e-38, %v2006_v26  ;;  %vm2005_vm11 = vcmp.eq.f32.partialorder %v2004_v31, 8.507059e+37 }
 0xc37   :  { %v2224_v11 = vpop.f32.mrf.mxu0  ;;  %v2237_v63 = vpop.f32.mrf.mxu1 }
 0xc38   :  { %v2241_v30 = vadd.f32 %v2224_v11, %v2209_v10  ;;  %v2242_v13 = vadd.f32 %v2237_v63, %v2210_v62 }
 0xc39   :  { %v4025_v14 = vpop.eup %4024 }
 0xc3a   :  { %v3777_v18 = vmul.f32 -1.442695, %v2241_v30  ;;  %v2244_v19 = vmul.f32 2.0, %v2242_v13  ;;  %v1996_v20 = vmul.f32 %v4025_v14, %v1993_v7  ;;  %vm2001_vm12 = vweird.f32 %v4025_v14 }
 0xc3b   :  { %vm2002_vm10 = vmor %vm2000_vm9, %vm2001_vm12 }
 0xc3c   :  { %4026 = vpow2.f32 %v3777_v18  ;;  %v2246_v21 = vsel %vm1101_vm3, %v2244_v19, %v2242_v13  ;;  %v1997_v22 = vsub.f32 1.0, %v1996_v20 }
 0xc3d   :  { %v3778_v24 = vmul.f32 -1.442695, %v2246_v21 }
 0xc3e   :  { %v1998_v28 = vmul.f32 %v4025_v14, %v1997_v22 }
 0xc3f   :  { %4028 = vpow2.f32 %v3778_v24  ;;  %v2226_v5 = vpop.f32.mrf.mxu0  ;;  %v2239_v33 = vpop.f32.mrf.mxu1 }
 0xc40   :  { %v1999_v12 = vadd.f32 %v4025_v14, %v1998_v28  ;;  %v2293_v24 = vpop.permute.xlu2 %2292 }
 0xc42   :  { %v4027_v36 = vpop.eup %4026  ;;  %v2003_v37 = vsel %vm2002_vm10, %v4025_v14, %v1999_v12 }
 0xc43   :  { %v2253_v40 = vadd.f32 1.0, %v4027_v36  ;;  %v4958_v57 = vsel %vm2005_vm11, %v2007_v35, %v2003_v37 }
 0xc44   :  { %v4961_v53 = vmul.f32 %v2032_v38, %v4958_v57 }
 0xc45   :  { %v4029_v58 = vpop.eup %4028  ;;  %4030 = vrcp.f32 %v2253_v40  ;;  %v2266_v11 = vand.u32 2147483648, %v2253_v40  ;;  %vm2260_vm11 = vweird.f32 %v2253_v40  ;;  %v2264_v63 = vand.u32 2147483647, %v2253_v40 }
 0xc46   :  { %v2254_v0 = vadd.f32 1.0, %v4029_v58 }
 0xc47   :  { %v2267_v18 = vor.u32 1.1754944e-38, %v2266_v11  ;;  %vm2265_vm13 = vcmp.eq.f32.partialorder %v2264_v63, 8.507059e+37 }
 0xc48   :  { %4032 = vrcp.f32 %v2254_v0  ;;  %v2281_v50 = vand.u32 2147483648, %v2254_v0  ;;  %v2279_v1 = vand.u32 2147483647, %v2254_v0  ;;  %vm2275_vm0 = vweird.f32 %v2254_v0 }
 0xc4a   :  { %v2282_v10 = vor.u32 1.1754944e-38, %v2281_v50  ;;  %vm2280_vm10 = vcmp.eq.f32.partialorder %v2279_v1, 8.507059e+37 }
 0xc4b   :  { %v4031_v2 = vpop.eup %4030 }
 0xc4c   :  { %v2256_v8 = vmul.f32 %v4031_v2, %v2253_v40  ;;  %vm2261_vm12 = vweird.f32 %v4031_v2 }
 0xc4d   :  { %vm2262_vm7 = vmor %vm2260_vm11, %vm2261_vm12 }
 0xc4e   :  { %v4033_v23 = vpop.eup %4032  ;;  %v2257_v29 = vsub.f32 1.0, %v2256_v8 }
 0xc4f   :  { %v2271_v41 = vmul.f32 %v4033_v23, %v2254_v0  ;;  %vm2276_vm15 = vweird.f32 %v4033_v23  ;;  %v2308_v0 = vld [vmem:[#allocation3 + $0x10] sm:$0xf0] }
 0xc50   :  { %v2258_v6 = vmul.f32 %v4031_v2, %v2257_v29  ;;  %vm2277_vm9 = vmor %vm2275_vm0, %vm2276_vm15 }
 0xc51   :  { %v2272_v47 = vsub.f32 1.0, %v2271_v41 }
 0xc52   :  { %v2259_v7 = vadd.f32 %v4031_v2, %v2258_v6 }
 0xc53   :  { %v2273_v52 = vmul.f32 %v4033_v23, %v2272_v47 }
 0xc54   :  { %v2263_v14 = vsel %vm2262_vm7, %v4031_v2, %v2259_v7  ;;  %v2309_v2 = vld [vmem:[#allocation3 + $0x38] sm:$0xf0] }
 0xc55   :  { %v2274_v9 = vadd.f32 %v4033_v23, %v2273_v52  ;;  %v2268_v20 = vsel %vm2265_vm13, %v2267_v18, %v2263_v14 }
 0xc56   :  { %v2295_v26 = vmul.f32 %v2293_v24, %v2268_v20 }
 0xc57   :  { %v2278_v62 = vsel %vm2277_vm9, %v4033_v23, %v2274_v9 }
 0xc58   :  { %v2283_v30 = vsel %vm2280_vm10, %v2282_v10, %v2278_v62 }
 0xc59   :  { %v2286_v13 = vmul.f32 2.0, %v2283_v30 }
 0xc5b   :  { %v3780_v19 = vadd.f32 -1.0, %v2286_v13 }
 0xc5d   :  { %v2290_v21 = vsel %vm1101_vm3, %v3780_v19, %v2283_v30 }
 0xc5e   :  { %v2296_v22 = vmul.f32 %v2290_v21, %v2268_v20 }
 0xc60   :  { %2298 = vrot.lane.b32.xlu0 %v2296_v22, %s4246_s5 }
 0xcd2   :  { %v2299_v28 = vpop.permute.xlu0 %2298 }
 0xcd3   :  { %v2301_v31 = vadd.f32 %v2299_v28, %v2295_v26 }
 0xcd5   :  { %4034 = vtanh.f32 %v2301_v31  ;;  %v2304_v20 = vsel %vm1090_vm6, %v2301_v31, %v2293_v24 }
 0xcdb   :  { %v4035_v5 = vpop.eup %4034 }
 0xcdc   :  { %v4966_v33 = vmul.f32 %v4035_v5, %v2290_v21 }
 0xcde   :  { %v2305_v12 = vsel %vm1090_vm6, %v4966_v33, %v4968_v34  ;;  %v2306_v17 = vsel %vm1090_vm6, %v4966_v33, 0.0 }
 0xcdf   :  { %v2310_v35 = vpack.c.bf16 %v2305_v12, %v2305_v12 }
 0xce1   :  { %2312 = vrot.lane.b32.xlu2 %v2310_v35, %s4246_s5 }
 0xce9   :  { %2426 = vrot.lane.b32.xlu2 %v2305_v12, %s4246_s5 }
 0xd3b   :  { %v2313_v36 = vpop.permute.xlu2 %2312 }
 0xd3c   :  { %3781 = vmatmul.msk.bf16.vlgmr.msrb.gmra.mxu3 %vm1154_vm14, %v2313_v36  ;;  %3782 = vmatmul.msk.bf16.vlgmr.msrb.gmra.mxu2 %vm1154_vm14, %v2313_v36  ;;  %v2400_v36 = vrot.slane %v2304_v20, 4 }
 0xd3d   :  { %2783 = vmatpush.bf16.msrb.mxu3 %v4827_v59  ;;  %2796 = vmatpush.bf16.msrb.mxu2 %v4829_v49 }
 0xd41   :  { %2784 = vmatpush.bf16.msrb.mxu3 %v4835_v4  ;;  %2797 = vmatpush.bf16.msrb.mxu2 %v4837_v56 }
 0xd45   :  { %2785 = vmatpush.bf16.msrb.mxu3 %v4843_v61  ;;  %2798 = vmatpush.bf16.msrb.mxu2 %v4845_v32 }
 0xd49   :  { %2786 = vmatpush.bf16.msrb.mxu3 %v4848_v15  ;;  %2799 = vmatpush.bf16.msrb.mxu2 %v4852_v16 }
 0xdbf   :  { %v2326_v37 = vpop.f32.mrf.mxu3  ;;  %v2339_v38 = vpop.f32.mrf.mxu2 }
 0xdc0   :  { %v2345_v40 = vrot.slane %v2326_v37, 4  ;;  %v2346_v58 = vrot.slane %v2339_v38, 4 }
 0xdc2   :  { %v2349_v8 = vadd.f32 %v2345_v40, %v2308_v0  ;;  %v2350_v23 = vadd.f32 %v2346_v58, %v2309_v2 }
 0xdc4   :  { %v3783_v29 = vmul.f32 -1.442695, %v2349_v8  ;;  %v2352_v41 = vmul.f32 2.0, %v2350_v23 }
 0xdc6   :  { %4036 = vpow2.f32 %v3783_v29  ;;  %v2354_v47 = vsel %vm1101_vm3, %v2352_v41, %v2350_v23 }
 0xdc7   :  { %v3784_v6 = vmul.f32 -1.442695, %v2354_v47  ;;  %v2328_v50 = vpop.f32.mrf.mxu3  ;;  %v2341_v52 = vpop.f32.mrf.mxu2 }
 0xdc9   :  { %4038 = vpow2.f32 %v3784_v6 }
 0xdcc   :  { %v4037_v1 = vpop.eup %4036 }
 0xdcd   :  { %v2361_v9 = vadd.f32 1.0, %v4037_v1  ;;  %v2427_v1 = vpop.permute.xlu2 %2426 }
 0xdcf   :  { %v4039_v7 = vpop.eup %4038  ;;  %4040 = vrcp.f32 %v2361_v9  ;;  %v2374_v13 = vand.u32 2147483648, %v2361_v9  ;;  %v2372_v19 = vand.u32 2147483647, %v2361_v9  ;;  %vm2368_vm7 = vweird.f32 %v2361_v9 }
 0xdd0   :  { %v2362_v10 = vadd.f32 1.0, %v4039_v7 }
 0xdd1   :  { %v2375_v28 = vor.u32 1.1754944e-38, %v2374_v13  ;;  %vm2373_vm12 = vcmp.eq.f32.partialorder %v2372_v19, 8.507059e+37 }
 0xdd2   :  { %4042 = vrcp.f32 %v2362_v10  ;;  %v2389_v26 = vand.u32 2147483648, %v2362_v10  ;;  %v2387_v12 = vand.u32 2147483647, %v2362_v10  ;;  %vm2383_vm9 = vweird.f32 %v2362_v10 }
 0xdd4   :  { %v2390_v40 = vor.u32 1.1754944e-38, %v2389_v26  ;;  %vm2388_vm11 = vcmp.eq.f32.partialorder %v2387_v12, 8.507059e+37 }
 0xdd5   :  { %v4041_v11 = vpop.eup %4040 }
 0xdd6   :  { %v2364_v62 = vmul.f32 %v4041_v11, %v2361_v9  ;;  %vm2369_vm13 = vweird.f32 %v4041_v11 }
 0xdd7   :  { %vm2370_vm15 = vmor %vm2368_vm7, %vm2369_vm13 }
 0xdd8   :  { %v4043_v63 = vpop.eup %4042  ;;  %v2365_v30 = vsub.f32 1.0, %v2364_v62 }
 0xdd9   :  { %v2379_v14 = vmul.f32 %v4043_v63, %v2362_v10  ;;  %vm2384_vm0 = vweird.f32 %v4043_v63 }
 0xdda   :  { %v2366_v18 = vmul.f32 %v4041_v11, %v2365_v30  ;;  %vm2385_vm10 = vmor %vm2383_vm9, %vm2384_vm0  ;;  %v2437_v30 = vld [vmem:[#allocation3 + $0x38] sm:$0xf] }
 0xddb   :  { %v2380_v21 = vsub.f32 1.0, %v2379_v14 }
 0xddc   :  { %v2367_v22 = vadd.f32 %v4041_v11, %v2366_v18 }
 0xddd   :  { %v2381_v5 = vmul.f32 %v4043_v63, %v2380_v21 }
 0xdde   :  { %v2371_v35 = vsel %vm2370_vm15, %v4041_v11, %v2367_v22 }
 0xddf   :  { %v2376_v37 = vsel %vm2373_vm12, %v2375_v28, %v2371_v35  ;;  %v2382_v38 = vadd.f32 %v4043_v63, %v2381_v5 }
 0xde0   :  { %v2402_v58 = vmul.f32 %v2400_v36, %v2376_v37 }
 0xde1   :  { %v2386_v0 = vsel %vm2385_vm10, %v4043_v63, %v2382_v38 }
 0xde2   :  { %v2391_v24 = vsel %vm2388_vm11, %v2390_v40, %v2386_v0 }
 0xde3   :  { %v2394_v31 = vmul.f32 2.0, %v2391_v24 }
 0xde5   :  { %v3786_v2 = vadd.f32 -1.0, %v2394_v31 }
 0xde7   :  { %v2398_v8 = vsel %vm1101_vm3, %v3786_v2, %v2391_v24 }
 0xde8   :  { %v2403_v23 = vmul.f32 %v2398_v8, %v2376_v37 }
 0xdea   :  { %2405 = vrot.lane.b32.xlu0 %v2403_v23, %s4246_s5 }
 0xe5c   :  { %v2406_v29 = vpop.permute.xlu0 %2405 }
 0xe5d   :  { %v2408_v41 = vadd.f32 %v2406_v29, %v2402_v58 }
 0xe5f   :  { %4044 = vtanh.f32 %v2408_v41  ;;  %v2412_v47 = vrot.slane %v2408_v41, 4 }
 0xe61   :  { %2413 = vrot.lane.b32.xlu0 %v2412_v47, %s4246_s5 }
 0xe65   :  { %v4045_v6 = vpop.eup %4044 }
 0xe66   :  { %v2410_v50 = vmul.f32 %v4045_v6, %v2398_v8 }
 0xe68   :  { %v2421_v52 = vrot.slane %v2410_v50, 4 }
 0xe6a   :  { %2422 = vrot.lane.b32.xlu1 %v2421_v52, %s4246_s5 }
 0xe72   :  { %2416 = vrot.lane.b32.xlu1 %v2304_v20, %s4246_s5 }
 0xed3   :  { %v2414_v11 = vpop.permute.xlu0 %2413 }
 0xedc   :  { %v4996_v9 = vpop.permute.xlu1 %2422 }
 0xedd   :  { %v2429_v7 = vsel %vm1086_vm4, %v4996_v9, %v2427_v1  ;;  %v2430_v48 = vsel %vm1086_vm4, %v4996_v9, 0.0 }
 0xede   :  { %2533 = vrot.lane.b32.xlu1 %v2429_v7, %s4246_s5  ;;  %v2438_v10 = vpack.c.bf16 %v2429_v7, %v2429_v7 }
 0xee0   :  { %3787 = vmatmul.msk.bf16.vlgmr.msra.gmra.mxu0 %vm1154_vm14, %v2438_v10  ;;  %3788 = vmatmul.msk.bf16.vlgmr.msra.gmra.mxu1 %vm1154_vm14, %v2438_v10 }
 0xee1   :  { %2908 = vmatpush.bf16.msra.mxu0 %v4827_v59  ;;  %2921 = vmatpush.bf16.msra.mxu1 %v4829_v49  ;;  %v2436_v59 = vld [vmem:[#allocation3 + $0x10] sm:$0xf] }
 0xee4   :  { %v2417_v62 = vpop.permute.xlu1 %2416 }
 0xee5   :  { %v2419_v63 = vsel %vm1086_vm4, %v2414_v11, %v2417_v62  ;;  %2909 = vmatpush.bf16.msra.mxu0 %v4835_v4  ;;  %2922 = vmatpush.bf16.msra.mxu1 %v4837_v56 }
 0xee6   :  { %2519 = vrot.lane.b32.xlu2 %v2419_v63, %s4246_s5 }
 0xee9   :  { %2910 = vmatpush.bf16.msra.mxu0 %v4843_v61  ;;  %2923 = vmatpush.bf16.msra.mxu1 %v4845_v32 }
 0xeed   :  { %2911 = vmatpush.bf16.msra.mxu0 %v4848_v15  ;;  %2924 = vmatpush.bf16.msra.mxu1 %v4852_v16 }
 0xf40   :  { %v2520_v10 = vpop.permute.xlu2 %2519 }
 0xf5d   :  { %v2451_v49 = vpop.f32.mrf.mxu0  ;;  %v2464_v13 = vpop.f32.mrf.mxu1 }
 0xf5e   :  { %v2468_v14 = vadd.f32 %v2451_v49, %v2436_v59  ;;  %v2469_v18 = vadd.f32 %v2464_v13, %v2437_v30  ;;  %v2534_v30 = vpop.permute.xlu1 %2533 }
 0xf60   :  { %v3789_v19 = vmul.f32 -1.442695, %v2468_v14  ;;  %v2471_v4 = vmul.f32 2.0, %v2469_v18 }
 0xf62   :  { %4046 = vpow2.f32 %v3789_v19  ;;  %v2473_v56 = vsel %vm1101_vm3, %v2471_v4, %v2469_v18 }
 0xf63   :  { %v3790_v20 = vmul.f32 -1.442695, %v2473_v56 }
 0xf65   :  { %4048 = vpow2.f32 %v3790_v20  ;;  %v2453_v61 = vpop.f32.mrf.mxu0  ;;  %v2466_v32 = vpop.f32.mrf.mxu1 }
 0xf66   :  { %v2539_v61 = vld [vmem:[#allocation3 + $0x8] sm:$0xf0] }
 0xf67   :  { %v2540_v32 = vld [vmem:[#allocation3 + $0x48] sm:$0xf0] }
 0xf68   :  { %v4047_v21 = vpop.eup %4046 }
 0xf69   :  { %v2480_v15 = vadd.f32 1.0, %v4047_v21 }
 0xf6b   :  { %v4049_v22 = vpop.eup %4048  ;;  %4050 = vrcp.f32 %v2480_v15  ;;  %v2493_v2 = vand.u32 2147483648, %v2480_v15  ;;  %vm2487_vm9 = vweird.f32 %v2480_v15  ;;  %v2491_v23 = vand.u32 2147483647, %v2480_v15 }
 0xf6c   :  { %v2481_v16 = vadd.f32 1.0, %v4049_v22 }
 0xf6d   :  { %v2494_v6 = vor.u32 1.1754944e-38, %v2493_v2  ;;  %vm2492_vm11 = vcmp.eq.f32.partialorder %v2491_v23, 8.507059e+37 }
 0xf6e   :  { %4052 = vrcp.f32 %v2481_v16  ;;  %v2508_v38 = vand.u32 2147483648, %v2481_v16  ;;  %v2506_v58 = vand.u32 2147483647, %v2481_v16  ;;  %vm2502_vm7 = vweird.f32 %v2481_v16 }
 0xf70   :  { %v2509_v31 = vor.u32 1.1754944e-38, %v2508_v38  ;;  %vm2507_vm12 = vcmp.eq.f32.partialorder %v2506_v58, 8.507059e+37 }
 0xf71   :  { %v4051_v26 = vpop.eup %4050 }
 0xf72   :  { %v2483_v28 = vmul.f32 %v4051_v26, %v2480_v15  ;;  %vm2488_vm15 = vweird.f32 %v4051_v26 }
 0xf73   :  { %vm2489_vm10 = vmor %vm2487_vm9, %vm2488_vm15 }
 0xf74   :  { %v4053_v5 = vpop.eup %4052  ;;  %v2484_v12 = vsub.f32 1.0, %v2483_v28 }
 0xf75   :  { %v2498_v35 = vmul.f32 %v4053_v5, %v2481_v16  ;;  %vm2503_vm13 = vweird.f32 %v4053_v5 }
 0xf76   :  { %v2485_v37 = vmul.f32 %v4051_v26, %v2484_v12  ;;  %vm2504_vm0 = vmor %vm2502_vm7, %vm2503_vm13 }
 0xf77   :  { %v2499_v36 = vsub.f32 1.0, %v2498_v35 }
 0xf78   :  { %v2486_v24 = vadd.f32 %v4051_v26, %v2485_v37 }
 0xf79   :  { %v2500_v40 = vmul.f32 %v4053_v5, %v2499_v36 }
 0xf7a   :  { %v2490_v47 = vsel %vm2489_vm10, %v4051_v26, %v2486_v24 }
 0xf7b   :  { %v2501_v0 = vadd.f32 %v4053_v5, %v2500_v40  ;;  %v2495_v52 = vsel %vm2492_vm11, %v2494_v6, %v2490_v47 }
 0xf7c   :  { %v2522_v11 = vmul.f32 %v2520_v10, %v2495_v52 }
 0xf7d   :  { %v2505_v8 = vsel %vm2504_vm0, %v4053_v5, %v2501_v0 }
 0xf7e   :  { %v2510_v29 = vsel %vm2507_vm12, %v2509_v31, %v2505_v8 }
 0xf7f   :  { %v2513_v41 = vmul.f32 2.0, %v2510_v29 }
 0xf81   :  { %v3792_v50 = vadd.f32 -1.0, %v2513_v41 }
 0xf83   :  { %v2517_v1 = vsel %vm1101_vm3, %v3792_v50, %v2510_v29 }
 0xf84   :  { %v2523_v7 = vmul.f32 %v2517_v1, %v2495_v52 }
 0xf86   :  { %2525 = vrot.lane.b32.xlu0 %v2523_v7, %s4246_s5 }
 0xff8   :  { %v2526_v62 = vpop.permute.xlu0 %2525 }
 0xff9   :  { %v2528_v63 = vadd.f32 %v2526_v62, %v2522_v11 }
 0xffb   :  { %4054 = vtanh.f32 %v2528_v63  ;;  %v2531_v29 = vsel %vm1082_vm1, %v2528_v63, %v2520_v10 }
 0xffc   :  { %v2631_v11 = vrot.slane %v2531_v29, 4 }
0x1001   :  { %v4055_v59 = vpop.eup %4054 }
0x1002   :  { %v5020_v49 = vmul.f32 %v4055_v59, %v2517_v1 }
0x1004   :  { %v2536_v13 = vsel %vm1082_vm1, %v5020_v49, %v2534_v30 }
0x1005   :  { %v2541_v14 = vpack.c.bf16 %v2536_v13, %v2536_v13 }
0x1007   :  { %2543 = vrot.lane.b32.xlu2 %v2541_v14, %s4246_s5 }
0x100f   :  { %2657 = vrot.lane.b32.xlu2 %v2536_v13, %s4246_s5 }
0x1061   :  { %v2544_v18 = vpop.permute.xlu2 %2543 }
0x1062   :  { %3793 = vmatmul.msk.bf16.vlgmr.msra.gmra.mxu3 %vm1154_vm14, %v2544_v18  ;;  %3794 = vmatmul.msk.bf16.vlgmr.msra.gmra.mxu2 %vm1154_vm14, %v2544_v18 }
0x10e5   :  { %v2557_v19 = vpop.f32.mrf.mxu3  ;;  %v2570_v4 = vpop.f32.mrf.mxu2 }
0x10e6   :  { %v2576_v56 = vrot.slane %v2557_v19, 4  ;;  %v2577_v20 = vrot.slane %v2570_v4, 4 }
0x10e8   :  { %v2580_v21 = vadd.f32 %v2576_v56, %v2539_v61  ;;  %v2581_v15 = vadd.f32 %v2577_v20, %v2540_v32 }
0x10ea   :  { %v3795_v22 = vmul.f32 -1.442695, %v2580_v21  ;;  %v2583_v16 = vmul.f32 2.0, %v2581_v15 }
0x10ec   :  { %4056 = vpow2.f32 %v3795_v22  ;;  %v2585_v26 = vsel %vm1101_vm3, %v2583_v16, %v2581_v15  ;;  %v2658_v22 = vpop.permute.xlu2 %2657 }
0x10ed   :  { %v3796_v28 = vmul.f32 -1.442695, %v2585_v26  ;;  %v2559_v5 = vpop.f32.mrf.mxu3  ;;  %v2572_v12 = vpop.f32.mrf.mxu2 }
0x10ef   :  { %4058 = vpow2.f32 %v3796_v28 }
0x10f2   :  { %v4057_v35 = vpop.eup %4056 }
0x10f3   :  { %v2592_v36 = vadd.f32 1.0, %v4057_v35 }
0x10f5   :  { %v4059_v37 = vpop.eup %4058  ;;  %4060 = vrcp.f32 %v2592_v36  ;;  %v2605_v31 = vand.u32 2147483648, %v2592_v36  ;;  %v2603_v23 = vand.u32 2147483647, %v2592_v36  ;;  %vm2599_vm7 = vweird.f32 %v2592_v36 }
0x10f6   :  { %v2593_v38 = vadd.f32 1.0, %v4059_v37 }
0x10f7   :  { %v2606_v50 = vor.u32 1.1754944e-38, %v2605_v31  ;;  %vm2604_vm12 = vcmp.eq.f32.partialorder %v2603_v23, 8.507059e+37 }
0x10f8   :  { %4062 = vrcp.f32 %v2593_v38  ;;  %v2620_v6 = vand.u32 2147483648, %v2593_v38  ;;  %v2618_v1 = vand.u32 2147483647, %v2593_v38  ;;  %vm2614_vm9 = vweird.f32 %v2593_v38 }
0x10fa   :  { %v2621_v30 = vor.u32 1.1754944e-38, %v2620_v6  ;;  %vm2619_vm11 = vcmp.eq.f32.partialorder %v2618_v1, 8.507059e+37 }
0x10fb   :  { %v4061_v40 = vpop.eup %4060 }
0x10fc   :  { %v2595_v58 = vmul.f32 %v4061_v40, %v2592_v36  ;;  %vm2600_vm13 = vweird.f32 %v4061_v40  ;;  %v2667_v36 = vld [vmem:[#allocation3 + $0x8] sm:$0xf] }
0x10fd   :  { %vm2601_vm15 = vmor %vm2599_vm7, %vm2600_vm13 }
0x10fe   :  { %v4063_v0 = vpop.eup %4062  ;;  %v2596_v24 = vsub.f32 1.0, %v2595_v58 }
0x10ff   :  { %v2610_v2 = vmul.f32 %v4063_v0, %v2593_v38  ;;  %vm2615_vm0 = vweird.f32 %v4063_v0  ;;  %v2668_v38 = vld [vmem:[#allocation3 + $0x48] sm:$0xf] }
0x1100   :  { %v2597_v8 = vmul.f32 %v4061_v40, %v2596_v24  ;;  %vm2616_vm10 = vmor %vm2614_vm9, %vm2615_vm0 }
0x1101   :  { %v2611_v41 = vsub.f32 1.0, %v2610_v2 }
0x1102   :  { %v2598_v47 = vadd.f32 %v4061_v40, %v2597_v8 }
0x1103   :  { %v2612_v52 = vmul.f32 %v4063_v0, %v2611_v41 }
0x1104   :  { %v2602_v7 = vsel %vm2601_vm15, %v4061_v40, %v2598_v47 }
0x1105   :  { %v2607_v62 = vsel %vm2604_vm12, %v2606_v50, %v2602_v7  ;;  %v2613_v59 = vadd.f32 %v4063_v0, %v2612_v52 }
0x1106   :  { %v2633_v13 = vmul.f32 %v2631_v11, %v2607_v62 }
0x1107   :  { %v2617_v14 = vsel %vm2616_vm10, %v4063_v0, %v2613_v59 }
0x1108   :  { %v2622_v10 = vsel %vm2619_vm11, %v2621_v30, %v2617_v14 }
0x1109   :  { %v2625_v63 = vmul.f32 2.0, %v2622_v10 }
0x110b   :  { %v3798_v18 = vadd.f32 -1.0, %v2625_v63 }
0x110d   :  { %v2629_v19 = vsel %vm1101_vm3, %v3798_v18, %v2622_v10 }
0x110e   :  { %v2634_v4 = vmul.f32 %v2629_v19, %v2607_v62 }
0x1110   :  { %2636 = vrot.lane.b32.xlu0 %v2634_v4, %s4246_s5 }
0x1182   :  { %v2637_v56 = vpop.permute.xlu0 %2636 }
0x1183   :  { %v2639_v20 = vadd.f32 %v2637_v56, %v2633_v13 }
0x1185   :  { %4064 = vtanh.f32 %v2639_v20  ;;  %v2643_v61 = vrot.slane %v2639_v20, 4 }
0x1187   :  { %2644 = vrot.lane.b32.xlu0 %v2643_v61, %s4246_s5 }
0x118b   :  { %v4065_v32 = vpop.eup %4064 }
0x118c   :  { %v2641_v21 = vmul.f32 %v4065_v32, %v2629_v19 }
0x118e   :  { %v2652_v15 = vrot.slane %v2641_v21, 4 }
0x1190   :  { %2653 = vrot.lane.b32.xlu1 %v2652_v15, %s4246_s5 }
0x1198   :  { %2647 = vrot.lane.b32.xlu1 %v2531_v29, %s4246_s5 }
0x11f9   :  { %v2645_v5 = vpop.permute.xlu0 %2644 }
0x1202   :  { %v5039_v16 = vpop.permute.xlu1 %2653 }
0x1203   :  { %v2660_v26 = vsel %vm1078_vm2, %v5039_v16, %v2658_v22 }
0x1204   :  { %2764 = vrot.lane.b32.xlu1 %v2660_v26, %s4246_s5  ;;  %v2669_v28 = vpack.c.bf16 %v2660_v26, %v2660_v26 }
0x1206   :  { %3799 = vmatmul.msk.bf16.vlgmr.msrb.gmra.mxu0 %vm1154_vm14, %v2669_v28  ;;  %3800 = vmatmul.msk.bf16.vlgmr.msrb.gmra.mxu1 %vm1154_vm14, %v2669_v28 }
0x120a   :  { %v2648_v12 = vpop.permute.xlu1 %2647 }
0x120b   :  { %v2650_v35 = vsel %vm1078_vm2, %v2645_v5, %v2648_v12  ;;  %v1978_v12 = vrot.slane %v4950_v3, 4 }
0x120c   :  { %2750 = vrot.lane.b32.xlu2 %v2650_v35, %s4246_s5  ;;  %v1941_v35 = vld [vmem:[#allocation3 + $0x70] sm:$0xf0] }
0x1283   :  { %v2682_v37 = vpop.f32.mrf.mxu0  ;;  %v2695_v40 = vpop.f32.mrf.mxu1 }
0x1284   :  { %v2699_v58 = vadd.f32 %v2682_v37, %v2667_v36  ;;  %v2700_v0 = vadd.f32 %v2695_v40, %v2668_v38  ;;  %v1982_v36 = vadd.f32 %v1978_v12, %v1941_v35 }
0x1286   :  { %v3801_v24 = vmul.f32 -1.442695, %v2699_v58  ;;  %v2702_v31 = vmul.f32 2.0, %v2700_v0  ;;  %v1984_v37 = vmul.f32 2.0, %v1982_v36 }
0x1288   :  { %4066 = vpow2.f32 %v3801_v24  ;;  %v2704_v2 = vsel %vm1101_vm3, %v2702_v31, %v2700_v0  ;;  %v1986_v38 = vsel %vm1101_vm3, %v1984_v37, %v1982_v36 }
0x1289   :  { %v3802_v8 = vmul.f32 -1.442695, %v2704_v2  ;;  %v3736_v40 = vmul.f32 -1.442695, %v1986_v38  ;;  %v5058_v2 = vpop.permute.xlu2 %2750 }
0x128b   :  { %4068 = vpow2.f32 %v3802_v8  ;;  %v2684_v23 = vpop.f32.mrf.mxu0  ;;  %v2697_v29 = vpop.f32.mrf.mxu1 }
0x128e   :  { %v4067_v41 = vpop.eup %4066 }
0x128f   :  { %v2711_v47 = vadd.f32 1.0, %v4067_v41 }
0x1291   :  { %v4069_v6 = vpop.eup %4068  ;;  %4070 = vrcp.f32 %v2711_v47  ;;  %v2724_v4 = vand.u32 2147483648, %v2711_v47  ;;  %vm2718_vm9 = vweird.f32 %v2711_v47  ;;  %v2722_v20 = vand.u32 2147483647, %v2711_v47 }
0x1292   :  { %v2712_v50 = vadd.f32 1.0, %v4069_v6 }
0x1293   :  { %v2725_v15 = vor.u32 1.1754944e-38, %v2724_v4  ;;  %vm2723_vm11 = vcmp.eq.f32.partialorder %v2722_v20, 8.507059e+37 }
0x1294   :  { %4072 = vrcp.f32 %v2712_v50  ;;  %v2739_v13 = vand.u32 2147483648, %v2712_v50  ;;  %v2737_v10 = vand.u32 2147483647, %v2712_v50  ;;  %vm2733_vm7 = vweird.f32 %v2712_v50 }
0x1295   :  { %4074 = vpow2.f32 %v3736_v40 }
0x1296   :  { %v2740_v19 = vor.u32 1.1754944e-38, %v2739_v13  ;;  %vm2738_vm12 = vcmp.eq.f32.partialorder %v2737_v10, 8.507059e+37 }
0x1297   :  { %v4071_v52 = vpop.eup %4070 }
0x1298   :  { %v2714_v1 = vmul.f32 %v4071_v52, %v2711_v47  ;;  %vm2719_vm15 = vweird.f32 %v4071_v52 }
0x1299   :  { %vm2720_vm10 = vmor %vm2718_vm9, %vm2719_vm15 }
0x129a   :  { %v4073_v7 = vpop.eup %4072  ;;  %v2715_v11 = vsub.f32 1.0, %v2714_v1 }
0x129b   :  { %v2729_v62 = vmul.f32 %v4073_v7, %v2712_v50  ;;  %vm2734_vm13 = vweird.f32 %v4073_v7  ;;  %v4075_v58 = vpop.eup %4074 }
0x129c   :  { %v2716_v30 = vmul.f32 %v4071_v52, %v2715_v11  ;;  %vm2735_vm0 = vmor %vm2733_vm7, %vm2734_vm13  ;;  %v1994_v0 = vadd.f32 1.0, %v4075_v58 }
0x129d   :  { %v2730_v59 = vsub.f32 1.0, %v2729_v62 }
0x129e   :  { %v2717_v18 = vadd.f32 %v4071_v52, %v2716_v30  ;;  %4076 = vrcp.f32 %v1994_v0  ;;  %v2021_v50 = vand.u32 2147483648, %v1994_v0  ;;  %vm2015_vm7 = vweird.f32 %v1994_v0 }
0x129f   :  { %v2731_v14 = vmul.f32 %v4073_v7, %v2730_v59  ;;  %v2019_v1 = vand.u32 2147483647, %v1994_v0 }
0x12a0   :  { %v2721_v21 = vsel %vm2720_vm10, %v4071_v52, %v2717_v18  ;;  %v2022_v30 = vor.u32 1.1754944e-38, %v2021_v50 }
0x12a1   :  { %v2732_v63 = vadd.f32 %v4073_v7, %v2731_v14  ;;  %v2726_v26 = vsel %vm2723_vm11, %v2725_v15, %v2721_v21  ;;  %v2771_v21 = vld [vmem:[#allocation3 + $0x18] sm:$0xf0] }
0x12a2   :  { %v2753_v8 = vmul.f32 %v5058_v2, %v2726_v26 }
0x12a3   :  { %v2736_v56 = vsel %vm2735_vm0, %v4073_v7, %v2732_v63  ;;  %v2765_v7 = vpop.permute.xlu1 %2764  ;;  %vm2020_vm0 = vcmp.eq.f32.partialorder %v2019_v1, 8.507059e+37 }
0x12a4   :  { %v2741_v61 = vsel %vm2738_vm12, %v2740_v19, %v2736_v56  ;;  %v4077_v24 = vpop.eup %4076 }
0x12a5   :  { %v2744_v32 = vmul.f32 2.0, %v2741_v61  ;;  %v2011_v31 = vmul.f32 %v4077_v24, %v1994_v0  ;;  %vm2016_vm13 = vweird.f32 %v4077_v24 }
0x12a6   :  { %vm2017_vm15 = vmor %vm2015_vm7, %vm2016_vm13 }
0x12a7   :  { %v3804_v22 = vadd.f32 -1.0, %v2744_v32  ;;  %v2012_v29 = vsub.f32 1.0, %v2011_v31  ;;  %v2770_v32 = vld [vmem:[#allocation3 + $0x58] sm:$0xf0] }
0x12a9   :  { %v2748_v28 = vsel %vm1101_vm3, %v3804_v22, %v2741_v61  ;;  %v2013_v41 = vmul.f32 %v4077_v24, %v2012_v29 }
0x12aa   :  { %v2754_v5 = vmul.f32 %v2748_v28, %v2726_v26 }
0x12ab   :  { %v2014_v47 = vadd.f32 %v4077_v24, %v2013_v41 }
0x12ac   :  { %2756 = vrot.lane.b32.xlu0 %v2754_v5, %s4246_s5 }
0x12ad   :  { %v2018_v62 = vsel %vm2017_vm15, %v4077_v24, %v2014_v47 }
0x12ae   :  { %v2023_v13 = vsel %vm2020_vm0, %v2022_v30, %v2018_v62 }
0x12af   :  { %v2026_v14 = vmul.f32 2.0, %v2023_v13 }
0x12b1   :  { %v3738_v10 = vadd.f32 -1.0, %v2026_v14 }
0x12b3   :  { %v5070_v63 = vsel %vm1101_vm3, %v3738_v10, %v2023_v13 }
0x12b4   :  { %v2035_v18 = vmul.f32 %v5070_v63, %v4958_v57 }
0x131e   :  { %v2757_v23 = vpop.permute.xlu0 %2756 }
0x131f   :  { %v2759_v3 = vadd.f32 %v2757_v23, %v2753_v8 }
0x1321   :  { %4078 = vtanh.f32 %v2759_v3  ;;  %v2762_v47 = vsel %vm1074_vm5, %v2759_v3, %v5058_v2 }
0x1322   :  { %v2862_v30 = vrot.slane %v2762_v47, 4 }
0x1327   :  { %v4079_v6 = vpop.eup %4078 }
0x1328   :  { %v5061_v52 = vmul.f32 %v4079_v6, %v2748_v28 }
0x132a   :  { %v2767_v11 = vsel %vm1074_vm5, %v5061_v52, %v2765_v7 }
0x132b   :  { %v2772_v59 = vpack.c.bf16 %v2767_v11, %v2767_v11 }
0x132d   :  { %2774 = vrot.lane.b32.xlu2 %v2772_v59, %s4246_s5 }
0x1335   :  { %2888 = vrot.lane.b32.xlu2 %v2767_v11, %s4246_s5 }
0x133d   :  { %2037 = vrot.lane.b32.xlu2 %v2035_v18, %s4246_s5 }
0x1387   :  { %v2775_v19 = vpop.permute.xlu2 %2774 }
0x1388   :  { %3805 = vmatmul.msk.bf16.vlgmr.msrb.gmra.mxu3 %vm1154_vm14, %v2775_v19  ;;  %3806 = vmatmul.msk.bf16.vlgmr.msrb.gmra.mxu2 %vm1154_vm14, %v2775_v19 }
0x140b   :  { %v2788_v4 = vpop.f32.mrf.mxu3  ;;  %v2801_v56 = vpop.f32.mrf.mxu2 }
0x140c   :  { %v2807_v20 = vrot.slane %v2788_v4, 4  ;;  %v2808_v61 = vrot.slane %v2801_v56, 4 }
0x140e   :  { %v2811_v15 = vadd.f32 %v2807_v20, %v2770_v32  ;;  %v2812_v22 = vadd.f32 %v2808_v61, %v2771_v21 }
0x1410   :  { %v3807_v26 = vmul.f32 -1.442695, %v2811_v15  ;;  %v2814_v28 = vmul.f32 2.0, %v2812_v22 }
0x1412   :  { %4080 = vpow2.f32 %v3807_v26  ;;  %v2816_v57 = vsel %vm1101_vm3, %v2814_v28, %v2812_v22  ;;  %v2889_v28 = vpop.permute.xlu2 %2888 }
0x1413   :  { %v3808_v5 = vmul.f32 -1.442695, %v2816_v57  ;;  %v2790_v12 = vpop.f32.mrf.mxu3  ;;  %v2803_v35 = vpop.f32.mrf.mxu2 }
0x1415   :  { %4082 = vpow2.f32 %v3808_v5 }
0x1418   :  { %v4081_v36 = vpop.eup %4080 }
0x1419   :  { %v2823_v37 = vadd.f32 1.0, %v4081_v36 }
0x141b   :  { %v4083_v38 = vpop.eup %4082  ;;  %4084 = vrcp.f32 %v2823_v37  ;;  %v2836_v8 = vand.u32 2147483648, %v2823_v37  ;;  %v2834_v41 = vand.u32 2147483647, %v2823_v37  ;;  %vm2830_vm9 = vweird.f32 %v2823_v37 }
0x141c   :  { %v2824_v40 = vadd.f32 1.0, %v4083_v38  ;;  %v1703_v38 = vsel %vm1082_vm1, %v4796_v55, 0.0  ;;  %v5114_v55 = vpop.permute.xlu2 %2037 }
0x141d   :  { %v2837_v7 = vor.u32 1.1754944e-38, %v2836_v8  ;;  %vm2835_vm13 = vcmp.eq.f32.partialorder %v2834_v41, 8.507059e+37  ;;  %v2898_v8 = vld [vmem:[#allocation3 + $0x58] sm:$0xf] }
0x141e   :  { %4086 = vrcp.f32 %v2824_v40  ;;  %v2851_v1 = vand.u32 2147483648, %v2824_v40  ;;  %v2849_v62 = vand.u32 2147483647, %v2824_v40  ;;  %vm2845_vm7 = vweird.f32 %v2824_v40 }
0x1420   :  { %v2852_v10 = vor.u32 1.1754944e-38, %v2851_v1  ;;  %vm2850_vm0 = vcmp.eq.f32.partialorder %v2849_v62, 8.507059e+37  ;;  %v2768_v1 = vsel %vm1074_vm5, %v5061_v52, 0.0 }
0x1421   :  { %v4085_v58 = vpop.eup %4084 }
0x1422   :  { %v2826_v0 = vmul.f32 %v4085_v58, %v2823_v37  ;;  %vm2831_vm12 = vweird.f32 %v4085_v58 }
0x1423   :  { %vm2832_vm10 = vmor %vm2830_vm9, %vm2831_vm12 }
0x1424   :  { %v4087_v24 = vpop.eup %4086  ;;  %v2827_v31 = vsub.f32 1.0, %v2826_v0  ;;  %v1472_v0 = vsel %vm1074_vm5, %v4740_v51, 0.0  ;;  %v2537_v51 = vsel %vm1082_vm1, %v5020_v49, 0.0 }
0x1425   :  { %v2841_v23 = vmul.f32 %v4087_v24, %v2824_v40  ;;  %vm2846_vm11 = vweird.f32 %v4087_v24 }
0x1426   :  { %v2828_v29 = vmul.f32 %v4085_v58, %v2827_v31  ;;  %vm2847_vm15 = vmor %vm2845_vm7, %vm2846_vm11 }
0x1427   :  { %v2842_v6 = vsub.f32 1.0, %v2841_v23 }
0x1428   :  { %v2829_v50 = vadd.f32 %v4085_v58, %v2828_v29  ;;  %v2899_v29 = vld [vmem:[#allocation3 + $0x18] sm:$0xf] }
0x1429   :  { %v2843_v11 = vmul.f32 %v4087_v24, %v2842_v6 }
0x142a   :  { %v2833_v59 = vsel %vm2832_vm10, %v4085_v58, %v2829_v50  ;;  %v1934_v58 = vsel %vm1090_vm6, %v4912_v27, 0.0 }
0x142b   :  { %v2838_v13 = vsel %vm2835_vm13, %v2837_v7, %v2833_v59  ;;  %v2844_v14 = vadd.f32 %v4087_v24, %v2843_v11 }
0x142c   :  { %v2864_v18 = vmul.f32 %v2862_v30, %v2838_v13 }
0x142d   :  { %v2848_v19 = vsel %vm2847_vm15, %v4087_v24, %v2844_v14 }
0x142e   :  { %v2853_v2 = vsel %vm2850_vm0, %v2852_v10, %v2848_v19 }
0x142f   :  { %v2856_v3 = vmul.f32 2.0, %v2853_v2 }
0x1431   :  { %v3810_v4 = vadd.f32 -1.0, %v2856_v3 }
0x1433   :  { %v2860_v56 = vsel %vm1101_vm3, %v3810_v4, %v2853_v2 }
0x1434   :  { %v2865_v20 = vmul.f32 %v2860_v56, %v2838_v13 }
0x1436   :  { %2867 = vrot.lane.b32.xlu0 %v2865_v20, %s4246_s5  ;;  %v3013_v20 = vld [vmem:[#allocation12 + $0x70] sm:$0xff] }
0x14a8   :  { %v2868_v61 = vpop.permute.xlu0 %2867 }
0x14a9   :  { %v2870_v32 = vadd.f32 %v2868_v61, %v2864_v18 }
0x14ab   :  { %4088 = vtanh.f32 %v2870_v32  ;;  %v2874_v21 = vrot.slane %v2870_v32, 4 }
0x14ad   :  { %2875 = vrot.lane.b32.xlu0 %v2874_v21, %s4246_s5 }
0x14b1   :  { %v4089_v15 = vpop.eup %4088 }
0x14b2   :  { %v2872_v22 = vmul.f32 %v4089_v15, %v2860_v56  ;;  %v3014_v56 = vld [vmem:[#allocation12 + $0x78] sm:$0xff]  ;;  %v3012_v15 = vld [vmem:[#allocation12 + $0x68] sm:$0xff] }
0x14b3   :  { %3016 = vmatpush.msra.mxu3 %v3014_v56 }
0x14b4   :  { %v2883_v26 = vrot.slane %v2872_v22, 4 }
0x14b5   :  { %3017 = vmatpush.msra.mxu3 %v3013_v20 }
0x14b6   :  { %2884 = vrot.lane.b32.xlu1 %v2883_v26, %s4246_s5 }
0x14b7   :  { %3018 = vmatpush.msra.mxu3 %v3012_v15 }
0x14be   :  { %2878 = vrot.lane.b32.xlu1 %v2762_v47, %s4246_s5 }
0x151f   :  { %v2876_v36 = vpop.permute.xlu0 %2875 }
0x1528   :  { %v2885_v57 = vpop.permute.xlu1 %2884 }
0x1529   :  { %v2891_v5 = vsel %vm1070_vm8, %v2885_v57, %v2889_v28  ;;  %v2892_v12 = vsel %vm1070_vm8, %v2885_v57, 0.0 }
0x152a   :  { %v2900_v35 = vpack.c.bf16 %v2891_v5, %v2891_v5  ;;  %2894 = vrot.lane.b32.xlu2 %v2892_v12, %s4246_s5  ;;  %v3011_v5 = vld [vmem:[#allocation12 + $0x60] sm:$0xff] }
0x152b   :  { %3019 = vmatpush.msra.mxu3 %v3011_v5 }
0x152c   :  { %3811 = vmatmul.msk.bf16.vlgmr.msra.gmra.mxu0 %vm1154_vm14, %v2900_v35  ;;  %3812 = vmatmul.msk.bf16.vlgmr.msra.gmra.mxu1 %vm1154_vm14, %v2900_v35  ;;  %vm2207_vm14 = vcmask 1043968  }
0x1530   :  { %v2879_v37 = vpop.permute.xlu1 %2878 }
0x1531   :  { %v2881_v40 = vsel %vm1070_vm8, %v2876_v36, %v2879_v37  ;;  %vm5273_vm8 = vcmask 519168   ;;  %v3010_v37 = vld [vmem:[#allocation12 + $0x58] sm:$0xff] }
0x1532   :  { %1705 = vrot.lane.b32.xlu2 %v1703_v38, %s4246_s5  ;;  %2981 = vrot.lane.b32.xlu0 %v2881_v40, %s4246_s5  ;;  %vm5274_vm4 = vmmov %vm5273_vm8 }
0x1533   :  { %vm5275_vm1 = vmmov %vm5274_vm4  ;;  %3020 = vmatpush.msra.mxu3 %v3010_v37 }
0x1534   :  { %vm5278_vm15 = vmmov %vm5275_vm1 }
0x153a   :  { %1936 = vrot.lane.b32.xlu2 %v1934_v58, %s4246_s5  ;;  %1474 = vrot.lane.b32.xlu0 %v1472_v0, %s4246_s5  ;;  %v3009_v0 = vld [vmem:[#allocation12 + $0x50] sm:$0xff] }
0x153b   :  { %3021 = vmatpush.msra.mxu3 %v3009_v0 }
0x1542   :  { %2432 = vrot.lane.b32.xlu0 %v2430_v48, %s4246_s5 }
0x1584   :  { %v2895_v24 = vpop.permute.xlu2 %2894 }
0x1585   :  { %2897 = vst.msk [vmem:[#allocation4 + $0x4] sm:$0xf] %vm2207_vm14, %v2895_v24 }
0x158c   :  { %v1706_v27 = vpop.permute.xlu2 %1705 }
0x158d   :  { %1708 = vst.msk [vmem:[#allocation4 + $0x10] sm:$0xf] %vm5273_vm8, %v1706_v27  ;;  %v2040_v27 = vadd.f32 %v5114_v55, %v4961_v53  ;;  %v3008_v53 = vld [vmem:[#allocation12 + $0x48] sm:$0xff]  ;;  %v3006_v55 = vld [vmem:[#allocation12 + $0x38] sm:$0xff] }
0x158e   :  { %2538 = vst.msk [vmem:[#allocation4 + $0x10] sm:$0xf] %vm2207_vm14, %v2537_v51  ;;  %3022 = vmatpush.msra.mxu3 %v3008_v53  ;;  %v3182_v53 = vld [vmem:[%s5266_s7 + $0xd8] sm:$0xff] }
0x1590   :  { %3023 = vmatpush.msra.mxu3 %v3007_v45  ;;  %v3165_v45 = vld [vmem:[%s5266_s7 + $0x50] sm:$0xff] }
0x1592   :  { %3024 = vmatpush.msra.mxu3 %v3006_v55 }
0x1594   :  { %v1937_v31 = vpop.permute.xlu2 %1936 }
0x1595   :  { %1939 = vst.msk [vmem:[#allocation4 + $0x18] sm:$0xf] %vm5274_vm4, %v1937_v31 }
0x1596   :  { %2307 = vst.msk [vmem:[#allocation4 + $0x18] sm:$0xf] %vm2207_vm14, %v2306_v17 }
0x15a4   :  { %v2982_v9 = vpop.permute.xlu0 %2981 }
0x15a9   :  { %v2913_v23 = vpop.f32.mrf.mxu0  ;;  %v2926_v41 = vpop.f32.mrf.mxu1 }
0x15aa   :  { %v2930_v46 = vadd.f32 %v2913_v23, %v2898_v8  ;;  %v2931_v49 = vadd.f32 %v2926_v41, %v2899_v29  ;;  %v3005_v29 = vld [vmem:[#allocation12 + $0x30] sm:$0xff]  ;;  %v3004_v41 = vld [vmem:[#allocation12 + $0x28] sm:$0xff] }
0x15ab   :  { %3025 = vmatpush.msra.mxu3 %v3005_v29 }
0x15ac   :  { %v3813_v47 = vmul.f32 -1.442695, %v2930_v46  ;;  %v2933_v6 = vmul.f32 2.0, %v2931_v49  ;;  %v1475_v50 = vpop.permute.xlu0 %1474  ;;  %v3003_v46 = vld [vmem:[#allocation12 + $0x20] sm:$0xff] }
0x15ad   :  { %1477 = vst.msk [vmem:[#allocation4 + $0x8] sm:$0xf] %vm5275_vm1, %v1475_v50  ;;  %3026 = vmatpush.msra.mxu3 %v3004_v41  ;;  %v3181_v41 = vld [vmem:[%s5266_s7 + $0xd0] sm:$0xff] }
0x15ae   :  { %4090 = vpow2.f32 %v3813_v47  ;;  %v2935_v25 = vsel %vm1101_vm3, %v2933_v6, %v2931_v49  ;;  %2769 = vst.msk [vmem:[#allocation4 + $0x8] sm:$0xf] %vm2207_vm14, %v2768_v1  ;;  %v2999_v49 = vld [vmem:[#allocation12] sm:$0xff] }
0x15af   :  { %v3814_v33 = vmul.f32 -1.442695, %v2935_v25  ;;  %3027 = vmatpush.msra.mxu3 %v3003_v46  ;;  %v3164_v46 = vld [vmem:[%s5266_s7 + $0x48] sm:$0xff] }
0x15b1   :  { %4092 = vpow2.f32 %v3814_v33  ;;  %v2915_v7 = vpop.f32.mrf.mxu0  ;;  %v2928_v11 = vpop.f32.mrf.mxu1  ;;  %3028 = vmatpush.msra.mxu3 %v3002_v54  ;;  %v3180_v54 = vld [vmem:[%s5266_s7 + $0xc8] sm:$0xff] }
0x15b4   :  { %v4091_v62 = vpop.eup %4090  ;;  %v2433_v59 = vpop.permute.xlu0 %2432 }
0x15b5   :  { %v2942_v30 = vadd.f32 1.0, %v4091_v62  ;;  %2435 = vst.msk [vmem:[#allocation4 + $0x14] sm:$0xf] %vm2207_vm14, %v2433_v59 }
0x15b7   :  { %v4093_v13 = vpop.eup %4092  ;;  %4094 = vrcp.f32 %v2942_v30  ;;  %v2955_v19 = vand.u32 2147483648, %v2942_v30  ;;  %v2953_v4 = vand.u32 2147483647, %v2942_v30  ;;  %vm2949_vm6 = vweird.f32 %v2942_v30 }
0x15b8   :  { %v2943_v43 = vadd.f32 1.0, %v4093_v13 }
0x15b9   :  { %v2956_v22 = vor.u32 1.1754944e-38, %v2955_v19  ;;  %vm2954_vm10 = vcmp.eq.f32.partialorder %v2953_v4, 8.507059e+37 }
0x15ba   :  { %4096 = vrcp.f32 %v2943_v43  ;;  %v2970_v21 = vand.u32 2147483648, %v2943_v43  ;;  %v2968_v28 = vand.u32 2147483647, %v2943_v43  ;;  %vm2964_vm11 = vweird.f32 %v2943_v43 }
0x15bb   :  { %4098 = vtanh.f32 %v2040_v27  ;;  %v3169_v27 = vld [vmem:[%s5266_s7 + $0x70] sm:$0xff] }
0x15bc   :  { %v2971_v36 = vor.u32 1.1754944e-38, %v2970_v21  ;;  %vm2969_vm7 = vcmp.eq.f32.partialorder %v2968_v28, 8.507059e+37 }
0x15bd   :  { %v4095_v52 = vpop.eup %4094 }
0x15be   :  { %v2945_v14 = vmul.f32 %v4095_v52, %v2942_v30  ;;  %vm2950_vm5 = vweird.f32 %v4095_v52  ;;  %v2997_v30 = vld [vmem:[#allocation4 + $0x10] sm:$0xff] }
0x15bf   :  { %vm2951_vm12 = vmor %vm2949_vm6, %vm2950_vm5  ;;  %vm3233_vm6 = vcmask 17408  }
0x15c0   :  { %v4097_v10 = vpop.eup %4096  ;;  %v2946_v18 = vsub.f32 1.0, %v2945_v14 }
0x15c1   :  { %v2960_v2 = vmul.f32 %v4097_v10, %v2943_v43  ;;  %vm2965_vm9 = vweird.f32 %v4097_v10  ;;  %v4099_v17 = vpop.eup %4098 }
0x15c2   :  { %v2947_v3 = vmul.f32 %v4095_v52, %v2946_v18  ;;  %vm2966_vm13 = vmor %vm2964_vm11, %vm2965_vm9  ;;  %v2042_v8 = vmul.f32 %v4099_v17, %v5070_v63  ;;  %v3000_v63 = vld [vmem:[#allocation12 + $0x8] sm:$0xff] }
0x15c3   :  { %v2961_v61 = vsub.f32 1.0, %v2960_v2  ;;  %v3184_v17 = vld [vmem:[%s5266_s7 + $0xe8] sm:$0xff] }
0x15c4   :  { %v2948_v32 = vadd.f32 %v4095_v52, %v2947_v3  ;;  %v2044_v23 = vrot.slane %v2042_v8, 4  ;;  %v3183_v8 = vld [vmem:[%s5266_s7 + $0xe0] sm:$0xff] }
0x15c5   :  { %v2962_v26 = vmul.f32 %v4097_v10, %v2961_v61 }
0x15c6   :  { %v2952_v57 = vsel %vm2951_vm12, %v4095_v52, %v2948_v32  ;;  %v3940_v52 = vld [vmem:[#allocation12 + $0x80] ss:$0 sm:$0xff] }
0x15c7   :  { %v2957_v12 = vsel %vm2954_vm10, %v2956_v22, %v2952_v57  ;;  %v2963_v35 = vadd.f32 %v4097_v10, %v2962_v26 }
0x15c8   :  { %v2984_v38 = vmul.f32 %v2982_v9, %v2957_v12  ;;  %v2661_v9 = vsel %vm1078_vm2, %v5039_v16, 0.0  ;;  %v3001_v16 = vld [vmem:[#allocation12 + $0x10] sm:$0xff]  ;;  %vm5277_vm2 = vcmp.ne.s32.totalorder %v4925_v42, 0 }
0x15c9   :  { %v2967_v40 = vsel %vm2966_vm13, %v4097_v10, %v2963_v35  ;;  %3029 = vmatpush.msra.mxu3 %v3001_v16  ;;  %v3076_v35 = vand.u32 3, %v4618_v44  ;;  %v3186_v44 = vld [vmem:[%s5266_s7 + $0xf8] sm:$0xff]  ;;  %v3163_v16 = vld [vmem:[%s5266_s7 + $0x40] sm:$0xff] }
0x15ca   :  { %v2972_v58 = vsel %vm2969_vm7, %v2971_v36, %v2967_v40  ;;  %3190 = vmatpush.msrb.mxu1 %v3186_v44 }
0x15cb   :  { %v2975_v48 = vmul.f32 2.0, %v2972_v58  ;;  %3030 = vmatpush.msra.mxu3 %v3000_v63  ;;  %v3179_v63 = vld [vmem:[%s5266_s7 + $0xc0] sm:$0xff] }
0x15cd   :  { %v3816_v24 = vadd.f32 -1.0, %v2975_v48  ;;  %3031 = vmatpush.msra.mxu3 %v2999_v49  ;;  %v4254_v48 = vmov 0.0   ;;  %v3162_v49 = vld [vmem:[%s5266_s7 + $0x38] sm:$0xff] }
0x15cf   :  { %v2979_v51 = vsel %vm1101_vm3, %v3816_v24, %v2972_v58  ;;  %vm5276_vm3 = vcmp.ne.s32.totalorder %v4644_v60, 0 }
0x15d0   :  { %v2985_v31 = vmul.f32 %v2979_v51, %v2957_v12  ;;  %v3071_v12 = vshrl.u32 %v95_v39, 7  ;;  %v3170_v39 = vld [vmem:[%s5266_s7 + $0x78] sm:$0xff] }
0x15d1   :  { %3210 = vmatpush.msra.mxu2 %v3170_v39 }
0x15d2   :  { %2987 = vrot.lane.b32.xlu1 %v2985_v31, %s4246_s5  ;;  %vm3084_vm0 = vcmp.eq.s32.totalorder %v3076_v35, %v3071_v12  ;;  %v3168_v31 = vld [vmem:[%s5266_s7 + $0x68] sm:$0xff] }
0x15d3   :  { %v3817_v24 = vsel %vm3084_vm0, 1.0, %v4254_v48  ;;  %3211 = vmatpush.msra.mxu2 %v3169_v27 }
0x15d5   :  { %3212 = vmatpush.msra.mxu2 %v3168_v31 }
0x15da   :  { %2663 = vrot.lane.b32.xlu1 %v2661_v9, %s4246_s5  ;;  %v3167_v9 = vld [vmem:[%s5266_s7 + $0x60] sm:$0xff] }
0x15db   :  { %3213 = vmatpush.msra.mxu2 %v3167_v9 }
0x15e2   :  { %2045 = vrot.lane.b32.xlu1 %v2044_v23, %s4246_s5  ;;  %v3166_v23 = vld [vmem:[%s5266_s7 + $0x58] sm:$0xff] }
0x15e3   :  { %3214 = vmatpush.msra.mxu2 %v3166_v23 }
0x15e5   :  { %3215 = vmatpush.msra.mxu2 %v3165_v45 }
0x15e7   :  { %3216 = vmatpush.msra.mxu2 %v3164_v46 }
0x15e9   :  { %3217 = vmatpush.msra.mxu2 %v3163_v16 }
0x15eb   :  { %3218 = vmatpush.msra.mxu2 %v3162_v49 }
0x1644   :  { %v2988_v47 = vpop.permute.xlu1 %2987 }
0x1645   :  { %v2990_v6 = vadd.f32 %v2988_v47, %v2984_v38  ;;  %v3178_v47 = vld [vmem:[%s5266_s7 + $0xb8] sm:$0xff] }
0x1647   :  { %4100 = vtanh.f32 %v2990_v6  ;;  %v3161_v6 = vld [vmem:[%s5266_s7 + $0x30] sm:$0xff] }
0x1648   :  { %3219 = vmatpush.msra.mxu2 %v3161_v6 }
0x164c   :  { %v2664_v50 = vpop.permute.xlu1 %2663 }
0x164d   :  { %v4101_v1 = vpop.eup %4100  ;;  %2666 = vst.msk [vmem:[#allocation4 + $0xc] sm:$0xf] %vm2207_vm14, %v2664_v50  ;;  %v3177_v50 = vld [vmem:[%s5266_s7 + $0xb0] sm:$0xff] }
0x164e   :  { %v2992_v25 = vmul.f32 %v4101_v1, %v2979_v51  ;;  %v3185_v51 = vld [vmem:[%s5266_s7 + $0xf0] sm:$0xff]  ;;  %v3160_v1 = vld [vmem:[%s5266_s7 + $0x28] sm:$0xff] }
0x164f   :  { %3191 = vmatpush.msrb.mxu1 %v3185_v51  ;;  %3220 = vmatpush.msra.mxu2 %v3160_v1 }
0x1650   :  { %v2993_v33 = vsel %vm5276_vm3, %v2992_v25, 0.0  ;;  %v3176_v25 = vld [vmem:[%s5266_s7 + $0xa8] sm:$0xff] }
0x1651   :  { %2994 = vst.msk [vmem:[#allocation4] sm:$0xf] %vm2207_vm14, %v2993_v33  ;;  %3192 = vmatpush.msrb.mxu1 %v3184_v17  ;;  %v3159_v33 = vld [vmem:[%s5266_s7 + $0x20] sm:$0xff] }
0x1652   :  { %3221 = vmatpush.msra.mxu2 %v3159_v33 }
0x1653   :  { %3193 = vmatpush.msrb.mxu1 %v3183_v8 }
0x1654   :  { %v2046_v7 = vpop.permute.xlu1 %2045  ;;  %v2996_v59 = vld [vmem:[#allocation4 + $0x8] sm:$0xff] }
0x1655   :  { %v2048_v11 = vsel %vm5277_vm2, %v2046_v7, 0.0  ;;  %3194 = vmatpush.msrb.mxu1 %v3182_v53  ;;  %v3175_v7 = vld [vmem:[%s5266_s7 + $0xa0] sm:$0xff] }
0x1656   :  { %2049 = vst.msk [vmem:[#allocation4 + $0x1c] sm:$0xf] %vm5278_vm15, %v2048_v11  ;;  %v3158_v11 = vld [vmem:[%s5266_s7 + $0x18] sm:$0xff] }
0x1657   :  { %2208 = vst.msk [vmem:[#allocation4 + $0x1c] sm:$0xf] %vm2207_vm14, %v4968_v34  ;;  %vm3091_vm14 = vcmask 261120   ;;  %3195 = vmatpush.msrb.mxu1 %v3181_v41  ;;  %3222 = vmatpush.msra.mxu2 %v3158_v11 }
0x1658   :  { %v2995_v62 = vld [vmem:[#allocation4] sm:$0xff] }
0x1659   :  { %3032 = vmatmul.f32.vlgmr.msra.gmra.mxu3 %v2995_v62  ;;  %3196 = vmatpush.msrb.mxu1 %v3180_v54 }
0x165b   :  { %3197 = vmatpush.msrb.mxu1 %v3179_v63 }
0x165d   :  { %3198 = vmatpush.msrb.mxu1 %v3178_v47 }
0x165e   :  { %v2998_v13 = vld [vmem:[#allocation4 + $0x18] sm:$0xff] }
0x165f   :  { %3199 = vmatpush.msrb.mxu1 %v3177_v50 }
0x1661   :  { %3035 = vmatmul.f32.gmra.mxu3 %v2996_v59  ;;  %3200 = vmatpush.msrb.mxu1 %v3176_v25 }
0x1663   :  { %3201 = vmatpush.msrb.mxu1 %v3175_v7 }
0x1669   :  { %3038 = vmatmul.f32.gmra.mxu3 %v2997_v30 }
0x1671   :  { %3041 = vmatmul.f32.gmra.mxu3 %v2998_v13 }
0x16dc   :  { %v3033_v60 = vpop.f32.mrf.mxu3 }
0x16e4   :  { %v3036_v43 = vpop.f32.mrf.mxu3 }
0x16e5   :  { %4102 = vtanh.f32 %v3036_v43  ;;  %v3155_v43 = vld [vmem:[%s5266_s7] sm:$0xff] }
0x16e6   :  { %4104 = vtanh.f32 %v3033_v60  ;;  %v3172_v60 = vld [vmem:[%s5266_s7 + $0x88] sm:$0xff] }
0x16eb   :  { %v4103_v14 = vpop.eup %4102 }
0x16ec   :  { %v3039_v42 = vpop.f32.mrf.mxu3  ;;  %v3051_v10 = vmul.f32 %v4103_v14, %v3940_v52  ;;  %v4105_v18 = vpop.eup %4104 }
0x16ed   :  { %4106 = vtanh.f32 %v3039_v42  ;;  %v3050_v2 = vmul.f32 %v4105_v18, %v3940_v52 }
0x16ee   :  { %3056 = vadd.xlane.f32.xlu2 %v3051_v10 }
0x16f3   :  { %v4107_v34 = vpop.eup %4106 }
0x16f4   :  { %v3042_v19 = vpop.f32.mrf.mxu3  ;;  %v3052_v3 = vmul.f32 %v4107_v34, %v3940_v52 }
0x16f5   :  { %4108 = vtanh.f32 %v3042_v19 }
0x16f6   :  { %3054 = vadd.xlane.f32.xlu2 %v3050_v2  ;;  %3058 = vadd.xlane.f32.xlu1 %v3052_v3 }
0x16fb   :  { %v4109_v4 = vpop.eup %4108 }
0x16fc   :  { %v3053_v56 = vmul.f32 %v4109_v4, %v3940_v52  ;;  %v3171_v52 = vld [vmem:[%s5266_s7 + $0x80] sm:$0xff] }
0x16fe   :  { %3060 = vadd.xlane.f32.xlu0 %v3053_v56 }
0x1761   :  { %v3057_v20 = vpop.xlane.xlu2 %3056 }
0x1762   :  { %v3064_v22 = vmul.f32 1.442695, %v3057_v20 }
0x1769   :  { %v3059_v61 = vpop.xlane.xlu1 %3058  ;;  %v3055_v21 = vpop.xlane.xlu2 %3054 }
0x176a   :  { %v3066_v32 = vmul.f32 1.442695, %v3059_v61  ;;  %v3062_v28 = vmul.f32 1.442695, %v3055_v21  ;;  %v3941_v21 = vld [vmem:[%s5266_s7 + $0x100] ss:$0 sm:$0xff] }
0x176c   :  { %4110 = vpow2.f32 %v3066_v32 }
0x1771   :  { %v3061_v15 = vpop.xlane.xlu0 %3060 }
0x1772   :  { %v3068_v26 = vmul.f32 1.442695, %v3061_v15  ;;  %v4111_v57 = vpop.eup %4110 }
0x1773   :  { %v3089_v38 = vmul.f32 %v4111_v57, %v2997_v30  ;;  %v3173_v30 = vld [vmem:[%s5266_s7 + $0x90] sm:$0xff] }
0x1774   :  { %4112 = vpow2.f32 %v3068_v26 }
0x1775   :  { %4114 = vpow2.f32 %v3064_v22 }
0x1776   :  { %4116 = vpow2.f32 %v3062_v28 }
0x177a   :  { %v4113_v5 = vpop.eup %4112 }
0x177b   :  { %v3090_v36 = vmul.f32 %v4113_v5, %v2998_v13  ;;  %v4115_v37 = vpop.eup %4114  ;;  %v3156_v13 = vld [vmem:[%s5266_s7 + $0x8] sm:$0xff] }
0x177c   :  { %v4117_v40 = vpop.eup %4116  ;;  %v3088_v58 = vmul.f32 %v4115_v37, %v2996_v59  ;;  %v3157_v59 = vld [vmem:[%s5266_s7 + $0x10] sm:$0xff] }
0x177d   :  { %3107 = vmatpush.msrb.mxu0 %v3090_v36  ;;  %v3087_v0 = vmul.f32 %v4117_v40, %v2995_v62  ;;  %v3174_v62 = vld [vmem:[%s5266_s7 + $0x98] sm:$0xff]  ;;  %3223 = vmatpush.msra.mxu2 %v3157_v59 }
0x177e   :  { %3202 = vmatpush.msrb.mxu1 %v3174_v62 }
0x177f   :  { %3108 = vmatpush.msrb.mxu0 %v3089_v38  ;;  %3224 = vmatpush.msra.mxu2 %v3156_v13 }
0x1780   :  { %3203 = vmatpush.msrb.mxu1 %v3173_v30 }
0x1781   :  { %3109 = vmatpush.msrb.mxu0 %v3088_v58  ;;  %3225 = vmatpush.msra.mxu2 %v3155_v43 }
0x1782   :  { %3204 = vmatpush.msrb.mxu1 %v3172_v60 }
0x1783   :  { %3110 = vmatpush.msrb.mxu0 %v3087_v0 }
0x1784   :  { %3818 = vmatmul.msk.f32.vlgmr.msrb.gmra.mxu0 %vm3091_vm14, %v3817_v24  ;;  %3205 = vmatpush.msrb.mxu1 %v3171_v52 }
0x1785   :  { %3127 = vmatpush.msra.mxu0 %v4113_v5 }
0x1787   :  { %3128 = vmatpush.msra.mxu0 %v4111_v57 }
0x1789   :  { %3129 = vmatpush.msra.mxu0 %v4115_v37 }
0x178b   :  { %3130 = vmatpush.msra.mxu0 %v4117_v40 }
0x178c   :  { %3819 = vmatmul.msk.f32.vlgmr.msra.gmra.mxu0 %vm3091_vm14, %v3817_v24 }
0x1801   :  { %v3112_v55 = vpop.f32.mrf.mxu0 }
0x1809   :  { %v3132_v29 = vpop.f32.mrf.mxu0 }
0x180a   :  { %3137 = vperm.xlu0 %3939, %v3132_v29  }
0x187c   :  { %v3138_v14 = vpop.permute.xlu0 %3137 }
0x187d   :  { %4118 = vrcp.f32 %v3138_v14  ;;  %v3151_v34 = vand.u32 2147483648, %v3138_v14  ;;  %v3149_v2 = vand.u32 2147483647, %v3138_v14  ;;  %vm3145_vm4 = vweird.f32 %v3138_v14 }
0x187f   :  { %v3152_v4 = vor.u32 1.1754944e-38, %v3151_v34  ;;  %vm3150_vm5 = vcmp.eq.f32.partialorder %v3149_v2, 8.507059e+37 }
0x1883   :  { %v4119_v42 = vpop.eup %4118 }
0x1884   :  { %v3141_v10 = vmul.f32 %v4119_v42, %v3138_v14  ;;  %vm3146_vm8 = vweird.f32 %v4119_v42 }
0x1885   :  { %vm3147_vm1 = vmor %vm3145_vm4, %vm3146_vm8 }
0x1886   :  { %v3142_v18 = vsub.f32 1.0, %v3141_v10 }
0x1888   :  { %v3143_v19 = vmul.f32 %v4119_v42, %v3142_v18 }
0x188a   :  { %v3144_v3 = vadd.f32 %v4119_v42, %v3143_v19 }
0x188c   :  { %v3148_v56 = vsel %vm3147_vm1, %v4119_v42, %v3144_v3 }
0x188d   :  { %v3153_v20 = vsel %vm3150_vm5, %v3152_v4, %v3148_v56 }
0x188e   :  { %v3154_v61 = vmul.f32 %v3153_v20, %v3112_v55 }
0x1890   :  { %v3188_v32 = vrot.slane %v3154_v61, 2  ;;  %3226 = vmatmul.f32.vlgmr.msra.gmra.mxu2 %v3154_v61 }
0x1892   :  { %3206 = vmatmul.f32.vlgmr.msrb.gmra.mxu1 %v3188_v32 }
0x190f   :  { %v3207_v15 = vpop.f32.mrf.mxu1 }
0x1913   :  { %v3227_v22 = vpop.f32.mrf.mxu2 }
0x1914   :  { %v3228_v26 = vadd.f32 %v3227_v22, %v3207_v15 }
0x1916   :  { %v3232_v28 = vadd.f32 %v3941_v21, %v3228_v26 }
0x1918   :  { %3234 = vst.msk [vmem:[#allocation13] sm:$0x3] %vm3233_vm6, %v3232_v28 }
0x1919   :  { %3245 = dma.vmem_to_hbm [thread:$0]  %s3241_s4, 32, %s3243_s0, [#allocation7]  }
0x191a   :  { %4235 = dma.done.wait [#allocation7], 32  }
0x191b   :  { %4236 = vsyncadd [#allocation7], 4294967264 }
0x191c   :  { %3250 = vsyncpa [#allocation6], 1 }
0x191d   :  { %3251 = vsyncpa [#allocation11], 1 }
0x191e   :  { %3252 = vsyncpa [#allocation7], 1 }
0x191f   :  { %3253 = vsyncpa [#allocation8], 1 }

</bundles_post_ra>
